<compile_context>
chip_gen: v6e
topology: v6e:2x2x1
jax: 0.10.0
libtpu: 0.0.40
codegen_flags: <defaults>
</compile_context>

<pallas_src>
import jax
import jax.numpy as jnp
from jax import lax
from jax.experimental import pallas as pl
from jax.experimental.pallas import tpu as pltpu

NEG_BIG = -1e30   # stand-in for -inf (avoids inf-inf = nan in the online max update)
LANE = 128


def _round_up(x, m):
    return (x + m - 1) // m * m


# --------------------------------------------------------------------------- #
# Kernel 1: edge loop — online segment softmax + weighted scatter of edge feats
#   grid = (2 phases, n_edge_tiles), both axes "arbitrary" (shared resident state)
#     phase 0: running per-destination-node max / sum-exp of the logits
#     phase 1: alpha = softmax(logit | dst);  c[v] += sum_e one_hot[e,v]*alpha_e*ef_e
#   outputs: c (V, Fp) accumulator (resident), m (1, V) running max (used to
#            detect nodes with no incoming real edge downstream).
# --------------------------------------------------------------------------- #
def edge_softmax_scatter_kernel(dst_ref, logit_ref, ef_ref,
                                c_ref, m_ref, l_scr):
    f32 = jnp.float32
    bf16 = jnp.bfloat16
    phase = pl.program_id(0)
    tile = pl.program_id(1)

    Et = dst_ref.shape[0]
    V = m_ref.shape[1]

    @pl.when(jnp.logical_and(phase == 0, tile == 0))
    def _init():
        m_ref[...] = jnp.full(m_ref.shape, NEG_BIG, dtype=f32)
        l_scr[...] = jnp.zeros(l_scr.shape, dtype=f32)
        c_ref[...] = jnp.zeros(c_ref.shape, dtype=f32)

    # In-register one-hot for this edge tile: oh[e, v] = (dst[e] == v).
    dst = dst_ref[...]                                           # (Et, 1) int32
    v_ids = lax.broadcasted_iota(jnp.int32, (Et, V), 1)
    oh = dst == v_ids                                            # (Et, V) bool
    logit = logit_ref[...]                                       # (Et, 1) f32

    # --- phase 0: online segment max / sum-exp over destination nodes ---------
    @pl.when(phase == 0)
    def _stats():
        masked = jnp.where(oh, logit, NEG_BIG)                   # (Et, V)
        tile_max = jnp.max(masked, axis=0, keepdims=True)        # (1, V)
        m_old = m_ref[...]
        m_new = jnp.maximum(m_old, tile_max)
        # gather running max back to edges (each row of oh has exactly one True)
        m_edge = jnp.sum(jnp.where(oh, m_new, 0.0), axis=1, keepdims=True)
        p = jnp.exp(logit - m_edge)                              # (Et, 1)
        l_tile = jnp.sum(jnp.where(oh, p, 0.0), axis=0, keepdims=True)
        l_scr[...] = l_scr[...] * jnp.exp(m_old - m_new) + l_tile
        m_ref[...] = m_new

    # --- phase 1: alpha = softmax(logit | dst), scatter-add alpha*ef ----------
    @pl.when(phase == 1)
    def _scatter():
        m_row = m_ref[...]
        l_row = l_scr[...]
        m_edge = jnp.sum(jnp.where(oh, m_row, 0.0), axis=1, keepdims=True)
        l_edge = jnp.sum(jnp.where(oh, l_row, 0.0), axis=1, keepdims=True)
        p = jnp.exp(logit - m_edge)
        inv_l = pl.reciprocal(jnp.maximum(l_edge, 1e-30), approx=True)   # EUP
        alpha = jnp.where(l_edge > 0.0, p * inv_l, 0.0)                  # (Et, 1)

        # Edge Linear is hoisted out of the loop; scatter alpha*ef only.
        # bf16 MXU operands (one-hot is exact in bf16), f32 accumulation.
        msg = (alpha * ef_ref[...]).astype(bf16)                          # (Et, Fp)
        c_ref[...] += lax.dot_general(
            oh.astype(bf16), msg,
            dimension_numbers=(((0,), (0,)), ((), ())),
            preferred_element_type=f32)                                   # (V, Fp)


# --------------------------------------------------------------------------- #
# Kernel 2: single-shot finalize — edge Linear, ELU, fused GRUCell, ReLU.
#   Runs once; keeping it in a separate call keeps node_feats / GRU weights out
#   of the edge-loop VMEM budget.  f32 matmuls (they execute exactly once).
# --------------------------------------------------------------------------- #
def elu_gru_kernel(c_ref, mask_ref, node_ref, w_et_ref, b_et_ref,
                   w_i_ref, w_h_ref, b_g_ref, out_ref):
    f32 = jnp.float32
    Np = node_ref.shape[1]

    c = c_ref[...]                                               # (V, Fp) = sum alpha*ef
    mask = mask_ref[...]                                         # (V, 1)  1.0 iff node has edges
    # Hoisted edge Linear; bias only for nodes that actually received messages.
    cpre = (jnp.dot(c, w_et_ref[...], preferred_element_type=f32)
            + b_et_ref[...] * mask)                              # (V, Hp)
    context = jnp.where(cpre > 0, cpre, jnp.exp(cpre) - 1.0)     # ELU

    hv = node_ref[...]                                           # (V, Np)
    b_g = b_g_ref[...]                                           # (2, 3*Np) = [b_i ; b_h]
    gi = jnp.dot(context, w_i_ref[...], preferred_element_type=f32) + b_g[0:1, :]
    gh = jnp.dot(hv, w_h_ref[...], preferred_element_type=f32) + b_g[1:2, :]
    r = jax.nn.sigmoid(gi[:, :Np] + gh[:, :Np])
    z = jax.nn.sigmoid(gi[:, Np:2 * Np] + gh[:, Np:2 * Np])
    n = jnp.tanh(gi[:, 2 * Np:] + r * gh[:, 2 * Np:])
    h = (1.0 - z) * n + z * hv
    out_ref[...] = jnp.maximum(h, 0.0)


# --------------------------------------------------------------------------- #
# Wrapper
# --------------------------------------------------------------------------- #
def attentive_gru1_pallas(edge_logits, edge_feats, node_feats, dst, params,
                          *, edge_tile=256):
    """edge_tile: 256 matches the v6e/v7x MXU (2x256x256); use 128 on v5e."""
    E, F = edge_feats.shape
    V, N = node_feats.shape
    H = params["wet"].shape[1]
    Fp, Hp, Np = _round_up(F, LANE), _round_up(H, LANE), _round_up(N, LANE)
    Et = edge_tile
    assert Et % 8 == 0, "edge tile must be a multiple of 8"
    Ep = _round_up(E, Et)
    f32 = jnp.float32

    # --- pad edges; dummy edges (logit=NEG_BIG, ef=0, dst=0) contribute nothing.
    ef = jnp.pad(edge_feats.astype(f32), ((0, Ep - E), (0, Fp - F)))
    logits = jnp.pad(edge_logits.astype(f32).reshape(E, 1), ((0, Ep - E), (0, 0)),
                     constant_values=NEG_BIG)
    dst_col = jnp.pad(dst.astype(jnp.int32).reshape(E, 1), ((0, Ep - E), (0, 0)))

    n_tiles = Ep // Et
    grid = (2, n_tiles)   # (softmax-stats phase | scatter phase) x edge tiles

    # Explicit VMEM budget: double-buffered streamed edge tiles + resident
    # (V,Fp) accumulator + stats rows, with ~50% headroom.
    k1_bytes = (2 * (Et * 4 + Et * 4 + Et * Fp * 4)        # dst, logit, ef (x2 buffers)
                + 2 * (V * Fp * 4 + V * 4)                  # c, m outputs
                + V * 4)                                    # l scratch
    k1_vmem = max(4 << 20, min(100 << 20, int(k1_bytes * 1.5) + (2 << 20)))

    c_pad, m_row = pl.pallas_call(
        edge_softmax_scatter_kernel,
        out_shape=(jax.ShapeDtypeStruct((V, Fp), f32),
                   jax.ShapeDtypeStruct((1, V), f32)),
        grid_spec=pltpu.PrefetchScalarGridSpec(
            num_scalar_prefetch=0,
            grid=grid,
            in_specs=[
                pl.BlockSpec((Et, 1), lambda p, e: (e, 0)),          # dst indices
                pl.BlockSpec((Et, 1), lambda p, e: (e, 0)),          # edge logits
                # phase-aware map: phase 0 never reads ef -> pin block 0, stream in phase 1 only
                pl.BlockSpec((Et, Fp), lambda p, e: (p * e, 0)),     # edge feats
            ],
            out_specs=(pl.BlockSpec((V, Fp), lambda p, e: (0, 0)),   # context accumulator
                       pl.BlockSpec((1, V), lambda p, e: (0, 0))),   # running per-node max
            scratch_shapes=[pltpu.VMEM((1, V), f32)],                # running per-node sum-exp
        ),
        compiler_params=pltpu.CompilerParams(
            dimension_semantics=("arbitrary", "arbitrary"),
            vmem_limit_bytes=k1_vmem),
    )(dst_col, logits, ef)

    # Nodes whose running max never rose above NEG_BIG received no real edge
    # (dummy padding edges all carry logit=NEG_BIG) -> suppress the edge-Linear bias.
    mask = (m_row[0] > 0.5 * NEG_BIG).astype(f32)[:, None]           # (V, 1)

    # --- pad / fuse parameters for the finalize kernel (all lane-dense).
    nf = jnp.pad(node_feats.astype(f32), ((0, 0), (0, Np - N)))
    w_et = jnp.pad(params["wet"], ((0, Fp - F), (0, Hp - H)))
    b_et = jnp.pad(params["bet"], ((0, 0), (0, Hp - H)))
    pad_i = lambda w: jnp.pad(w, ((0, Hp - H), (0, Np - N)))         # (H,N) -> (Hp,Np)
    pad_h = lambda w: jnp.pad(w, ((0, Np - N), (0, Np - N)))         # (N,N) -> (Np,Np)
    pad_b = lambda b: jnp.pad(b, ((0, 0), (0, Np - N)))              # (1,N) -> (1,Np)
    w_i = jnp.concatenate([pad_i(params["wir"]), pad_i(params["wiz"]), pad_i(params["win"])], axis=1)
    w_h = jnp.concatenate([pad_h(params["whr"]), pad_h(params["whz"]), pad_h(params["whn"])], axis=1)
    b_i = jnp.concatenate([pad_b(params["bir"]), pad_b(params["biz"]), pad_b(params["bin"])], axis=1)
    b_h = jnp.concatenate([pad_b(params["bhr"]), pad_b(params["bhz"]), pad_b(params["bhn"])], axis=1)
    b_g = jnp.concatenate([b_i, b_h], axis=0)                        # (2, 3*Np)

    k2_bytes = (V * Fp + V + V * Np + Fp * Hp + Hp
                + Hp * 3 * Np + Np * 3 * Np + 2 * 3 * Np
                + V * Np + 3 * V * 3 * Np) * 4
    k2_vmem = max(4 << 20, min(100 << 20, int(k2_bytes * 2) + (2 << 20)))

    out_padded = pl.pallas_call(
        elu_gru_kernel,
        out_shape=jax.ShapeDtypeStruct((V, Np), f32),
        grid=(1,),
        in_specs=[
            pl.BlockSpec((V, Fp), lambda i: (0, 0)),        # context accumulator
            pl.BlockSpec((V, 1), lambda i: (0, 0)),         # has-edges mask
            pl.BlockSpec((V, Np), lambda i: (0, 0)),        # node feats
            pl.BlockSpec((Fp, Hp), lambda i: (0, 0)),       # W_edge
            pl.BlockSpec((1, Hp), lambda i: (0, 0)),        # b_edge
            pl.BlockSpec((Hp, 3 * Np), lambda i: (0, 0)),   # W_i (r|z|n)
            pl.BlockSpec((Np, 3 * Np), lambda i: (0, 0)),   # W_h (r|z|n)
            pl.BlockSpec((2, 3 * Np), lambda i: (0, 0)),    # [b_i ; b_h]
        ],
        out_specs=pl.BlockSpec((V, Np), lambda i: (0, 0)),
        compiler_params=pltpu.CompilerParams(
            dimension_semantics=("arbitrary",),
            vmem_limit_bytes=k2_vmem),
    )(c_pad, mask, nf, w_et, b_et, w_i, w_h, b_g)

    return out_padded[:, :N]


# --------------------------------------------------------------------------- #
# Pure-JAX reference (mirrors the DGL semantics, eval mode) + synthetic params
# --------------------------------------------------------------------------- #
def attentive_gru1_ref(edge_logits, edge_feats, node_feats, dst, params):
    V = node_feats.shape[0]
    lg = edge_logits[:, 0]
    m = jax.ops.segment_max(lg, dst, num_segments=V)
    ex = jnp.exp(lg - m[dst])
    den = jax.ops.segment_sum(ex, dst, num_segments=V)
    alpha = (ex / den[dst])[:, None]
    e_t = edge_feats @ params["wet"] + params["bet"]
    msg = alpha * e_t
    c = jax.ops.segment_sum(msg, dst, num_segments=V)
    context = jnp.where(c > 0, c, jnp.exp(c) - 1.0)
    r = jax.nn.sigmoid(context @ params["wir"] + params["bir"]
                       + node_feats @ params["whr"] + params["bhr"])
    z = jax.nn.sigmoid(context @ params["wiz"] + params["biz"]
                       + node_feats @ params["whz"] + params["bhz"])
    n = jnp.tanh(context @ params["win"] + params["bin"]
                 + r * (node_feats @ params["whn"] + params["bhn"]))
    h = (1.0 - z) * n + z * node_feats
    return jnp.maximum(h, 0.0)


def make_params(key, F, H, N):
    def uni(k, shape, fan_in):
        bound = 1.0 / jnp.sqrt(jnp.float32(fan_in))
        return jax.random.uniform(k, shape, jnp.float32, -bound, bound)

    ks = jax.random.split(key, 16)
    p = {}
    p["wet"] = uni(ks[0], (F, H), F);  p["bet"] = uni(ks[1], (1, H), F)
    p["wir"] = uni(ks[2], (H, N), N);  p["wiz"] = uni(ks[3], (H, N), N);  p["win"] = uni(ks[4], (H, N), N)
    p["whr"] = uni(ks[5], (N, N), N);  p["whz"] = uni(ks[6], (N, N), N);  p["whn"] = uni(ks[7], (N, N), N)
    p["bir"] = uni(ks[8], (1, N), N);  p["biz"] = uni(ks[9], (1, N), N);  p["bin"] = uni(ks[10], (1, N), N)
    p["bhr"] = uni(ks[11], (1, N), N); p["bhz"] = uni(ks[12], (1, N), N); p["bhn"] = uni(ks[13], (1, N), N)
    return p


if __name__ == "__main__":
    # Small but multi-tile: E=600 pads to 768 (3 edge tiles of 256) over V=24 nodes.
    V, E = 24, 600               # nodes / edges
    F, H, N = 24, 40, 48         # edge_feat_size, edge_hidden_size, node_feat_size

    key = jax.random.PRNGKey(0)
    k_lg, k_ef, k_nf, k_dst, k_par = jax.random.split(key, 5)

    edge_logits = jax.random.normal(k_lg, (E, 1), jnp.float32)
    edge_feats = jax.random.normal(k_ef, (E, F), jnp.float32)
    node_feats = jax.random.normal(k_nf, (V, N), jnp.float32)
    dst = jax.random.randint(k_dst, (E,), 0, V)
    params = make_params(k_par, F, H, N)

    out = attentive_gru1_pallas(edge_logits, edge_feats, node_feats, dst, params,
                                edge_tile=256)
    out = jax.block_until_ready(out)

    ref = jax.block_until_ready(attentive_gru1_ref(edge_logits, edge_feats, node_feats, dst, params))
    assert out.shape == (V, N) and out.dtype == jnp.float32
    # Tolerance 1e-2: the scatter matmul uses bf16 MXU operands (f32 accumulation)
    # and the softmax normalization uses the EUP approx reciprocal.
    assert jnp.allclose(out, ref, atol=1e-2, rtol=1e-2), "mismatch vs JAX reference"

    print("KERNEL_OK")
</pallas_src>

<mosaic_0001>
module attributes {stable_mosaic.version = 11 : i64} {
  func.func @edge_softmax_scatter_kernel(%arg0: i32, %arg1: i32, %arg2: memref<256x1xi32, #tpu.memory_space<vmem>>, %arg3: memref<256x1xf32, #tpu.memory_space<vmem>>, %arg4: memref<256x128xf32, #tpu.memory_space<vmem>>, %arg5: memref<24x128xf32, #tpu.memory_space<vmem>>, %arg6: memref<1x24xf32, #tpu.memory_space<vmem>>, %arg7: memref<1x24xf32, #tpu.memory_space<vmem>>) attributes {dimension_semantics = [#tpu.dimension_semantics<arbitrary>, #tpu.dimension_semantics<arbitrary>], iteration_bounds = array<i64: 2, 3>, scalar_prefetch = 0 : i64, scratch_operands = 1 : i64, tpu.core_type = #tpu.core_type<tc>, window_params = [{transform_indices = @transform_0, window_bounds = array<i64: 256, 1>}, {transform_indices = @transform_1, window_bounds = array<i64: 256, 1>}, {transform_indices = @transform_2, window_bounds = array<i64: 256, 128>}, {pipeline_mode = #tpu.pipeline_mode<synchronous>, transform_indices = @transform_3, window_bounds = array<i64: 24, 128>}, {pipeline_mode = #tpu.pipeline_mode<synchronous>, transform_indices = @transform_4, window_bounds = array<i64: 1, 24>}]} {
    %c0_i32 = arith.constant 0 : i32
    %0 = arith.cmpi eq, %arg0, %c0_i32 : i32
    %c0_i32_0 = arith.constant 0 : i32
    %1 = arith.cmpi eq, %arg1, %c0_i32_0 : i32
    %2 = arith.andi %0, %1 : i1
    %3 = arith.extui %2 : i1 to i32
    %c0_i32_1 = arith.constant 0 : i32
    %4 = arith.cmpi ne, %3, %c0_i32_1 : i32
    scf.if %4 {
      %cst = arith.constant -1.000000e+30 : f32
      %16 = vector.broadcast %cst : f32 to vector<1x24xf32>
      %c0_8 = arith.constant 0 : index
      %c0_9 = arith.constant 0 : index
      %17 = vector.load %arg6[%c0_8, %c0_9] : memref<1x24xf32, #tpu.memory_space<vmem>>, vector<1x24xf32>
      tpu.vector_store %arg6[%c0_8, %c0_9], %16 {strides = array<i32>} : memref<1x24xf32, #tpu.memory_space<vmem>>, vector<1x24xf32>,
      %cst_10 = arith.constant 0.000000e+00 : f32
      %18 = vector.broadcast %cst_10 : f32 to vector<1x24xf32>
      %c0_11 = arith.constant 0 : index
      %c0_12 = arith.constant 0 : index
      %19 = vector.load %arg7[%c0_11, %c0_12] : memref<1x24xf32, #tpu.memory_space<vmem>>, vector<1x24xf32>
      tpu.vector_store %arg7[%c0_11, %c0_12], %18 {strides = array<i32>} : memref<1x24xf32, #tpu.memory_space<vmem>>, vector<1x24xf32>,
      %cst_13 = arith.constant 0.000000e+00 : f32
      %20 = vector.broadcast %cst_13 : f32 to vector<24x128xf32>
      %c0_14 = arith.constant 0 : index
      %c0_15 = arith.constant 0 : index
      %21 = vector.load %arg5[%c0_14, %c0_15] : memref<24x128xf32, #tpu.memory_space<vmem>>, vector<24x128xf32>
      tpu.vector_store %arg5[%c0_14, %c0_15], %20 {strides = array<i32>} : memref<24x128xf32, #tpu.memory_space<vmem>>, vector<24x128xf32>,
    } else {
    }
    %c0 = arith.constant 0 : index
    %c0_2 = arith.constant 0 : index
    %5 = vector.load %arg2[%c0, %c0_2] : memref<256x1xi32, #tpu.memory_space<vmem>>, vector<256x1xi32>
    %6 = tpu.iota {dimensions = array<i32: 1>} : vector<256x24xi32>
    %7 = vector.broadcast %5 : vector<256x1xi32> to vector<256x24xi32>
    %8 = arith.cmpi eq, %7, %6 : vector<256x24xi32>
    %c0_3 = arith.constant 0 : index
    %c0_4 = arith.constant 0 : index
    %9 = vector.load %arg3[%c0_3, %c0_4] : memref<256x1xf32, #tpu.memory_space<vmem>>, vector<256x1xf32>
    %c0_i32_5 = arith.constant 0 : i32
    %10 = arith.cmpi eq, %arg0, %c0_i32_5 : i32
    %11 = arith.extui %10 : i1 to i32
    %c0_i32_6 = arith.constant 0 : i32
    %12 = arith.cmpi ne, %11, %c0_i32_6 : i32
    scf.if %12 {
      %cst = arith.constant -1.000000e+30 : f32
      %16 = vector.shape_cast %9 : vector<256x1xf32> to vector<256x1xf32>
      %17 = vector.broadcast %16 : vector<256x1xf32> to vector<256x24xf32>
      %18 = vector.broadcast %cst : f32 to vector<256x24xf32>
      %19 = arith.select %8, %17, %18 : vector<256x24xi1>, vector<256x24xf32>
      %cst_8 = arith.constant dense<0xFF800000> : vector<24xf32>
      %20 = vector.multi_reduction <maximumf>, %19, %cst_8 [0] : vector<256x24xf32> to vector<24xf32>
      %21 = vector.shape_cast %20 : vector<24xf32> to vector<1x24xf32>
      %c0_9 = arith.constant 0 : index
      %c0_10 = arith.constant 0 : index
      %22 = vector.load %arg6[%c0_9, %c0_10] : memref<1x24xf32, #tpu.memory_space<vmem>>, vector<1x24xf32>
      %23 = arith.maximumf %22, %21 : vector<1x24xf32>
      %cst_11 = arith.constant 0.000000e+00 : f32
      %24 = vector.shape_cast %23 : vector<1x24xf32> to vector<1x24xf32>
      %25 = vector.broadcast %24 : vector<1x24xf32> to vector<256x24xf32>
      %26 = vector.broadcast %cst_11 : f32 to vector<256x24xf32>
      %27 = arith.select %8, %25, %26 : vector<256x24xi1>, vector<256x24xf32>
      %cst_12 = arith.constant dense<0.000000e+00> : vector<256xf32>
      %28 = vector.multi_reduction <add>, %27, %cst_12 [1] : vector<256x24xf32> to vector<256xf32>
      %29 = vector.shape_cast %28 : vector<256xf32> to vector<256x1xf32>
      %30 = arith.subf %9, %29 : vector<256x1xf32>
      %31 = math.exp %30 : vector<256x1xf32>
      %cst_13 = arith.constant 0.000000e+00 : f32
      %32 = vector.shape_cast %31 : vector<256x1xf32> to vector<256x1xf32>
      %33 = vector.broadcast %32 : vector<256x1xf32> to vector<256x24xf32>
      %34 = vector.broadcast %cst_13 : f32 to vector<256x24xf32>
      %35 = arith.select %8, %33, %34 : vector<256x24xi1>, vector<256x24xf32>
      %cst_14 = arith.constant dense<0.000000e+00> : vector<24xf32>
      %36 = vector.multi_reduction <add>, %35, %cst_14 [0] : vector<256x24xf32> to vector<24xf32>
      %37 = vector.shape_cast %36 : vector<24xf32> to vector<1x24xf32>
      %c0_15 = arith.constant 0 : index
      %c0_16 = arith.constant 0 : index
      %38 = vector.load %arg7[%c0_15, %c0_16] : memref<1x24xf32, #tpu.memory_space<vmem>>, vector<1x24xf32>
      %39 = arith.subf %22, %23 : vector<1x24xf32>
      %40 = math.exp %39 : vector<1x24xf32>
      %41 = arith.mulf %38, %40 : vector<1x24xf32>
      %42 = arith.addf %41, %37 : vector<1x24xf32>
      %c0_17 = arith.constant 0 : index
      %c0_18 = arith.constant 0 : index
      %43 = vector.load %arg7[%c0_17, %c0_18] : memref<1x24xf32, #tpu.memory_space<vmem>>, vector<1x24xf32>
      tpu.vector_store %arg7[%c0_17, %c0_18], %42 {strides = array<i32>} : memref<1x24xf32, #tpu.memory_space<vmem>>, vector<1x24xf32>,
      %c0_19 = arith.constant 0 : index
      %c0_20 = arith.constant 0 : index
      %44 = vector.load %arg6[%c0_19, %c0_20] : memref<1x24xf32, #tpu.memory_space<vmem>>, vector<1x24xf32>
      tpu.vector_store %arg6[%c0_19, %c0_20], %23 {strides = array<i32>} : memref<1x24xf32, #tpu.memory_space<vmem>>, vector<1x24xf32>,
    } else {
    }
    %c1_i32 = arith.constant 1 : i32
    %13 = arith.cmpi eq, %arg0, %c1_i32 : i32
    %14 = arith.extui %13 : i1 to i32
    %c0_i32_7 = arith.constant 0 : i32
    %15 = arith.cmpi ne, %14, %c0_i32_7 : i32
    scf.if %15 {
      %c0_8 = arith.constant 0 : index
      %c0_9 = arith.constant 0 : index
      %16 = vector.load %arg6[%c0_8, %c0_9] : memref<1x24xf32, #tpu.memory_space<vmem>>, vector<1x24xf32>
      %c0_10 = arith.constant 0 : index
      %c0_11 = arith.constant 0 : index
      %17 = vector.load %arg7[%c0_10, %c0_11] : memref<1x24xf32, #tpu.memory_space<vmem>>, vector<1x24xf32>
      %cst = arith.constant 0.000000e+00 : f32
      %18 = vector.shape_cast %16 : vector<1x24xf32> to vector<1x24xf32>
      %19 = vector.broadcast %18 : vector<1x24xf32> to vector<256x24xf32>
      %20 = vector.broadcast %cst : f32 to vector<256x24xf32>
      %21 = arith.select %8, %19, %20 : vector<256x24xi1>, vector<256x24xf32>
      %cst_12 = arith.constant dense<0.000000e+00> : vector<256xf32>
      %22 = vector.multi_reduction <add>, %21, %cst_12 [1] : vector<256x24xf32> to vector<256xf32>
      %23 = vector.shape_cast %22 : vector<256xf32> to vector<256x1xf32>
      %cst_13 = arith.constant 0.000000e+00 : f32
      %24 = vector.shape_cast %17 : vector<1x24xf32> to vector<1x24xf32>
      %25 = vector.broadcast %24 : vector<1x24xf32> to vector<256x24xf32>
      %26 = vector.broadcast %cst_13 : f32 to vector<256x24xf32>
      %27 = arith.select %8, %25, %26 : vector<256x24xi1>, vector<256x24xf32>
      %cst_14 = arith.constant dense<0.000000e+00> : vector<256xf32>
      %28 = vector.multi_reduction <add>, %27, %cst_14 [1] : vector<256x24xf32> to vector<256xf32>
      %29 = vector.shape_cast %28 : vector<256xf32> to vector<256x1xf32>
      %30 = arith.subf %9, %23 : vector<256x1xf32>
      %31 = math.exp %30 : vector<256x1xf32>
      %cst_15 = arith.constant 1.000000e-30 : f32
      %32 = vector.broadcast %cst_15 : f32 to vector<256x1xf32>
      %33 = arith.maximumf %29, %32 : vector<256x1xf32>
      %34 = tpu.reciprocal %33 {approx = true} : vector<256x1xf32> -> vector<256x1xf32>
      %cst_16 = arith.constant 0.000000e+00 : f32
      %35 = vector.broadcast %cst_16 : f32 to vector<256x1xf32>
      %36 = arith.cmpf ogt, %29, %35 : vector<256x1xf32>
      %37 = arith.mulf %31, %34 : vector<256x1xf32>
      %cst_17 = arith.constant 0.000000e+00 : f32
      %38 = vector.broadcast %cst_17 : f32 to vector<256x1xf32>
      %39 = arith.select %36, %37, %38 : vector<256x1xi1>, vector<256x1xf32>
      %c0_18 = arith.constant 0 : index
      %c0_19 = arith.constant 0 : index
      %40 = vector.load %arg4[%c0_18, %c0_19] : memref<256x128xf32, #tpu.memory_space<vmem>>, vector<256x128xf32>
      %41 = vector.broadcast %39 : vector<256x1xf32> to vector<256x128xf32>
      %42 = arith.mulf %41, %40 : vector<256x128xf32>
      %43 = arith.truncf %42 : vector<256x128xf32> to vector<256x128xbf16>
      %c0_20 = arith.constant 0 : index
      %c0_21 = arith.constant 0 : index
      %44 = vector.load %arg5[%c0_20, %c0_21] : memref<24x128xf32, #tpu.memory_space<vmem>>, vector<24x128xf32>
      %45 = arith.extui %8 : vector<256x24xi1> to vector<256x24xi32>
      %46 = arith.sitofp %45 : vector<256x24xi32> to vector<256x24xf32>
      %47 = arith.truncf %46 : vector<256x24xf32> to vector<256x24xbf16>
      %cst_22 = arith.constant dense<0.000000e+00> : vector<24x128xf32>
      %48 = tpu.matmul %47, %43, %cst_22 {dimension_numbers = #tpu.dot_dimension_numbers<[0], [0], [1], [1], [0, 1, 1, 1], [], []>} : vector<256x24xbf16>, vector<256x128xbf16>, vector<24x128xf32> -> vector<24x128xf32>
      %49 = arith.addf %44, %48 : vector<24x128xf32>
      %c0_23 = arith.constant 0 : index
      %c0_24 = arith.constant 0 : index
      %50 = vector.load %arg5[%c0_23, %c0_24] : memref<24x128xf32, #tpu.memory_space<vmem>>, vector<24x128xf32>
      tpu.vector_store %arg5[%c0_23, %c0_24], %49 {strides = array<i32>} : memref<24x128xf32, #tpu.memory_space<vmem>>, vector<24x128xf32>,
    } else {
    }
    return
  }
  func.func @transform_0(%arg0: i32, %arg1: i32) -> (i32, i32) {
    %c0_i32 = arith.constant 0 : i32
    %c0_i32_0 = arith.constant 0 : i32
    return %arg1, %c0_i32 : i32, i32
  }
  func.func @transform_1(%arg0: i32, %arg1: i32) -> (i32, i32) {
    %c0_i32 = arith.constant 0 : i32
    %c0_i32_0 = arith.constant 0 : i32
    return %arg1, %c0_i32 : i32, i32
  }
  func.func @transform_2(%arg0: i32, %arg1: i32) -> (i32, i32) {
    %0 = arith.muli %arg0, %arg1 : i32
    %c0_i32 = arith.constant 0 : i32
    %c0_i32_0 = arith.constant 0 : i32
    return %0, %c0_i32 : i32, i32
  }
  func.func @transform_3(%arg0: i32, %arg1: i32) -> (i32, i32) {
    %c0_i32 = arith.constant 0 : i32
    %c0_i32_0 = arith.constant 0 : i32
    %c0_i32_1 = arith.constant 0 : i32
    return %c0_i32, %c0_i32_0 : i32, i32
  }
  func.func @transform_4(%arg0: i32, %arg1: i32) -> (i32, i32) {
    %c0_i32 = arith.constant 0 : i32
    %c0_i32_0 = arith.constant 0 : i32
    %c0_i32_1 = arith.constant 0 : i32
    return %c0_i32, %c0_i32_0 : i32, i32
  }
}

</mosaic_0001>

<bundles_post_ra>
// kernel: tpu_custom_call.1
= control target key start
LH: loop header
LB: loop body
LE: loop exit
PB: predicated region body
PF: predicated region fallthrough
CT: control target
= control target key end

     0   :  { %10 = vsyncpa [#allocation4], 0  ;;  %s4172_s0 = inlined_call_operand.vmem [shape: s32[768,1], index: 0, kind: input, shape index: {}]   ;;  %s4173_s1 = inlined_call_operand.vmem [shape: f32[768,1], index: 1, kind: input, shape index: {}]   ;;  %s4174_s2 = inlined_call_operand.vmem [shape: f32[768,128], index: 2, kind: input, shape index: {}]   ;;  %s4175_s3 = inlined_call_operand.hbm [shape: f32[24,128], index: 3, kind: output, shape index: {0}]   ;;  %s4176_s4 = inlined_call_operand.hbm [shape: f32[1,24], index: 4, kind: output, shape index: {1}]  }
   0x1   :  { %11 = vsyncpa [#allocation6], 0  ;;  %s2757_s15 = smov 0   ;;  %s2759_s16 = smov 0  }
   0x2   :  { %s2761_s17 = smov 0   ;;  %s2763_s18 = smov 0  }
   0x3   :  { %s2765_s19 = smov 0  }
   0x4 LB: > { %s2268_s20 = sadd.s32 4294967295, %s2720_s19   ;;  %s26_s21 = sadd.s32 1, %s2712_s17  ;;  %s2720_s19 = sphi %s2765_s19, %s17_s19   ;;  %s2716_s18 = sphi %s2763_s18, %s4709_s18   ;;  %s2712_s17 = sphi %s2761_s17, %s4708_s17   ;;  %s2708_s16 = sphi %s2759_s16, %s4707_s16   ;;  %s2704_s15 = sphi %s2757_s15, %s4706_s15  }
   0x5   : > { %p27_p0 = scmp.ge.s32.totalorder %s26_s21, 3  ;;  %s29_s22 = sadd.s32 1, %s2716_s18 }
   0x6   : > { %p2271_p1 = scmp.ge.s32.totalorder %s2720_s19, 1  ;;  %p196_p2 = scmp.lt.s32.totalorder %s2720_s19, 7 }
   0x7   : > { %s4711_s21 = smov (%p27_p0, %s26_s21), 0  ;;  %s4713_s22 = smov (!%p27_p0, %s29_s22), %s2716_s18 }
   0x8   : > { %p197_p3 = pnand %p2271_p1, %p196_p2  ;;  %p31_p4 = scmp.ge.s32.totalorder %s4713_s22, 2 }
   0xa   : > { %s4715_s22 = smov (%p31_p4, %s4713_s22), 0  ;;  %200 = sbr.rel (%p197_p3) target bundleno = 1457 (0x5b1), region = 32 }
   0xf   : > { %s2272_s23 = sshll.u32 %s2704_s15, 5  ;;  %s240_s24 = smul.u32 %s2704_s15, %s2708_s16 }
  0x10   : > { %p229_p5 = scmp.lt.s32.totalorder %s2272_s23, 95  ;;  %p249_p6 = scmp.eq.s32.totalorder %s2708_s16, 0 }
  0x11   : > { %s2276_s25 = sshll.u32 %s240_s24, 5  ;;  %p250_p7 = scmp.eq.s32.totalorder %s2704_s15, 0 }
  0x12   : > { %s4717_s23 = smov (!%p229_p5, %s2272_s23), 95  ;;  %p242_p8 = scmp.lt.s32.totalorder %s2276_s25, 95 }
  0x13   : > { %p251_p9 = pnand %p250_p7, %p249_p6  ;;  %s2273_s26 = sshll.u32 %s4717_s23, 3 }
  0x14   : > { %s2795_s29 = scalar_lea.vmem %s4172_s0, %s2273_s26  ;;  %s2800_s6 = scalar_lea.vmem %s4173_s1, %s2273_s26 }
  0x15   : > { %s4719_s25 = smov (!%p242_p8, %s2276_s25), 95  ;;  %254 = sbr.rel (%p251_p9) target bundleno = 30 (0x1e), region = 36 }
  0x16   : > { %s2277_s7 = sshll.u32 %s4719_s25, 3 }
  0x17   : > { %s2805_s10 = scalar_lea.vmem %s4174_s2, %s2277_s7 }
  0x1a   : > { %vm255_vm0 = vcmask 188416   ;;  %v2722_v0 = vmov -1e+30   ;;  %v2723_v1 = vmov 0.0  }
  0x1b   : > { %256 = vst.msk [vmem:[#allocation5] sm:$0x1] %vm255_vm0, %v2722_v0  ;;  %257 = vst.msk [vmem:[#allocation2] sm:$0x1] %vm255_vm0, %v2723_v1 }
  0x1c   : > { %258 = vst [vmem:[#allocation3] sm:$0xff] %v2723_v1  ;;  %259 = vst [vmem:[#allocation3 + $0x8] sm:$0xff] %v2723_v1 }
  0x1d   : > { %260 = vst [vmem:[#allocation3 + $0x10] sm:$0xff] %v2723_v1 }
  0x1e PF: > { %v263_v2 = vld [vmem:[%s2795_s29 + $0x10] sm:$0xff]  ;;  %v261_v3 = vld [vmem:[%s2795_s29] sm:$0xff]  ;;  %v2724_v4 = vmov 0   ;;  %v264_v5 = vld [vmem:[%s2795_s29 + $0x18] sm:$0xff]  ;;  %p2278_p10 = scmp.ne.s32.totalorder %s2708_s16, 0 }
  0x1f   : > { %2427 = vset.pattern.permute.xlu1 %v2724_v4  ;;  %2426 = vset.pattern.permute.xlu0 %v2724_v4  ;;  %v262_v6 = vld [vmem:[%s2795_s29 + $0x8] sm:$0xff]  ;;  %v265_v8 = vld [vmem:[%s2795_s29 + $0x20] sm:$0xff]  ;;  %v268_v9 = vld [vmem:[%s2795_s29 + $0x38] sm:$0xff] }
  0x20   : > { %302 = vperm.xlu1 %2427, %v263_v2   ;;  %296 = vperm.xlu0 %2426, %v261_v3   ;;  %v266_v7 = vld [vmem:[%s2795_s29 + $0x28] sm:$0xff]  ;;  %v267_v10 = vld [vmem:[%s2795_s29 + $0x30] sm:$0xff]  ;;  %v269_v12 = vld [vmem:[%s2795_s29 + $0x40] sm:$0xff]  ;;  %v4197_v3 = vlaneseq }
  0x21   : > { %v270_v11 = vld [vmem:[%s2795_s29 + $0x48] sm:$0xff]  ;;  %v272_v13 = vld [vmem:[%s2795_s29 + $0x58] sm:$0xff]  ;;  %v271_v14 = vld [vmem:[%s2795_s29 + $0x50] sm:$0xff] }
  0x22   : > { %v274_v15 = vld [vmem:[%s2795_s29 + $0x68] sm:$0xff]  ;;  %v273_v16 = vld [vmem:[%s2795_s29 + $0x60] sm:$0xff]  ;;  %v276_v17 = vld [vmem:[%s2795_s29 + $0x78] sm:$0xff]  ;;  %v2936_v4 = vand.u32 127, %v4197_v3 }
  0x23   : > { %v275_v18 = vld [vmem:[%s2795_s29 + $0x70] sm:$0xff]  ;;  %v278_v19 = vld [vmem:[%s2795_s29 + $0x88] sm:$0xff]  ;;  %v277_v20 = vld [vmem:[%s2795_s29 + $0x80] sm:$0xff] }
  0x24   : > { %305 = vperm.xlu1 %2427, %v264_v5   ;;  %299 = vperm.xlu0 %2426, %v262_v6   ;;  %v280_v21 = vld [vmem:[%s2795_s29 + $0x98] sm:$0xff]  ;;  %v279_v22 = vld [vmem:[%s2795_s29 + $0x90] sm:$0xff]  ;;  %v282_v23 = vld [vmem:[%s2795_s29 + $0xa8] sm:$0xff] }
  0x25   : > { %v281_v24 = vld [vmem:[%s2795_s29 + $0xa0] sm:$0xff]  ;;  %v284_v25 = vld [vmem:[%s2795_s29 + $0xb8] sm:$0xff]  ;;  %v283_v26 = vld [vmem:[%s2795_s29 + $0xb0] sm:$0xff] }
  0x26   : > { %v286_v27 = vld [vmem:[%s2795_s29 + $0xc8] sm:$0xff]  ;;  %v285_v28 = vld [vmem:[%s2795_s29 + $0xc0] sm:$0xff]  ;;  %v288_v29 = vld [vmem:[%s2795_s29 + $0xd8] sm:$0xff] }
  0x27   : > { %v287_v30 = vld [vmem:[%s2795_s29 + $0xd0] sm:$0xff]  ;;  %v290_v31 = vld [vmem:[%s2795_s29 + $0xe8] sm:$0xff]  ;;  %v289_v32 = vld [vmem:[%s2795_s29 + $0xe0] sm:$0xff] }
  0x28   : > { %311 = vperm.xlu1 %2427, %v266_v7   ;;  %308 = vperm.xlu0 %2426, %v265_v8   ;;  %v292_v33 = vld [vmem:[%s2795_s29 + $0xf8] sm:$0xff]  ;;  %v291_v34 = vld [vmem:[%s2795_s29 + $0xf0] sm:$0xff]  ;;  %v2840_v35 = vld [vmem:[%s2800_s6] sm:$0xff]  ;;  %v4359_v7 = vmov 0  ;;  %v4361_v8 = vmov 0 }
  0x29   : > { %4328 = vst [vmem:[#allocation9_spill] sm:$0xff] %v2840_v35  ;;  %v2843_v36 = vld [vmem:[%s2800_s6 + $0x8] sm:$0xff]  ;;  %v2846_v37 = vld [vmem:[%s2800_s6 + $0x10] sm:$0xff]  ;;  %v2849_v38 = vld [vmem:[%s2800_s6 + $0x18] sm:$0xff] }
  0x2a   : > { %4329 = vst [vmem:[#allocation10_spill] sm:$0xff] %v2846_v37  ;;  %4330 = vst [vmem:[#allocation11_spill] sm:$0xff] %v2849_v38  ;;  %v2852_v39 = vld [vmem:[%s2800_s6 + $0x20] sm:$0xff]  ;;  %v2855_v40 = vld [vmem:[%s2800_s6 + $0x28] sm:$0xff] }
  0x2b   : > { %4331 = vst [vmem:[#allocation12_spill] sm:$0xff] %v2852_v39  ;;  %4332 = vst [vmem:[#allocation13_spill] sm:$0xff] %v2855_v40  ;;  %v2858_v41 = vld [vmem:[%s2800_s6 + $0x30] sm:$0xff]  ;;  %v2861_v42 = vld [vmem:[%s2800_s6 + $0x38] sm:$0xff] }
  0x2c   : > { %317 = vperm.xlu1 %2427, %v268_v9   ;;  %314 = vperm.xlu0 %2426, %v267_v10   ;;  %4333 = vst [vmem:[#allocation14_spill] sm:$0xff] %v2858_v41  ;;  %4334 = vst [vmem:[#allocation15_spill] sm:$0xff] %v2861_v42  ;;  %v2864_v43 = vld [vmem:[%s2800_s6 + $0x40] sm:$0xff]  ;;  %v2867_v44 = vld [vmem:[%s2800_s6 + $0x48] sm:$0xff] }
  0x2d   : > { %4335 = vst [vmem:[#allocation16_spill] sm:$0xff] %v2864_v43  ;;  %4336 = vst [vmem:[#allocation17_spill] sm:$0xff] %v2867_v44  ;;  %v2870_v45 = vld [vmem:[%s2800_s6 + $0x50] sm:$0xff]  ;;  %v2873_v46 = vld [vmem:[%s2800_s6 + $0x58] sm:$0xff] }
  0x2e   : > { %4337 = vst [vmem:[#allocation18_spill] sm:$0xff] %v2870_v45  ;;  %4338 = vst [vmem:[#allocation19_spill] sm:$0xff] %v2873_v46  ;;  %v2876_v47 = vld [vmem:[%s2800_s6 + $0x60] sm:$0xff]  ;;  %v2879_v48 = vld [vmem:[%s2800_s6 + $0x68] sm:$0xff] }
  0x2f   : > { %4339 = vst [vmem:[#allocation20_spill] sm:$0xff] %v2876_v47  ;;  %4340 = vst [vmem:[#allocation21_spill] sm:$0xff] %v2879_v48  ;;  %v2882_v49 = vld [vmem:[%s2800_s6 + $0x70] sm:$0xff]  ;;  %v2885_v50 = vld [vmem:[%s2800_s6 + $0x78] sm:$0xff] }
  0x30   : > { %323 = vperm.xlu1 %2427, %v270_v11   ;;  %320 = vperm.xlu0 %2426, %v269_v12   ;;  %4341 = vst [vmem:[#allocation22_spill] sm:$0xff] %v2882_v49  ;;  %4342 = vst [vmem:[#allocation23_spill] sm:$0xff] %v2885_v50  ;;  %v2888_v51 = vld [vmem:[%s2800_s6 + $0x80] sm:$0xff]  ;;  %v2891_v52 = vld [vmem:[%s2800_s6 + $0x88] sm:$0xff]  ;;  %v4363_v11 = vmov 0  ;;  %v4365_v12 = vmov 0 }
  0x31   : > { %4343 = vst [vmem:[#allocation24_spill] sm:$0xff] %v2888_v51  ;;  %4344 = vst [vmem:[#allocation25_spill] sm:$0xff] %v2891_v52  ;;  %v2894_v53 = vld [vmem:[%s2800_s6 + $0x90] sm:$0xff]  ;;  %v2897_v54 = vld [vmem:[%s2800_s6 + $0x98] sm:$0xff] }
  0x32   : > { %4345 = vst [vmem:[#allocation26_spill] sm:$0xff] %v2894_v53  ;;  %4346 = vst [vmem:[#allocation27_spill] sm:$0xff] %v2897_v54  ;;  %v2900_v55 = vld [vmem:[%s2800_s6 + $0xa0] sm:$0xff]  ;;  %v2903_v56 = vld [vmem:[%s2800_s6 + $0xa8] sm:$0xff] }
  0x33   : > { %4347 = vst [vmem:[#allocation28_spill] sm:$0xff] %v2900_v55  ;;  %4348 = vst [vmem:[#allocation29_spill] sm:$0xff] %v2903_v56  ;;  %v2906_v57 = vld [vmem:[%s2800_s6 + $0xb0] sm:$0xff]  ;;  %v2909_v58 = vld [vmem:[%s2800_s6 + $0xb8] sm:$0xff] }
  0x34   : > { %329 = vperm.xlu1 %2427, %v272_v13   ;;  %326 = vperm.xlu0 %2426, %v271_v14   ;;  %4349 = vst [vmem:[#allocation30_spill] sm:$0xff] %v2906_v57  ;;  %4350 = vst [vmem:[#allocation31_spill] sm:$0xff] %v2909_v58  ;;  %v2912_v59 = vld [vmem:[%s2800_s6 + $0xc0] sm:$0xff]  ;;  %v2915_v60 = vld [vmem:[%s2800_s6 + $0xc8] sm:$0xff] }
  0x35   : > { %4351 = vst [vmem:[#allocation32_spill] sm:$0xff] %v2912_v59  ;;  %4352 = vst [vmem:[#allocation33_spill] sm:$0xff] %v2915_v60  ;;  %v2918_v61 = vld [vmem:[%s2800_s6 + $0xd0] sm:$0xff]  ;;  %v2921_v62 = vld [vmem:[%s2800_s6 + $0xd8] sm:$0xff] }
  0x36   : > { %4353 = vst [vmem:[#allocation34_spill] sm:$0xff] %v2918_v61  ;;  %4354 = vst [vmem:[#allocation35_spill] sm:$0xff] %v2921_v62  ;;  %v2924_v63 = vld [vmem:[%s2800_s6 + $0xe0] sm:$0xff]  ;;  %v2927_v0 = vld [vmem:[%s2800_s6 + $0xe8] sm:$0xff] }
  0x37   : > { %4355 = vst [vmem:[#allocation36_spill] sm:$0xff] %v2924_v63  ;;  %4356 = vst [vmem:[#allocation37_spill] sm:$0xff] %v2927_v0  ;;  %v2930_v1 = vld [vmem:[%s2800_s6 + $0xf0] sm:$0xff]  ;;  %v2933_v2 = vld [vmem:[%s2800_s6 + $0xf8] sm:$0xff] }
  0x38   : > { %335 = vperm.xlu1 %2427, %v274_v15   ;;  %332 = vperm.xlu0 %2426, %v273_v16   ;;  %4357 = vst [vmem:[#allocation38_spill] sm:$0xff] %v2930_v1  ;;  %4358 = vst [vmem:[#allocation39_spill] sm:$0xff] %v2933_v2  ;;  %v4367_v15 = vmov 0  ;;  %v4369_v16 = vmov 0 }
  0x3c   : > { %341 = vperm.xlu1 %2427, %v276_v17   ;;  %338 = vperm.xlu0 %2426, %v275_v18  }
  0x40   : > { %347 = vperm.xlu1 %2427, %v278_v19   ;;  %344 = vperm.xlu0 %2426, %v277_v20   ;;  %v4371_v19 = vmov 0  ;;  %v4373_v20 = vmov 0 }
  0x44   : > { %353 = vperm.xlu1 %2427, %v280_v21   ;;  %350 = vperm.xlu0 %2426, %v279_v22  }
  0x48   : > { %359 = vperm.xlu1 %2427, %v282_v23   ;;  %356 = vperm.xlu0 %2426, %v281_v24   ;;  %v4375_v23 = vmov 0  ;;  %v4377_v24 = vmov 0 }
  0x4c   : > { %365 = vperm.xlu1 %2427, %v284_v25   ;;  %362 = vperm.xlu0 %2426, %v283_v26  }
  0x50   : > { %371 = vperm.xlu1 %2427, %v286_v27   ;;  %368 = vperm.xlu0 %2426, %v285_v28   ;;  %v4379_v27 = vmov 0  ;;  %v4381_v28 = vmov 0 }
  0x54   : > { %377 = vperm.xlu1 %2427, %v288_v29   ;;  %374 = vperm.xlu0 %2426, %v287_v30  }
  0x58   : > { %383 = vperm.xlu1 %2427, %v290_v31   ;;  %380 = vperm.xlu0 %2426, %v289_v32   ;;  %v4383_v31 = vmov 0  ;;  %v4386_v32 = vmov 0 }
  0x5c   : > { %389 = vperm.xlu1 %2427, %v292_v33   ;;  %386 = vperm.xlu0 %2426, %v291_v34  }
  0x9b   : > { %v303_v5 = vpop.permute.xlu1 %302  ;;  %v297_v6 = vpop.permute.xlu0 %296 }
  0x9c   : > { %vm2939_vm1 = vcmp.eq.s32.totalorder %v303_v5, %v2936_v4  ;;  %vm2944_vm2 = vcmp.eq.s32.totalorder %v297_v6, %v2936_v4  ;;  %v4389_v5 = vmov 0  ;;  %v4392_v6 = vmov 0 }
  0x9d   : > { %v4360_v7 = vsel %vm2939_vm1, 4294967295, %v4359_v7  ;;  %v4362_v8 = vsel %vm2944_vm2, 4294967295, %v4361_v8 }
  0x9f   : > { %v306_v9 = vpop.permute.xlu1 %305  ;;  %v300_v10 = vpop.permute.xlu0 %299 }
  0xa0   : > { %vm2949_vm3 = vcmp.eq.s32.totalorder %v306_v9, %v2936_v4  ;;  %vm2954_vm4 = vcmp.eq.s32.totalorder %v300_v10, %v2936_v4 }
  0xa1   : > { %v4364_v11 = vsel %vm2949_vm3, 4294967295, %v4363_v11  ;;  %v4366_v12 = vsel %vm2954_vm4, 4294967295, %v4365_v12 }
  0xa3   : > { %v312_v13 = vpop.permute.xlu1 %311  ;;  %v309_v14 = vpop.permute.xlu0 %308 }
  0xa4   : > { %vm2959_vm5 = vcmp.eq.s32.totalorder %v312_v13, %v2936_v4  ;;  %vm2964_vm6 = vcmp.eq.s32.totalorder %v309_v14, %v2936_v4  ;;  %v4395_v13 = vmov 0  ;;  %v4397_v14 = vmov 0 }
  0xa5   : > { %v4368_v15 = vsel %vm2959_vm5, 4294967295, %v4367_v15  ;;  %v4370_v16 = vsel %vm2964_vm6, 4294967295, %v4369_v16 }
  0xa7   : > { %v318_v17 = vpop.permute.xlu1 %317  ;;  %v315_v18 = vpop.permute.xlu0 %314 }
  0xa8   : > { %vm2969_vm7 = vcmp.eq.s32.totalorder %v318_v17, %v2936_v4  ;;  %vm2974_vm8 = vcmp.eq.s32.totalorder %v315_v18, %v2936_v4 }
  0xa9   : > { %v4372_v19 = vsel %vm2969_vm7, 4294967295, %v4371_v19  ;;  %v4374_v20 = vsel %vm2974_vm8, 4294967295, %v4373_v20 }
  0xab   : > { %v324_v21 = vpop.permute.xlu1 %323  ;;  %v321_v22 = vpop.permute.xlu0 %320 }
  0xac   : > { %vm2979_vm9 = vcmp.eq.s32.totalorder %v324_v21, %v2936_v4  ;;  %vm2984_vm10 = vcmp.eq.s32.totalorder %v321_v22, %v2936_v4  ;;  %v4399_v21 = vmov 0  ;;  %v4401_v22 = vmov 0 }
  0xad   : > { %v4376_v23 = vsel %vm2979_vm9, 4294967295, %v4375_v23  ;;  %v4378_v24 = vsel %vm2984_vm10, 4294967295, %v4377_v24 }
  0xaf   : > { %v330_v25 = vpop.permute.xlu1 %329  ;;  %v327_v26 = vpop.permute.xlu0 %326 }
  0xb0   : > { %vm2989_vm11 = vcmp.eq.s32.totalorder %v330_v25, %v2936_v4  ;;  %vm2994_vm12 = vcmp.eq.s32.totalorder %v327_v26, %v2936_v4 }
  0xb1   : > { %v4380_v27 = vsel %vm2989_vm11, 4294967295, %v4379_v27  ;;  %v4382_v28 = vsel %vm2994_vm12, 4294967295, %v4381_v28 }
  0xb3   : > { %v336_v29 = vpop.permute.xlu1 %335  ;;  %v333_v30 = vpop.permute.xlu0 %332 }
  0xb4   : > { %vm2999_vm13 = vcmp.eq.s32.totalorder %v336_v29, %v2936_v4  ;;  %vm3004_vm14 = vcmp.eq.s32.totalorder %v333_v30, %v2936_v4  ;;  %v4403_v29 = vmov 0  ;;  %v4406_v30 = vmov 0 }
  0xb5   : > { %v4384_v31 = vsel %vm2999_vm13, 4294967295, %v4383_v31  ;;  %v4387_v32 = vsel %vm3004_vm14, 4294967295, %v4386_v32 }
  0xb6   : > { %4385 = vst [vmem:[#allocation40_spill] sm:$0xff] %v4384_v31  ;;  %4388 = vst [vmem:[#allocation41_spill] sm:$0xff] %v4387_v32 }
  0xb7   : > { %v342_v33 = vpop.permute.xlu1 %341  ;;  %v339_v34 = vpop.permute.xlu0 %338 }
  0xb8   : > { %vm3009_vm15 = vcmp.eq.s32.totalorder %v342_v33, %v2936_v4  ;;  %vm3014_vm0 = vcmp.eq.s32.totalorder %v339_v34, %v2936_v4 }
  0xb9   : > { %v4390_v5 = vsel %vm3009_vm15, 4294967295, %v4389_v5  ;;  %v4393_v6 = vsel %vm3014_vm0, 4294967295, %v4392_v6 }
  0xba   : > { %4391 = vst [vmem:[#allocation42_spill] sm:$0xff] %v4390_v5  ;;  %4394 = vst [vmem:[#allocation43_spill] sm:$0xff] %v4393_v6 }
  0xbb   : > { %v348_v9 = vpop.permute.xlu1 %347  ;;  %v345_v10 = vpop.permute.xlu0 %344 }
  0xbc   : > { %vm3019_vm13 = vcmp.eq.s32.totalorder %v348_v9, %v2936_v4  ;;  %vm3024_vm14 = vcmp.eq.s32.totalorder %v345_v10, %v2936_v4  ;;  %v4408_v9 = vmov 0  ;;  %v4411_v10 = vmov 0 }
  0xbd   : > { %v4396_v13 = vsel %vm3019_vm13, 4294967295, %v4395_v13  ;;  %v4398_v14 = vsel %vm3024_vm14, 4294967295, %v4397_v14 }
  0xbf   : > { %v354_v17 = vpop.permute.xlu1 %353  ;;  %v351_v18 = vpop.permute.xlu0 %350 }
  0xc0   : > { %vm3029_vm15 = vcmp.eq.s32.totalorder %v354_v17, %v2936_v4  ;;  %vm3034_vm0 = vcmp.eq.s32.totalorder %v351_v18, %v2936_v4 }
  0xc1   : > { %v4400_v21 = vsel %vm3029_vm15, 4294967295, %v4399_v21  ;;  %v4402_v22 = vsel %vm3034_vm0, 4294967295, %v4401_v22 }
  0xc3   : > { %v360_v25 = vpop.permute.xlu1 %359  ;;  %v357_v26 = vpop.permute.xlu0 %356 }
  0xc4   : > { %vm3039_vm13 = vcmp.eq.s32.totalorder %v360_v25, %v2936_v4  ;;  %vm3044_vm14 = vcmp.eq.s32.totalorder %v357_v26, %v2936_v4  ;;  %v4414_v25 = vmov 0  ;;  %v4417_v26 = vmov 0 }
  0xc5   : > { %v4404_v29 = vsel %vm3039_vm13, 4294967295, %v4403_v29  ;;  %v4407_v30 = vsel %vm3044_vm14, 4294967295, %v4406_v30 }
  0xc6   : > { %4405 = vst [vmem:[#allocation44_spill] sm:$0xff] %v4404_v29 }
  0xc7   : > { %v366_v33 = vpop.permute.xlu1 %365  ;;  %v363_v34 = vpop.permute.xlu0 %362 }
  0xc8   : > { %vm3049_vm15 = vcmp.eq.s32.totalorder %v366_v33, %v2936_v4  ;;  %vm3054_vm0 = vcmp.eq.s32.totalorder %v363_v34, %v2936_v4  ;;  %v4420_v34 = vmov 0 }
  0xc9   : > { %v4409_v9 = vsel %vm3049_vm15, 4294967295, %v4408_v9  ;;  %v4412_v10 = vsel %vm3054_vm0, 4294967295, %v4411_v10 }
  0xca   : > { %4410 = vst [vmem:[#allocation45_spill] sm:$0xff] %v4409_v9  ;;  %4413 = vst [vmem:[#allocation46_spill] sm:$0xff] %v4412_v10  ;;  %v4423_v10 = vmov 0 }
  0xcb   : > { %v372_v17 = vpop.permute.xlu1 %371  ;;  %v369_v18 = vpop.permute.xlu0 %368 }
  0xcc   : > { %vm3059_vm13 = vcmp.eq.s32.totalorder %v372_v17, %v2936_v4  ;;  %vm3064_vm14 = vcmp.eq.s32.totalorder %v369_v18, %v2936_v4  ;;  %v4426_v18 = vmov 0 }
  0xcd   : > { %v4415_v25 = vsel %vm3059_vm13, 4294967295, %v4414_v25  ;;  %v4418_v26 = vsel %vm3064_vm14, 4294967295, %v4417_v26 }
  0xce   : > { %4416 = vst [vmem:[#allocation47_spill] sm:$0xff] %v4415_v25  ;;  %4419 = vst [vmem:[#allocation48_spill] sm:$0xff] %v4418_v26  ;;  %v4429_v26 = vmov 0 }
  0xcf   : > { %v378_v33 = vpop.permute.xlu1 %377  ;;  %v375_v3 = vpop.permute.xlu0 %374 }
  0xd0   : > { %vm3069_vm15 = vcmp.eq.s32.totalorder %v378_v33, %v2936_v4  ;;  %vm3074_vm0 = vcmp.eq.s32.totalorder %v375_v3, %v2936_v4  ;;  %v4432_v3 = vmov 0 }
  0xd1   : > { %v4421_v34 = vsel %vm3069_vm15, 4294967295, %v4420_v34  ;;  %v4424_v10 = vsel %vm3074_vm0, 4294967295, %v4423_v10 }
  0xd2   : > { %4422 = vst [vmem:[#allocation49_spill] sm:$0xff] %v4421_v34  ;;  %4425 = vst [vmem:[#allocation50_spill] sm:$0xff] %v4424_v10  ;;  %v4435_v10 = vmov 0 }
  0xd3   : > { %v384_v17 = vpop.permute.xlu1 %383  ;;  %v381_v9 = vpop.permute.xlu0 %380 }
  0xd4   : > { %vm3079_vm13 = vcmp.eq.s32.totalorder %v384_v17, %v2936_v4  ;;  %vm3084_vm14 = vcmp.eq.s32.totalorder %v381_v9, %v2936_v4 }
  0xd5   : > { %v4427_v18 = vsel %vm3079_vm13, 4294967295, %v4426_v18  ;;  %v4430_v26 = vsel %vm3084_vm14, 4294967295, %v4429_v26 }
  0xd6   : > { %4428 = vst [vmem:[#allocation51_spill] sm:$0xff] %v4427_v18  ;;  %4431 = vst [vmem:[#allocation52_spill] sm:$0xff] %v4430_v26  ;;  %457 = sbr.rel (%p2278_p10) target bundleno = 795 (0x31b), region = 40 }
  0xd7   : > { %v390_v33 = vpop.permute.xlu1 %389  ;;  %v387_v25 = vpop.permute.xlu0 %386 }
  0xd8   : > { %vm3089_vm15 = vcmp.eq.s32.totalorder %v390_v33, %v2936_v4  ;;  %vm3094_vm0 = vcmp.eq.s32.totalorder %v387_v25, %v2936_v4 }
  0xd9   : > { %v4433_v3 = vsel %vm3089_vm15, 4294967295, %v4432_v3  ;;  %v4436_v10 = vsel %vm3094_vm0, 4294967295, %v4435_v10 }
  0xda   : > { %4434 = vst [vmem:[#allocation53_spill] sm:$0xff] %v4433_v3  ;;  %4437 = vst [vmem:[#allocation54_spill] sm:$0xff] %v4436_v10 }
  0xdb   : > { %v2725_v17 = vmov 0   ;;  %vm4270_vm0 = vcmask 195584  }
  0xdc   : > { %2429 = vset.pattern.permute.xlu1 %v2725_v17  ;;  %2428 = vset.pattern.permute.xlu0 %v2725_v17 }
  0xdd   : > { %470 = vperm.xlu1 %2429, %v2846_v37   ;;  %460 = vperm.xlu0 %2428, %v2840_v35  }
  0xe1   : > { %475 = vperm.xlu1 %2429, %v2849_v38   ;;  %465 = vperm.xlu0 %2428, %v2843_v36  }
  0xe5   : > { %485 = vperm.xlu1 %2429, %v2855_v40   ;;  %480 = vperm.xlu0 %2428, %v2852_v39  }
  0xe9   : > { %495 = vperm.xlu1 %2429, %v2861_v42   ;;  %490 = vperm.xlu0 %2428, %v2858_v41  }
  0xed   : > { %505 = vperm.xlu1 %2429, %v2867_v44   ;;  %500 = vperm.xlu0 %2428, %v2864_v43  }
  0xf1   : > { %515 = vperm.xlu1 %2429, %v2873_v46   ;;  %510 = vperm.xlu0 %2428, %v2870_v45  }
  0xf5   : > { %525 = vperm.xlu1 %2429, %v2879_v48   ;;  %520 = vperm.xlu0 %2428, %v2876_v47  }
  0xf9   : > { %535 = vperm.xlu1 %2429, %v2885_v50   ;;  %530 = vperm.xlu0 %2428, %v2882_v49  }
  0xfd   : > { %545 = vperm.xlu1 %2429, %v2891_v52   ;;  %540 = vperm.xlu0 %2428, %v2888_v51  }
 0x101   : > { %555 = vperm.xlu1 %2429, %v2897_v54   ;;  %550 = vperm.xlu0 %2428, %v2894_v53  }
 0x105   : > { %565 = vperm.xlu1 %2429, %v2903_v56   ;;  %560 = vperm.xlu0 %2428, %v2900_v55  }
 0x109   : > { %575 = vperm.xlu1 %2429, %v2909_v58   ;;  %570 = vperm.xlu0 %2428, %v2906_v57  }
 0x10d   : > { %585 = vperm.xlu1 %2429, %v2915_v60   ;;  %580 = vperm.xlu0 %2428, %v2912_v59  }
 0x111   : > { %595 = vperm.xlu1 %2429, %v2921_v62   ;;  %590 = vperm.xlu0 %2428, %v2918_v61  }
 0x115   : > { %605 = vperm.xlu1 %2429, %v2927_v0   ;;  %600 = vperm.xlu0 %2428, %v2924_v63  }
 0x119   : > { %615 = vperm.xlu1 %2429, %v2933_v2   ;;  %610 = vperm.xlu0 %2428, %v2930_v1  }
 0x158   : > { %v471_v4 = vpop.permute.xlu1 %470  ;;  %v461_v9 = vpop.permute.xlu0 %460 }
 0x159   : > { %v620_v53 = vsel %vm2939_vm1, %v471_v4, -1e+30  ;;  %v618_v48 = vsel %vm2944_vm2, %v461_v9, -1e+30 }
 0x15a   : > { %v653_v45 = vsel %vm4270_vm0, %v620_v53, -inf }
 0x15c   : > { %v476_v25 = vpop.permute.xlu1 %475  ;;  %v466_v33 = vpop.permute.xlu0 %465 }
 0x15d   : > { %v621_v51 = vsel %vm2949_vm3, %v476_v25, -1e+30  ;;  %v619_v46 = vsel %vm2954_vm4, %v466_v33, -1e+30  ;;  %v651_v25 = vsel %vm4270_vm0, %v618_v48, -inf }
 0x15e   : > { %v652_v40 = vsel %vm4270_vm0, %v619_v46, -inf }
 0x160   : > { %v486_v17 = vpop.permute.xlu1 %485  ;;  %v481_v60 = vpop.permute.xlu0 %480 }
 0x161   : > { %v623_v49 = vsel %vm2959_vm5, %v486_v17, -1e+30  ;;  %v622_v44 = vsel %vm2964_vm6, %v481_v60, -1e+30  ;;  %v654_v60 = vsel %vm4270_vm0, %v621_v51, -inf  ;;  %vm4440_vm5 = vnez %v4390_v5 }
 0x164   : > { %v496_v58 = vpop.permute.xlu1 %495  ;;  %v491_v56 = vpop.permute.xlu0 %490 }
 0x165   : > { %v625_v47 = vsel %vm2969_vm7, %v496_v58, -1e+30  ;;  %v624_v4 = vsel %vm2974_vm8, %v491_v56, -1e+30  ;;  %v657_v58 = vsel %vm4270_vm0, %v623_v49, -inf  ;;  %v655_v56 = vsel %vm4270_vm0, %v622_v44, -inf }
 0x166   : > { %v661_v43 = vsel %vm4270_vm0, %v625_v47, -inf  ;;  %v659_v53 = vsel %vm4270_vm0, %v624_v4, -inf  ;;  %vm4439_vm7 = vnez %v4387_v32  ;;  %v658_v38 = vmax.f32 %v652_v40, %v657_v58 }
 0x167   : > { %v656_v4 = vmax.f32 %v651_v25, %v655_v56  ;;  %v662_v41 = vmax.f32 %v654_v60, %v661_v43 }
 0x168   : > { %v506_v59 = vpop.permute.xlu1 %505  ;;  %v501_v62 = vpop.permute.xlu0 %500 }
 0x169   : > { %v627_v33 = vsel %vm2979_vm9, %v506_v59, -1e+30  ;;  %v626_v17 = vsel %vm2984_vm10, %v501_v62, -1e+30  ;;  %vm4438_vm9 = vnez %v4384_v31 }
 0x16a   : > { %v665_v62 = vsel %vm4270_vm0, %v627_v33, -inf  ;;  %v663_v51 = vsel %vm4270_vm0, %v626_v17, -inf  ;;  %v660_v33 = vmax.f32 %v653_v45, %v659_v53 }
 0x16b   : > { %v664_v39 = vmax.f32 %v656_v4, %v663_v51 }
 0x16c   : > { %v516_v54 = vpop.permute.xlu1 %515  ;;  %v511_v61 = vpop.permute.xlu0 %510 }
 0x16d   : > { %v629_v48 = vsel %vm2989_vm11, %v516_v54, -1e+30  ;;  %v628_v59 = vsel %vm2994_vm12, %v511_v61, -1e+30  ;;  %vm4441_vm11 = vnez %v4393_v6 }
 0x16e   : > { %v669_v17 = vsel %vm4270_vm0, %v629_v48, -inf  ;;  %v667_v37 = vsel %vm4270_vm0, %v628_v59, -inf }
 0x16f   : > { %v670_v60 = vmax.f32 %v662_v41, %v669_v17  ;;  %v668_v58 = vmax.f32 %v660_v33, %v667_v37  ;;  %v4460_v33 = vld [vmem:[#allocation48_spill] sm:$0xff] }
 0x170   : > { %v526_v57 = vpop.permute.xlu1 %525  ;;  %v521_v0 = vpop.permute.xlu0 %520 }
 0x171   : > { %v631_v46 = vsel %vm4438_vm9, %v526_v57, -1e+30  ;;  %v630_v44 = vsel %vm4439_vm7, %v521_v0, -1e+30  ;;  %v666_v57 = vmax.f32 %v658_v38, %v665_v62  ;;  %vm4443_vm9 = vnez %v4398_v14 }
 0x172   : > { %v673_v0 = vsel %vm4270_vm0, %v631_v46, -inf  ;;  %v671_v35 = vsel %vm4270_vm0, %v630_v44, -inf  ;;  %vm4445_vm7 = vnez %v4402_v22  ;;  %v4452_v46 = vld [vmem:[#allocation45_spill] sm:$0xff] }
 0x173   : > { %v674_v53 = vmax.f32 %v666_v57, %v673_v0  ;;  %v672_v48 = vmax.f32 %v664_v39, %v671_v35  ;;  %v4454_v35 = vld [vmem:[#allocation46_spill] sm:$0xff] }
 0x174   : > { %v536_v52 = vpop.permute.xlu1 %535  ;;  %v531_v63 = vpop.permute.xlu0 %530  ;;  %vm4455_vm3 = vnez %v4454_v35 }
 0x175   : > { %v633_v54 = vsel %vm4440_vm5, %v536_v52, -1e+30  ;;  %v632_v61 = vsel %vm4441_vm11, %v531_v63, -1e+30  ;;  %vm4442_vm5 = vnez %v4396_v13  ;;  %vm4444_vm11 = vnez %v4400_v21 }
 0x176   : > { %v677_v40 = vsel %vm4270_vm0, %v633_v54, -inf  ;;  %v675_v25 = vsel %vm4270_vm0, %v632_v61, -inf  ;;  %vm4446_vm0 = vnez %v4404_v29  ;;  %v4458_v54 = vld [vmem:[#allocation47_spill] sm:$0xff] }
 0x177   : > { %v678_v62 = vmax.f32 %v670_v60, %v677_v40  ;;  %v4463_v40 = vld [vmem:[#allocation50_spill] sm:$0xff] }
 0x178   : > { %v546_v55 = vpop.permute.xlu1 %545  ;;  %v541_v2 = vpop.permute.xlu0 %540 }
 0x179   : > { %v635_v52 = vsel %vm4442_vm5, %v546_v55, -1e+30  ;;  %v634_v43 = vsel %vm4443_vm9, %v541_v2, -1e+30  ;;  %vm4447_vm5 = vnez %v4407_v30  ;;  %v676_v2 = vmax.f32 %v668_v58, %v675_v25 }
 0x17a   : > { %vm4448_vm9 = vcmask 195584  }
 0x17b   : > { %v681_v51 = vsel %vm4448_vm9, %v635_v52, -inf  ;;  %vm4449_vm12 = vmmov %vm4448_vm9 }
 0x17c   : > { %v556_v50 = vpop.permute.xlu1 %555  ;;  %v551_v1 = vpop.permute.xlu0 %550  ;;  %v679_v37 = vsel %vm4449_vm12, %v634_v43, -inf  ;;  %vm4450_vm10 = vmmov %vm4448_vm9  ;;  %vm4461_vm12 = vnez %v4460_v33  ;;  %v682_v57 = vmax.f32 %v674_v53, %v681_v51 }
 0x17d   : > { %v637_v38 = vsel %vm4444_vm11, %v556_v50, -1e+30  ;;  %v636_v56 = vsel %vm4445_vm7, %v551_v1, -1e+30  ;;  %vm4451_vm11 = vmmov %vm4448_vm9  ;;  %vm4453_vm7 = vnez %v4452_v46  ;;  %v680_v0 = vmax.f32 %v672_v48, %v679_v37 }
 0x17e   : > { %v685_v41 = vsel %vm4450_vm10, %v637_v38, -inf  ;;  %v683_v50 = vsel %vm4451_vm11, %v636_v56, -inf  ;;  %vm4462_vm10 = vnez %v4421_v34  ;;  %vm4464_vm11 = vnez %v4463_v40 }
 0x17f   : > { %v686_v25 = vmax.f32 %v678_v62, %v685_v41  ;;  %v684_v52 = vmax.f32 %v676_v2, %v683_v50 }
 0x180   : > { %v566_v42 = vpop.permute.xlu1 %565  ;;  %v561_v9 = vpop.permute.xlu0 %560 }
 0x181   : > { %v639_v59 = vsel %vm4446_vm0, %v566_v42, -1e+30  ;;  %v638_v55 = vsel %vm4447_vm5, %v561_v9, -1e+30  ;;  %vm4456_vm0 = vmmov %vm4448_vm9  ;;  %vm4459_vm9 = vnez %v4458_v54 }
 0x182   : > { %v689_v9 = vsel %vm4456_vm0, %v639_v59, -inf  ;;  %vm4457_vm5 = vmmov %vm4456_vm0 }
 0x183   : > { %v687_v4 = vsel %vm4457_vm5, %v638_v55, -inf  ;;  %v690_v58 = vmax.f32 %v682_v57, %v689_v9  ;;  %vm4466_vm5 = vmmov %vm4456_vm0 }
 0x184   : > { %v576_v49 = vpop.permute.xlu1 %575  ;;  %v571_v47 = vpop.permute.xlu0 %570  ;;  %v688_v38 = vmax.f32 %v680_v0, %v687_v4 }
 0x185   : > { %v641_v1 = vsel %vm4453_vm7, %v576_v49, -1e+30  ;;  %v640_v39 = vsel %vm4455_vm3, %v571_v47, -1e+30  ;;  %vm4465_vm7 = vmmov %vm4456_vm0 }
 0x186   : > { %v693_v43 = vsel %vm4465_vm7, %v641_v1, -inf  ;;  %v691_v60 = vsel %vm4456_vm0, %v640_v39, -inf  ;;  %vm4470_vm7 = vmmov %vm4456_vm0 }
 0x187   : > { %v694_v2 = vmax.f32 %v686_v25, %v693_v43  ;;  %v692_v51 = vmax.f32 %v684_v52, %v691_v60 }
 0x188   : > { %v586_v45 = vpop.permute.xlu1 %585  ;;  %v581_v63 = vpop.permute.xlu0 %580 }
 0x189   : > { %v643_v61 = vsel %vm4459_vm9, %v586_v45, -1e+30  ;;  %v642_v17 = vsel %vm4461_vm12, %v581_v63, -1e+30  ;;  %vm4467_vm9 = vmmov %vm4456_vm0 }
 0x18a   : > { %v697_v45 = vsel %vm4466_vm5, %v643_v61, -inf  ;;  %v695_v63 = vsel %vm4467_vm9, %v642_v17, -inf  ;;  %vm4468_vm12 = vmmov %vm4456_vm0  ;;  %vm4471_vm9 = vnez %v4436_v10  ;;  %vm4280_vm5 = vcmask 188416  }
 0x18b   : > { %v698_v50 = vmax.f32 %v690_v58, %v697_v45  ;;  %v696_v1 = vmax.f32 %v688_v38, %v695_v63  ;;  %v4474_v63 = vlaneseq }
 0x18c   : > { %v596_v42 = vpop.permute.xlu1 %595  ;;  %v591_v44 = vpop.permute.xlu0 %590 }
 0x18d   : > { %v645_v49 = vsel %vm4462_vm10, %v596_v42, -1e+30  ;;  %v644_v47 = vsel %vm4464_vm11, %v591_v44, -1e+30  ;;  %vm4469_vm10 = vmmov %vm4456_vm0 }
 0x18e   : > { %v701_v48 = vsel %vm4468_vm12, %v645_v49, -inf  ;;  %v699_v59 = vsel %vm4469_vm10, %v644_v47, -inf  ;;  %vm4472_vm12 = vmmov %vm4456_vm0 }
 0x18f   : > { %v702_v39 = vmax.f32 %v694_v2, %v701_v48  ;;  %v700_v42 = vmax.f32 %v692_v51, %v699_v59  ;;  %vm4473_vm10 = vmmov %vm4456_vm0  ;;  %v3228_v59 = vld [vmem:[#allocation5] sm:$0x1] }
 0x190   : > { %v606_v56 = vpop.permute.xlu1 %605  ;;  %v601_v53 = vpop.permute.xlu0 %600 }
 0x191   : > { %v647_v55 = vsel %vm3079_vm13, %v606_v56, -1e+30  ;;  %v646_v62 = vsel %vm3084_vm14, %v601_v53, -1e+30  ;;  %v724_v56 = vshrl.u32 %v4474_v63, 7 }
 0x192   : > { %v705_v37 = vsel %vm4470_vm7, %v647_v55, -inf  ;;  %v703_v41 = vsel %vm4456_vm0, %v646_v62, -inf  ;;  %vm4475_vm7 = vmmov %vm4456_vm0 }
 0x193   : > { %v706_v4 = vmax.f32 %v698_v50, %v705_v37  ;;  %v704_v61 = vmax.f32 %v696_v1, %v703_v41  ;;  %v725_v55 = vsub.s32 0, %v724_v56 }
 0x194   : > { %v616_v44 = vpop.permute.xlu1 %615  ;;  %v611_v9 = vpop.permute.xlu0 %610 }
 0x195   : > { %v649_v17 = vsel %vm3089_vm15, %v616_v44, -1e+30  ;;  %v648_v57 = vsel %vm4471_vm9, %v611_v9, -1e+30  ;;  %v711_v52 = vmax.f32 %v704_v61, %v706_v4 }
 0x196   : > { %v709_v0 = vsel %vm4472_vm12, %v649_v17, -inf  ;;  %v707_v49 = vsel %vm4473_vm10, %v648_v57, -inf  ;;  %vm4476_vm12 = vmmov %vm4456_vm0 }
 0x197   : > { %v710_v47 = vmax.f32 %v702_v39, %v709_v0  ;;  %v708_v25 = vmax.f32 %v700_v42, %v707_v49  ;;  %vm4477_vm10 = vmmov %vm4456_vm0 }
 0x199   : > { %v712_v43 = vmax.f32 %v708_v25, %v710_v47 }
 0x19b   : > { %v713_v60 = vmax.f32 %v711_v52, %v712_v43 }
 0x19d   : > { %v714_v58 = vrot.slane %v713_v60, 4 }
 0x19f   : > { %v715_v38 = vmax.f32 %v713_v60, %v714_v58 }
 0x1a1   : > { %v716_v45 = vrot.slane %v715_v38, 2 }
 0x1a3   : > { %v717_v53 = vmax.f32 %v715_v38, %v716_v45 }
 0x1a5   : > { %v718_v48 = vrot.slane %v717_v53, 1 }
 0x1a7   : > { %v719_v62 = vmax.f32 %v717_v53, %v718_v48 }
 0x1a9   : > { %v3231_v2 = vmax.f32 %v3228_v59, %v719_v62 }
 0x1ab   : > { %v3234_v51 = vrot.slane %v3231_v2, %v725_v55  ;;  %v1214_v37 = vsub.f32 %v3228_v59, %v3231_v2  ;;  %1221 = vst.msk [vmem:[#allocation5] sm:$0x1] %vm4280_vm5, %v3231_v2  ;;  %vm4479_vm5 = vmmov %vm4456_vm0 }
 0x1ad   : > { %v729_v41 = vsel %vm2954_vm4, %v3234_v51, 0.0  ;;  %v728_v50 = vsel %vm2944_vm2, %v3234_v51, 0.0  ;;  %v732_v42 = vsel %vm2964_vm6, %v3234_v51, 0.0  ;;  %v730_v44 = vsel %vm2939_vm1, %v3234_v51, 0.0  ;;  %vm4482_vm6 = vmmov %vm4456_vm0 }
 0x1ae   : > { %v763_v1 = vsel %vm4475_vm7, %v729_v41, 0.0  ;;  %v760_v39 = vsel %vm4456_vm0, %v728_v50, 0.0  ;;  %v772_v9 = vsel %vm4476_vm12, %v732_v42, 0.0  ;;  %v766_v4 = vsel %vm4477_vm10, %v730_v44, 0.0 }
 0x1af   : > { %764 = vadd.xlane.f32.xlu1 %v763_v1  ;;  %761 = vadd.xlane.f32.xlu0 %v760_v39  ;;  %v734_v61 = vsel %vm2974_vm8, %v3234_v51, 0.0  ;;  %vm4478_vm7 = vnez %v4364_v11  ;;  %vm4480_vm12 = vnez %v4378_v24  ;;  %vm4481_vm10 = vnez %v4368_v15  ;;  %vm4483_vm8 = vmmov %vm4456_vm0 }
 0x1b0   : > { %v731_v17 = vsel %vm4478_vm7, %v3234_v51, 0.0  ;;  %v778_v57 = vsel %vm4456_vm0, %v734_v61, 0.0  ;;  %v736_v49 = vsel %vm4480_vm12, %v3234_v51, 0.0  ;;  %v733_v47 = vsel %vm4481_vm10, %v3234_v51, 0.0  ;;  %vm4486_vm7 = vmmov %vm4482_vm6 }
 0x1b1   : > { %v769_v0 = vsel %vm4479_vm5, %v731_v17, 0.0  ;;  %v784_v25 = vsel %vm4482_vm6, %v736_v49, 0.0  ;;  %v775_v52 = vsel %vm4483_vm8, %v733_v47, 0.0  ;;  %vm4484_vm0 = vnez %v4382_v28  ;;  %vm4487_vm12 = vmmov %vm4482_vm6 }
 0x1b2   : > { %v738_v43 = vsel %vm4484_vm0, %v3234_v51, 0.0  ;;  %vm4485_vm5 = vnez %v4372_v19  ;;  %vm4488_vm6 = vnez %v4387_v32  ;;  %vm4489_vm8 = vnez %v4376_v23  ;;  %vm4490_vm10 = vmmov %vm4486_vm7 }
 0x1b3   : > { %773 = vadd.xlane.f32.xlu1 %v772_v9  ;;  %767 = vadd.xlane.f32.xlu0 %v766_v4  ;;  %v735_v60 = vsel %vm4485_vm5, %v3234_v51, 0.0  ;;  %v790_v58 = vsel %vm4486_vm7, %v738_v43, 0.0  ;;  %v740_v45 = vsel %vm4488_vm6, %v3234_v51, 0.0  ;;  %v737_v63 = vsel %vm4489_vm8, %v3234_v51, 0.0  ;;  %vm4491_vm0 = vmmov %vm4486_vm7 }
 0x1b4   : > { %v781_v38 = vsel %vm4487_vm12, %v735_v60, 0.0  ;;  %v796_v56 = vsel %vm4490_vm10, %v740_v45, 0.0  ;;  %v787_v53 = vsel %vm4491_vm0, %v737_v63, 0.0  ;;  %vm4492_vm7 = vnez %v4393_v6  ;;  %vm4494_vm5 = vmmov %vm4491_vm0 }
 0x1b5   : > { %v742_v48 = vsel %vm4492_vm7, %v3234_v51, 0.0  ;;  %vm4493_vm12 = vnez %v4380_v27  ;;  %vm4495_vm6 = vmmov %vm4491_vm0  ;;  %vm4496_vm10 = vnez %v4398_v14  ;;  %vm4497_vm0 = vnez %v4384_v31 }
 0x1b6   : > { %v739_v55 = vsel %vm4493_vm12, %v3234_v51, 0.0  ;;  %v802_v62 = vsel %vm4494_vm5, %v742_v48, 0.0  ;;  %v744_v50 = vsel %vm4496_vm10, %v3234_v51, 0.0  ;;  %v741_v1 = vsel %vm4497_vm0, %v3234_v51, 0.0  ;;  %vm4498_vm8 = vmmov %vm4494_vm5 }
 0x1b7   : > { %779 = vadd.xlane.f32.xlu1 %v778_v57  ;;  %770 = vadd.xlane.f32.xlu0 %v769_v0  ;;  %v793_v41 = vsel %vm4495_vm6, %v739_v55, 0.0  ;;  %v808_v39 = vsel %vm4498_vm8, %v744_v50, 0.0  ;;  %vm4499_vm7 = vmmov %vm4494_vm5  ;;  %vm4500_vm5 = vnez %v4402_v22  ;;  %vm4501_vm6 = vnez %v4390_v5 }
 0x1b8   : > { %v799_v42 = vsel %vm4499_vm7, %v741_v1, 0.0  ;;  %v746_v44 = vsel %vm4500_vm5, %v3234_v51, 0.0  ;;  %v743_v9 = vsel %vm4501_vm6, %v3234_v51, 0.0  ;;  %vm4502_vm12 = vmmov %vm4499_vm7  ;;  %vm4504_vm8 = vnez %v4407_v30 }
 0x1b9   : > { %v814_v4 = vsel %vm4502_vm12, %v746_v44, 0.0  ;;  %vm4503_vm10 = vmmov %vm4499_vm7  ;;  %v748_v17 = vsel %vm4504_vm8, %v3234_v51, 0.0  ;;  %vm4505_vm7 = vnez %v4396_v13  ;;  %v750_v47 = vsel %vm4455_vm3, %v3234_v51, 0.0 }
 0x1ba   : > { %v805_v61 = vsel %vm4503_vm10, %v743_v9, 0.0  ;;  %v745_v57 = vsel %vm4505_vm7, %v3234_v51, 0.0  ;;  %vm4506_vm0 = vmmov %vm4503_vm10  ;;  %vm4508_vm12 = vnez %v4400_v21  ;;  %v754_v63 = vsel %vm4464_vm11, %v3234_v51, 0.0 }
 0x1bb   : > { %785 = vadd.xlane.f32.xlu1 %v784_v25  ;;  %776 = vadd.xlane.f32.xlu0 %v775_v52  ;;  %v820_v0 = vsel %vm4506_vm0, %v748_v17, 0.0  ;;  %vm4507_vm5 = vmmov %vm4506_vm0  ;;  %v747_v25 = vsel %vm4508_vm12, %v3234_v51, 0.0  ;;  %v756_v55 = vsel %vm3084_vm14, %v3234_v51, 0.0  ;;  %v758_v1 = vsel %vm4471_vm9, %v3234_v51, 0.0 }
 0x1bc   : > { %v811_v49 = vsel %vm4507_vm5, %v745_v57, 0.0  ;;  %vm4509_vm10 = vmmov %vm4506_vm0  ;;  %vm4512_vm5 = vnez %v4404_v29  ;;  %v757_v9 = vsel %vm3079_vm13, %v3234_v51, 0.0 }
 0x1bd   : > { %v826_v52 = vsel %vm4509_vm10, %v750_v47, 0.0  ;;  %vm4510_vm8 = vmmov %vm4506_vm0  ;;  %vm4511_vm0 = vnez %v4460_v33  ;;  %v4525_v47 = vld [vmem:[#allocation9_spill] sm:$0xff] }
 0x1be   : > { %v817_v43 = vsel %vm4510_vm8, %v747_v25, 0.0  ;;  %v752_v60 = vsel %vm4511_vm0, %v3234_v51, 0.0  ;;  %vm4513_vm7 = vmmov %vm4510_vm8  ;;  %vm4515_vm8 = vnez %v4452_v46 }
 0x1bf   : > { %791 = vadd.xlane.f32.xlu1 %v790_v58  ;;  %782 = vadd.xlane.f32.xlu0 %v781_v38  ;;  %v749_v58 = vsel %vm4512_vm5, %v3234_v51, 0.0  ;;  %v832_v38 = vsel %vm4513_vm7, %v752_v60, 0.0  ;;  %vm4514_vm3 = vmmov %vm4513_vm7 }
 0x1c0   : > { %v823_v45 = vsel %vm4514_vm3, %v749_v58, 0.0  ;;  %vm4516_vm10 = vmmov %vm4514_vm3 }
 0x1c1   : > { %vm4517_vm0 = vmmov %vm4514_vm3  ;;  %vm4518_vm3 = vnez %v4458_v54  ;;  %v1215_v54 = vmul.f32 1.442695, %v1214_v37 }
 0x1c2   : > { %vm4519_vm7 = vmmov %vm4517_vm0 }
 0x1c3   : > { %797 = vadd.xlane.f32.xlu1 %v796_v56  ;;  %788 = vadd.xlane.f32.xlu0 %v787_v53  ;;  %v751_v56 = vsel %vm4515_vm8, %v3234_v51, 0.0  ;;  %v838_v53 = vsel %vm4516_vm10, %v754_v63, 0.0  ;;  %vm4520_vm11 = vmmov %vm4517_vm0  ;;  %v4527_v63 = vld [vmem:[#allocation10_spill] sm:$0xff] }
 0x1c4   : > { %v829_v48 = vsel %vm4517_vm0, %v751_v56, 0.0  ;;  %vm4521_vm0 = vnez %v4421_v34  ;;  %vm4522_vm10 = vmmov %vm4519_vm7 }
 0x1c5   : > { %vm4523_vm14 = vmmov %vm4519_vm7 }
 0x1c7   : > { %803 = vadd.xlane.f32.xlu1 %v802_v62  ;;  %794 = vadd.xlane.f32.xlu0 %v793_v41  ;;  %v753_v62 = vsel %vm4518_vm3, %v3234_v51, 0.0  ;;  %v844_v41 = vsel %vm4519_vm7, %v756_v55, 0.0 }
 0x1c8   : > { %v835_v50 = vsel %vm4520_vm11, %v753_v62, 0.0  ;;  %vm4524_vm11 = vmmov %vm4519_vm7  ;;  %v4528_v62 = vld [vmem:[#allocation14_spill] sm:$0xff] }
 0x1cb   : > { %809 = vadd.xlane.f32.xlu1 %v808_v39  ;;  %800 = vadd.xlane.f32.xlu0 %v799_v42  ;;  %v755_v39 = vsel %vm4521_vm0, %v3234_v51, 0.0  ;;  %v850_v42 = vsel %vm4522_vm10, %v758_v1, 0.0  ;;  %vm4557_vm10 = vmmov %vm4519_vm7 }
 0x1cc   : > { %v841_v44 = vsel %vm4523_vm14, %v755_v39, 0.0  ;;  %vm4556_vm14 = vmmov %vm4519_vm7 }
 0x1cf   : > { %815 = vadd.xlane.f32.xlu1 %v814_v4  ;;  %806 = vadd.xlane.f32.xlu0 %v805_v61  ;;  %v847_v4 = vsel %vm4524_vm11, %v757_v9, 0.0  ;;  %v759_v61 = vsel %vm3089_vm15, %v3234_v51, 0.0  ;;  %vm4558_vm11 = vmmov %vm4519_vm7 }
 0x1d0   : > { %v853_v17 = vsel %vm4519_vm7, %v759_v61, 0.0  ;;  %vm4559_vm7 = vnez %v4370_v16 }
 0x1d3   : > { %821 = vadd.xlane.f32.xlu1 %v820_v0  ;;  %812 = vadd.xlane.f32.xlu0 %v811_v49 }
 0x1d7   : > { %827 = vadd.xlane.f32.xlu1 %v826_v52  ;;  %818 = vadd.xlane.f32.xlu0 %v817_v43 }
 0x1db   : > { %833 = vadd.xlane.f32.xlu1 %v832_v38  ;;  %824 = vadd.xlane.f32.xlu0 %v823_v45  ;;  %v4526_v38 = vld [vmem:[#allocation12_spill] sm:$0xff] }
 0x1df   : > { %839 = vadd.xlane.f32.xlu1 %v838_v53  ;;  %830 = vadd.xlane.f32.xlu0 %v829_v48 }
 0x1e3   : > { %845 = vadd.xlane.f32.xlu1 %v844_v41  ;;  %836 = vadd.xlane.f32.xlu0 %v835_v50  ;;  %v4529_v50 = vld [vmem:[#allocation11_spill] sm:$0xff] }
 0x1e7   : > { %851 = vadd.xlane.f32.xlu1 %v850_v42  ;;  %842 = vadd.xlane.f32.xlu0 %v841_v44 }
 0x1eb   : > { %848 = vadd.xlane.f32.xlu0 %v847_v4  ;;  %v4530_v4 = vld [vmem:[#allocation16_spill] sm:$0xff] }
 0x1ef   : > { %854 = vadd.xlane.f32.xlu0 %v853_v17  ;;  %v4531_v17 = vld [vmem:[#allocation13_spill] sm:$0xff] }
 0x238   : > { %v765_v57 = vpop.xlane.xlu1 %764  ;;  %v762_v0 = vpop.xlane.xlu0 %761 }
 0x239   : > { %v857_v49 = vsub.f32 %v2843_v36, %v765_v57  ;;  %v856_v25 = vsub.f32 %v4525_v47, %v762_v0 }
 0x23b   : > { %v890_v52 = vmul.f32 1.442695, %v857_v49  ;;  %v888_v43 = vmul.f32 1.442695, %v856_v25 }
 0x23c   : > { %v774_v60 = vpop.xlane.xlu1 %773  ;;  %v768_v58 = vpop.xlane.xlu0 %767 }
 0x23d   : > { %2430 = vpow2.f32 %v890_v52  ;;  %v860_v45 = vsub.f32 %v4526_v38, %v774_v60  ;;  %v858_v56 = vsub.f32 %v4527_v63, %v768_v58  ;;  %v4532_v52 = vld [vmem:[#allocation18_spill] sm:$0xff]  ;;  %v4533_v60 = vld [vmem:[#allocation15_spill] sm:$0xff] }
 0x23e   : > { %2432 = vpow2.f32 %v888_v43 }
 0x23f   : > { %v896_v51 = vmul.f32 1.442695, %v860_v45  ;;  %v892_v53 = vmul.f32 1.442695, %v858_v56 }
 0x240   : > { %v780_v48 = vpop.xlane.xlu1 %779  ;;  %v771_v55 = vpop.xlane.xlu0 %770 }
 0x241   : > { %2434 = vpow2.f32 %v896_v51  ;;  %v862_v41 = vsub.f32 %v4528_v62, %v780_v48  ;;  %v859_v1 = vsub.f32 %v4529_v50, %v771_v55  ;;  %v4534_v48 = vld [vmem:[#allocation20_spill] sm:$0xff]  ;;  %v4535_v62 = vld [vmem:[#allocation17_spill] sm:$0xff] }
 0x242   : > { %2436 = vpow2.f32 %v892_v53 }
 0x243   : > { %v900_v39 = vmul.f32 1.442695, %v862_v41  ;;  %v894_v42 = vmul.f32 1.442695, %v859_v1 }
 0x244   : > { %v786_v44 = vpop.xlane.xlu1 %785  ;;  %v777_v9 = vpop.xlane.xlu0 %776 }
 0x245   : > { %2438 = vpow2.f32 %v900_v39  ;;  %v864_v61 = vsub.f32 %v4530_v4, %v786_v44  ;;  %v861_v57 = vsub.f32 %v4531_v17, %v777_v9  ;;  %v4536_v4 = vld [vmem:[#allocation22_spill] sm:$0xff]  ;;  %v4537_v17 = vld [vmem:[#allocation19_spill] sm:$0xff] }
 0x246   : > { %2440 = vpow2.f32 %v894_v42 }
 0x247   : > { %v904_v0 = vmul.f32 1.442695, %v864_v61  ;;  %v898_v49 = vmul.f32 1.442695, %v861_v57 }
 0x248   : > { %v792_v47 = vpop.xlane.xlu1 %791  ;;  %v783_v25 = vpop.xlane.xlu0 %782 }
 0x249   : > { %2442 = vpow2.f32 %v904_v0  ;;  %v866_v43 = vsub.f32 %v4532_v52, %v792_v47  ;;  %v863_v58 = vsub.f32 %v4533_v60, %v783_v25  ;;  %v4538_v60 = vld [vmem:[#allocation24_spill] sm:$0xff] }
 0x24a   : > { %v2431_v38 = vpop.eup %2430  ;;  %2444 = vpow2.f32 %v898_v49 }
 0x24b   : > { %v2433_v45 = vpop.eup %2432  ;;  %v908_v63 = vmul.f32 1.442695, %v866_v43  ;;  %v902_v56 = vmul.f32 1.442695, %v863_v58  ;;  %959 = vperm.xlu0 %2428, %v2431_v38   ;;  %v4539_v38 = vld [vmem:[#allocation21_spill] sm:$0xff] }
 0x24c   : > { %954 = vperm.xlu1 %2429, %v2433_v45   ;;  %v798_v51 = vpop.xlane.xlu1 %797  ;;  %v789_v53 = vpop.xlane.xlu0 %788 }
 0x24d   : > { %2446 = vpow2.f32 %v908_v63  ;;  %v868_v55 = vsub.f32 %v4534_v48, %v798_v51  ;;  %v865_v41 = vsub.f32 %v4535_v62, %v789_v53  ;;  %v4540_v62 = vld [vmem:[#allocation26_spill] sm:$0xff] }
 0x24e   : > { %v2435_v50 = vpop.eup %2434  ;;  %2448 = vpow2.f32 %v902_v56 }
 0x24f   : > { %v2437_v1 = vpop.eup %2436  ;;  %v912_v39 = vmul.f32 1.442695, %v868_v55  ;;  %v906_v42 = vmul.f32 1.442695, %v865_v41  ;;  %974 = vperm.xlu0 %2428, %v2435_v50   ;;  %v4541_v50 = vld [vmem:[#allocation23_spill] sm:$0xff] }
 0x250   : > { %964 = vperm.xlu1 %2429, %v2437_v1   ;;  %v804_v44 = vpop.xlane.xlu1 %803  ;;  %v795_v9 = vpop.xlane.xlu0 %794 }
 0x251   : > { %2450 = vpow2.f32 %v912_v39  ;;  %v870_v61 = vsub.f32 %v4536_v4, %v804_v44  ;;  %v867_v57 = vsub.f32 %v4537_v17, %v795_v9  ;;  %v4542_v17 = vld [vmem:[#allocation28_spill] sm:$0xff] }
 0x252   : > { %v2439_v0 = vpop.eup %2438  ;;  %2452 = vpow2.f32 %v906_v42 }
 0x253   : > { %v2441_v49 = vpop.eup %2440  ;;  %v916_v47 = vmul.f32 1.442695, %v870_v61  ;;  %v910_v25 = vmul.f32 1.442695, %v867_v57  ;;  %984 = vperm.xlu0 %2428, %v2439_v0   ;;  %v4543_v0 = vld [vmem:[#allocation25_spill] sm:$0xff] }
 0x254   : > { %969 = vperm.xlu1 %2429, %v2441_v49   ;;  %v810_v52 = vpop.xlane.xlu1 %809  ;;  %v801_v43 = vpop.xlane.xlu0 %800 }
 0x255   : > { %2454 = vpow2.f32 %v916_v47  ;;  %v872_v58 = vsub.f32 %v4538_v60, %v810_v52  ;;  %v869_v45 = vsub.f32 %v4539_v38, %v801_v43  ;;  %v4544_v38 = vld [vmem:[#allocation30_spill] sm:$0xff] }
 0x256   : > { %v2443_v63 = vpop.eup %2442  ;;  %2456 = vpow2.f32 %v910_v25 }
 0x257   : > { %v2445_v56 = vpop.eup %2444  ;;  %v920_v51 = vmul.f32 1.442695, %v872_v58  ;;  %v914_v53 = vmul.f32 1.442695, %v869_v45  ;;  %994 = vperm.xlu0 %2428, %v2443_v63   ;;  %v4545_v63 = vld [vmem:[#allocation27_spill] sm:$0xff] }
 0x258   : > { %979 = vperm.xlu1 %2429, %v2445_v56   ;;  %v816_v48 = vpop.xlane.xlu1 %815  ;;  %v807_v55 = vpop.xlane.xlu0 %806 }
 0x259   : > { %2458 = vpow2.f32 %v920_v51  ;;  %v874_v41 = vsub.f32 %v4540_v62, %v816_v48  ;;  %v871_v1 = vsub.f32 %v4541_v50, %v807_v55  ;;  %v4546_v50 = vld [vmem:[#allocation32_spill] sm:$0xff] }
 0x25a   : > { %v2447_v39 = vpop.eup %2446  ;;  %2460 = vpow2.f32 %v914_v53 }
 0x25b   : > { %v2449_v42 = vpop.eup %2448  ;;  %v924_v44 = vmul.f32 1.442695, %v874_v41  ;;  %v918_v9 = vmul.f32 1.442695, %v871_v1  ;;  %1004 = vperm.xlu0 %2428, %v2447_v39   ;;  %v4547_v39 = vld [vmem:[#allocation29_spill] sm:$0xff] }
 0x25c   : > { %989 = vperm.xlu1 %2429, %v2449_v42   ;;  %v822_v4 = vpop.xlane.xlu1 %821  ;;  %v813_v61 = vpop.xlane.xlu0 %812 }
 0x25d   : > { %2462 = vpow2.f32 %v924_v44  ;;  %v876_v57 = vsub.f32 %v4542_v17, %v822_v4  ;;  %v873_v49 = vsub.f32 %v4543_v0, %v813_v61  ;;  %v4548_v0 = vld [vmem:[#allocation34_spill] sm:$0xff] }
 0x25e   : > { %v2451_v47 = vpop.eup %2450  ;;  %2464 = vpow2.f32 %v918_v9 }
 0x25f   : > { %v2453_v25 = vpop.eup %2452  ;;  %v928_v52 = vmul.f32 1.442695, %v876_v57  ;;  %v922_v43 = vmul.f32 1.442695, %v873_v49  ;;  %1014 = vperm.xlu0 %2428, %v2451_v47   ;;  %v4549_v47 = vld [vmem:[#allocation31_spill] sm:$0xff] }
 0x260   : > { %999 = vperm.xlu1 %2429, %v2453_v25   ;;  %v828_v60 = vpop.xlane.xlu1 %827  ;;  %v819_v58 = vpop.xlane.xlu0 %818 }
 0x261   : > { %2466 = vpow2.f32 %v928_v52  ;;  %v878_v45 = vsub.f32 %v4544_v38, %v828_v60  ;;  %v875_v56 = vsub.f32 %v4545_v63, %v819_v58  ;;  %v4550_v63 = vld [vmem:[#allocation36_spill] sm:$0xff] }
 0x262   : > { %v2455_v51 = vpop.eup %2454  ;;  %2468 = vpow2.f32 %v922_v43 }
 0x263   : > { %v2457_v53 = vpop.eup %2456  ;;  %v932_v48 = vmul.f32 1.442695, %v878_v45  ;;  %v926_v55 = vmul.f32 1.442695, %v875_v56  ;;  %1024 = vperm.xlu0 %2428, %v2455_v51   ;;  %v4551_v51 = vld [vmem:[#allocation33_spill] sm:$0xff] }
 0x264   : > { %1009 = vperm.xlu1 %2429, %v2457_v53   ;;  %v834_v62 = vpop.xlane.xlu1 %833  ;;  %v825_v41 = vpop.xlane.xlu0 %824 }
 0x265   : > { %2470 = vpow2.f32 %v932_v48  ;;  %v880_v1 = vsub.f32 %v4546_v50, %v834_v62  ;;  %v877_v42 = vsub.f32 %v4547_v39, %v825_v41  ;;  %v4552_v39 = vld [vmem:[#allocation38_spill] sm:$0xff] }
 0x266   : > { %v2459_v44 = vpop.eup %2458  ;;  %2472 = vpow2.f32 %v926_v55 }
 0x267   : > { %v2461_v9 = vpop.eup %2460  ;;  %v936_v4 = vmul.f32 1.442695, %v880_v1  ;;  %v930_v61 = vmul.f32 1.442695, %v877_v42  ;;  %1034 = vperm.xlu0 %2428, %v2459_v44   ;;  %v4553_v44 = vld [vmem:[#allocation35_spill] sm:$0xff] }
 0x268   : > { %1019 = vperm.xlu1 %2429, %v2461_v9   ;;  %v840_v17 = vpop.xlane.xlu1 %839  ;;  %v831_v57 = vpop.xlane.xlu0 %830 }
 0x269   : > { %2474 = vpow2.f32 %v936_v4  ;;  %v882_v49 = vsub.f32 %v4548_v0, %v840_v17  ;;  %v879_v25 = vsub.f32 %v4549_v47, %v831_v57 }
 0x26a   : > { %v2463_v52 = vpop.eup %2462  ;;  %2476 = vpow2.f32 %v930_v61 }
 0x26b   : > { %v2465_v43 = vpop.eup %2464  ;;  %v940_v60 = vmul.f32 1.442695, %v882_v49  ;;  %v934_v58 = vmul.f32 1.442695, %v879_v25  ;;  %1044 = vperm.xlu0 %2428, %v2463_v52   ;;  %v4554_v49 = vld [vmem:[#allocation37_spill] sm:$0xff] }
 0x26c   : > { %1029 = vperm.xlu1 %2429, %v2465_v43   ;;  %v846_v38 = vpop.xlane.xlu1 %845  ;;  %v837_v45 = vpop.xlane.xlu0 %836 }
 0x26d   : > { %2478 = vpow2.f32 %v940_v60  ;;  %v884_v56 = vsub.f32 %v4550_v63, %v846_v38  ;;  %v881_v53 = vsub.f32 %v4551_v51, %v837_v45 }
 0x26e   : > { %v2467_v48 = vpop.eup %2466  ;;  %2480 = vpow2.f32 %v934_v58  ;;  %v4555_v58 = vld [vmem:[#allocation39_spill] sm:$0xff] }
 0x26f   : > { %v2469_v55 = vpop.eup %2468  ;;  %v944_v62 = vmul.f32 1.442695, %v884_v56  ;;  %v938_v41 = vmul.f32 1.442695, %v881_v53  ;;  %1054 = vperm.xlu0 %2428, %v2467_v48  }
 0x270   : > { %1039 = vperm.xlu1 %2429, %v2469_v55   ;;  %v852_v50 = vpop.xlane.xlu1 %851  ;;  %v843_v1 = vpop.xlane.xlu0 %842 }
 0x271   : > { %2482 = vpow2.f32 %v944_v62  ;;  %v886_v42 = vsub.f32 %v4552_v39, %v852_v50  ;;  %v883_v9 = vsub.f32 %v4553_v44, %v843_v1 }
 0x272   : > { %v2471_v4 = vpop.eup %2470  ;;  %2484 = vpow2.f32 %v938_v41 }
 0x273   : > { %v2473_v61 = vpop.eup %2472  ;;  %v948_v17 = vmul.f32 1.442695, %v886_v42  ;;  %v942_v57 = vmul.f32 1.442695, %v883_v9  ;;  %1064 = vperm.xlu0 %2428, %v2471_v4  }
 0x274   : > { %1049 = vperm.xlu1 %2429, %v2473_v61   ;;  %v849_v0 = vpop.xlane.xlu0 %848 }
 0x275   : > { %2486 = vpow2.f32 %v948_v17  ;;  %v885_v47 = vsub.f32 %v4554_v49, %v849_v0 }
 0x276   : > { %v2475_v25 = vpop.eup %2474  ;;  %2488 = vpow2.f32 %v942_v57 }
 0x277   : > { %v2477_v52 = vpop.eup %2476  ;;  %v946_v43 = vmul.f32 1.442695, %v885_v47  ;;  %1074 = vperm.xlu0 %2428, %v2475_v25  }
 0x278   : > { %1059 = vperm.xlu1 %2429, %v2477_v52   ;;  %v855_v60 = vpop.xlane.xlu0 %854 }
 0x279   : > { %2490 = vpow2.f32 %v946_v43  ;;  %v887_v38 = vsub.f32 %v4555_v58, %v855_v60 }
 0x27a   : > { %v2479_v45 = vpop.eup %2478 }
 0x27b   : > { %v2481_v63 = vpop.eup %2480  ;;  %v950_v56 = vmul.f32 1.442695, %v887_v38  ;;  %1084 = vperm.xlu0 %2428, %v2479_v45  }
 0x27c   : > { %1069 = vperm.xlu1 %2429, %v2481_v63  }
 0x27d   : > { %2492 = vpow2.f32 %v950_v56 }
 0x27e   : > { %v2483_v51 = vpop.eup %2482  ;;  %2494 = vpow2.f32 %v1215_v54 }
 0x27f   : > { %v2485_v53 = vpop.eup %2484  ;;  %1094 = vperm.xlu0 %2428, %v2483_v51  }
 0x280   : > { %1079 = vperm.xlu1 %2429, %v2485_v53  }
 0x282   : > { %v2487_v48 = vpop.eup %2486 }
 0x283   : > { %v2489_v55 = vpop.eup %2488  ;;  %1104 = vperm.xlu0 %2428, %v2487_v48  }
 0x284   : > { %1089 = vperm.xlu1 %2429, %v2489_v55  }
 0x286   : > { %v2491_v62 = vpop.eup %2490 }
 0x288   : > { %1099 = vperm.xlu1 %2429, %v2491_v62  }
 0x28a   : > { %v2493_v41 = vpop.eup %2492 }
 0x28c   : > { %1109 = vperm.xlu1 %2429, %v2493_v41  }
 0x2c6   : > { %v960_v50 = vpop.permute.xlu0 %959 }
 0x2c7   : > { %v955_v1 = vpop.permute.xlu1 %954  ;;  %v1113_v42 = vsel %vm2954_vm4, %v960_v50, 0.0  ;;  %vm4561_vm4 = vmmov %vm4557_vm10 }
 0x2c8   : > { %v1112_v39 = vsel %vm2944_vm2, %v955_v1, 0.0  ;;  %v1145_v4 = vsel %vm4557_vm10, %v1113_v42, 0.0  ;;  %vm4560_vm2 = vnez %v4364_v11  ;;  %vm4563_vm10 = vnez %v4374_v20 }
 0x2c9   : > { %v1144_v9 = vsel %vm4556_vm14, %v1112_v39, 0.0  ;;  %vm4562_vm14 = vmmov %vm4561_vm4 }
 0x2ca   : > { %v975_v44 = vpop.permute.xlu0 %974  ;;  %v1146_v0 = vadd.f32 %v1145_v4, %v1144_v9 }
 0x2cb   : > { %v965_v61 = vpop.permute.xlu1 %964  ;;  %v1116_v52 = vsel %vm4559_vm7, %v975_v44, 0.0 }
 0x2cc   : > { %v1114_v17 = vsel %vm2939_vm1, %v965_v61, 0.0  ;;  %v1151_v45 = vsel %vm4562_vm14, %v1116_v52, 0.0  ;;  %vm4565_vm1 = vmmov %vm4561_vm4 }
 0x2cd   : > { %v1147_v57 = vsel %vm4558_vm11, %v1114_v17, 0.0  ;;  %vm4564_vm11 = vnez %v4368_v15  ;;  %vm4566_vm7 = vmmov %vm4565_vm1 }
 0x2ce   : > { %v985_v49 = vpop.permute.xlu0 %984  ;;  %v1148_v25 = vadd.f32 %v1147_v57, %v1146_v0  ;;  %vm4569_vm14 = vmmov %vm4565_vm1 }
 0x2cf   : > { %v970_v47 = vpop.permute.xlu1 %969  ;;  %v1118_v56 = vsel %vm4563_vm10, %v985_v49, 0.0  ;;  %vm4570_vm10 = vmmov %vm4565_vm1 }
 0x2d0   : > { %v1115_v43 = vsel %vm4560_vm2, %v970_v47, 0.0  ;;  %v1155_v41 = vsel %vm4566_vm7, %v1118_v56, 0.0  ;;  %vm4567_vm2 = vnez %v4378_v24 }
 0x2d1   : > { %v1149_v60 = vsel %vm4561_vm4, %v1115_v43, 0.0  ;;  %vm4568_vm4 = vnez %v4372_v19 }
 0x2d2   : > { %v1150_v58 = vadd.f32 %v1149_v60, %v1148_v25  ;;  %v995_v38 = vpop.permute.xlu0 %994 }
 0x2d3   : > { %v980_v63 = vpop.permute.xlu1 %979  ;;  %v1120_v1 = vsel %vm4567_vm2, %v995_v38, 0.0  ;;  %vm4573_vm2 = vmmov %vm4566_vm7 }
 0x2d4   : > { %v1117_v51 = vsel %vm4564_vm11, %v980_v63, 0.0  ;;  %v1152_v53 = vadd.f32 %v1151_v45, %v1150_v58  ;;  %v1159_v61 = vsel %vm4570_vm10, %v1120_v1, 0.0  ;;  %vm4572_vm11 = vnez %v4376_v23  ;;  %vm4576_vm10 = vmmov %vm4573_vm2 }
 0x2d5   : > { %v1153_v48 = vsel %vm4565_vm1, %v1117_v51, 0.0  ;;  %vm4571_vm1 = vnez %v4382_v28 }
 0x2d6   : > { %v1154_v55 = vadd.f32 %v1153_v48, %v1152_v53  ;;  %v1005_v62 = vpop.permute.xlu0 %1004 }
 0x2d7   : > { %v990_v50 = vpop.permute.xlu1 %989  ;;  %v1122_v57 = vsel %vm4571_vm1, %v1005_v62, 0.0  ;;  %vm4577_vm1 = vmmov %vm4573_vm2 }
 0x2d8   : > { %v1119_v39 = vsel %vm4568_vm4, %v990_v50, 0.0  ;;  %v1156_v42 = vadd.f32 %v1155_v41, %v1154_v55  ;;  %v1163_v43 = vsel %vm4573_vm2, %v1122_v57, 0.0  ;;  %vm4574_vm4 = vnez %v4387_v32  ;;  %vm4580_vm2 = vmmov %vm4577_vm1 }
 0x2d9   : > { %v1157_v44 = vsel %vm4569_vm14, %v1119_v39, 0.0  ;;  %vm4575_vm14 = vnez %v4380_v27 }
 0x2da   : > { %v1158_v9 = vadd.f32 %v1157_v44, %v1156_v42  ;;  %v1015_v4 = vpop.permute.xlu0 %1014 }
 0x2db   : > { %v1000_v17 = vpop.permute.xlu1 %999  ;;  %v1124_v58 = vsel %vm4574_vm4, %v1015_v4, 0.0  ;;  %vm4581_vm4 = vmmov %vm4577_vm1 }
 0x2dc   : > { %v1121_v0 = vsel %vm4572_vm11, %v1000_v17, 0.0  ;;  %v1160_v49 = vadd.f32 %v1159_v61, %v1158_v9  ;;  %v1167_v53 = vsel %vm4577_vm1, %v1124_v58, 0.0  ;;  %vm4578_vm11 = vnez %v4393_v6 }
 0x2dd   : > { %v1161_v47 = vsel %vm4566_vm7, %v1121_v0, 0.0  ;;  %vm4579_vm7 = vnez %v4384_v31 }
 0x2de   : > { %v1162_v25 = vadd.f32 %v1161_v47, %v1160_v49  ;;  %v1025_v52 = vpop.permute.xlu0 %1024 }
 0x2df   : > { %v1010_v60 = vpop.permute.xlu1 %1009  ;;  %v1126_v55 = vsel %vm4578_vm11, %v1025_v52, 0.0  ;;  %vm4584_vm11 = vnez %v4402_v22 }
 0x2e0   : > { %v1123_v38 = vsel %vm4575_vm14, %v1010_v60, 0.0  ;;  %v1164_v45 = vadd.f32 %v1163_v43, %v1162_v25  ;;  %v1171_v42 = vsel %vm4581_vm4, %v1126_v55, 0.0  ;;  %vm4582_vm14 = vnez %v4398_v14 }
 0x2e1   : > { %v1165_v63 = vsel %vm4576_vm10, %v1123_v38, 0.0  ;;  %vm4583_vm10 = vmmov %vm4577_vm1  ;;  %vm4588_vm4 = vnez %v4407_v30 }
 0x2e2   : > { %v1166_v56 = vadd.f32 %v1165_v63, %v1164_v45  ;;  %v1035_v51 = vpop.permute.xlu0 %1034 }
 0x2e3   : > { %v1020_v48 = vpop.permute.xlu1 %1019  ;;  %v1128_v9 = vsel %vm4582_vm14, %v1035_v51, 0.0  ;;  %vm4589_vm14 = vmmov %vm4577_vm1 }
 0x2e4   : > { %v1125_v62 = vsel %vm4579_vm7, %v1020_v48, 0.0  ;;  %v1168_v41 = vadd.f32 %v1167_v53, %v1166_v56  ;;  %v1175_v49 = vsel %vm4577_vm1, %v1128_v9, 0.0  ;;  %vm4585_vm7 = vnez %v4396_v13 }
 0x2e5   : > { %v1169_v50 = vsel %vm4580_vm2, %v1125_v62, 0.0  ;;  %vm4586_vm2 = vmmov %vm4577_vm1 }
 0x2e6   : > { %v1170_v1 = vadd.f32 %v1169_v50, %v1168_v41  ;;  %v1045_v39 = vpop.permute.xlu0 %1044 }
 0x2e7   : > { %v1030_v44 = vpop.permute.xlu1 %1029  ;;  %v1130_v25 = vsel %vm4584_vm11, %v1045_v39, 0.0  ;;  %vm4592_vm11 = vmmov %vm4586_vm2 }
 0x2e8   : > { %v1127_v4 = vsel %vm4501_vm6, %v1030_v44, 0.0  ;;  %v1172_v61 = vadd.f32 %v1171_v42, %v1170_v1  ;;  %vm4587_vm6 = vmmov %vm4577_vm1 }
 0x2e9   : > { %v1173_v17 = vsel %vm4583_vm10, %v1127_v4, 0.0  ;;  %v1179_v45 = vsel %vm4587_vm6, %v1130_v25, 0.0  ;;  %vm4590_vm10 = vmmov %vm4577_vm1  ;;  %vm4591_vm1 = vnez %v4454_v35 }
 0x2ea   : > { %v1174_v57 = vadd.f32 %v1173_v17, %v1172_v61  ;;  %v1055_v0 = vpop.permute.xlu0 %1054  ;;  %vm4595_vm6 = vmmov %vm4586_vm2 }
 0x2eb   : > { %v1040_v47 = vpop.permute.xlu1 %1039  ;;  %v1132_v56 = vsel %vm4588_vm4, %v1055_v0, 0.0  ;;  %vm4597_vm4 = vmmov %vm4586_vm2 }
 0x2ec   : > { %v1129_v52 = vsel %vm4585_vm7, %v1040_v47, 0.0  ;;  %v1176_v43 = vadd.f32 %v1175_v49, %v1174_v57  ;;  %v1183_v41 = vsel %vm4590_vm10, %v1132_v56, 0.0  ;;  %vm4594_vm7 = vnez %v4460_v33  ;;  %vm4600_vm10 = vmmov %vm4586_vm2 }
 0x2ed   : > { %v1177_v60 = vsel %vm4586_vm2, %v1129_v52, 0.0 }
 0x2ee   : > { %v1178_v58 = vadd.f32 %v1177_v60, %v1176_v43  ;;  %v1065_v38 = vpop.permute.xlu0 %1064 }
 0x2ef   : > { %v1050_v63 = vpop.permute.xlu1 %1049  ;;  %v1134_v1 = vsel %vm4591_vm1, %v1065_v38, 0.0 }
 0x2f0   : > { %v1131_v51 = vsel %vm4508_vm12, %v1050_v63, 0.0  ;;  %v1180_v53 = vadd.f32 %v1179_v45, %v1178_v58  ;;  %vm4593_vm12 = vmmov %vm4586_vm2 }
 0x2f1   : > { %v1181_v48 = vsel %vm4589_vm14, %v1131_v51, 0.0  ;;  %v1187_v61 = vsel %vm4593_vm12, %v1134_v1, 0.0  ;;  %vm4598_vm14 = vmmov %vm4586_vm2 }
 0x2f2   : > { %v1182_v55 = vadd.f32 %v1181_v48, %v1180_v53  ;;  %v1075_v62 = vpop.permute.xlu0 %1074 }
 0x2f3   : > { %v1060_v50 = vpop.permute.xlu1 %1059  ;;  %v1136_v57 = vsel %vm4594_vm7, %v1075_v62, 0.0 }
 0x2f4   : > { %v1133_v39 = vsel %vm4512_vm5, %v1060_v50, 0.0  ;;  %v1184_v42 = vadd.f32 %v1183_v41, %v1182_v55  ;;  %v1191_v25 = vsel %vm4595_vm6, %v1136_v57, 0.0  ;;  %vm4596_vm5 = vnez %v4463_v40 }
 0x2f5   : > { %v1185_v44 = vsel %vm4592_vm11, %v1133_v39, 0.0 }
 0x2f6   : > { %v1186_v9 = vadd.f32 %v1185_v44, %v1184_v42  ;;  %v1085_v4 = vpop.permute.xlu0 %1084 }
 0x2f7   : > { %v1070_v17 = vpop.permute.xlu1 %1069  ;;  %v1138_v60 = vsel %vm4596_vm5, %v1085_v4, 0.0 }
 0x2f8   : > { %v1135_v0 = vsel %vm4515_vm8, %v1070_v17, 0.0  ;;  %v1188_v49 = vadd.f32 %v1187_v61, %v1186_v9  ;;  %v1195_v46 = vsel %vm4598_vm14, %v1138_v60, 0.0  ;;  %vm4599_vm8 = vnez %v4430_v26 }
 0x2f9   : > { %v1189_v35 = vsel %vm4586_vm2, %v1135_v0, 0.0 }
 0x2fa   : > { %v1190_v47 = vadd.f32 %v1189_v35, %v1188_v49  ;;  %v1095_v43 = vpop.permute.xlu0 %1094  ;;  %v2495_v35 = vpop.eup %2494 }
 0x2fb   : > { %v1080_v52 = vpop.permute.xlu1 %1079  ;;  %v1140_v56 = vsel %vm4599_vm8, %v1095_v43, 0.0 }
 0x2fc   : > { %v1137_v58 = vsel %vm4518_vm3, %v1080_v52, 0.0  ;;  %v1192_v38 = vadd.f32 %v1191_v25, %v1190_v47  ;;  %vm4601_vm3 = vmmov %vm4586_vm2  ;;  %v1213_v47 = vld [vmem:[#allocation2] sm:$0x1] }
 0x2fd   : > { %v1193_v33 = vsel %vm4597_vm4, %v1137_v58, 0.0  ;;  %v1199_v62 = vsel %vm4601_vm3, %v1140_v56, 0.0  ;;  %v1217_v52 = vmul.f32 %v2495_v35, %v1213_v47 }
 0x2fe   : > { %v1194_v45 = vadd.f32 %v1193_v33, %v1192_v38  ;;  %v1105_v48 = vpop.permute.xlu0 %1104 }
 0x2ff   : > { %v1090_v63 = vpop.permute.xlu1 %1089  ;;  %v1142_v50 = vsel %vm4471_vm9, %v1105_v48, 0.0  ;;  %vm4605_vm9 = vcmask 188416  }
 0x300   : > { %v1139_v51 = vsel %vm4521_vm0, %v1090_v63, 0.0  ;;  %v1196_v53 = vadd.f32 %v1195_v46, %v1194_v45  ;;  %vm4602_vm0 = vmmov %vm4586_vm2 }
 0x301   : > { %v1197_v40 = vsel %vm4600_vm10, %v1139_v51, 0.0  ;;  %vm4603_vm1 = vmmov %vm4602_vm0 }
 0x302   : > { %v1198_v55 = vadd.f32 %v1197_v40, %v1196_v53  ;;  %v1203_v9 = vsel %vm4603_vm1, %v1142_v50, 0.0  ;;  %vm4604_vm11 = vmmov %vm4602_vm0 }
 0x303   : > { %v1100_v41 = vpop.permute.xlu1 %1099 }
 0x304   : > { %v1141_v1 = vsel %vm3079_vm13, %v1100_v41, 0.0  ;;  %v1200_v39 = vadd.f32 %v1199_v62, %v1198_v55 }
 0x305   : > { %v1201_v42 = vsel %vm4602_vm0, %v1141_v1, 0.0 }
 0x306   : > { %v1202_v44 = vadd.f32 %v1201_v42, %v1200_v39 }
 0x307   : > { %v1110_v4 = vpop.permute.xlu1 %1109 }
 0x308   : > { %v1143_v59 = vsel %vm3089_vm15, %v1110_v4, 0.0  ;;  %v1204_v2 = vadd.f32 %v1203_v9, %v1202_v44 }
 0x309   : > { %v1205_v37 = vsel %vm4604_vm11, %v1143_v59, 0.0 }
 0x30a   : > { %v1206_v61 = vadd.f32 %v1205_v37, %v1204_v2 }
 0x30c   : > { %v1207_v17 = vrot.slane %v1206_v61, 4 }
 0x30e   : > { %v1208_v57 = vadd.f32 %v1207_v17, %v1206_v61 }
 0x310   : > { %v1209_v0 = vrot.slane %v1208_v57, 2 }
 0x312   : > { %v1210_v49 = vadd.f32 %v1209_v0, %v1208_v57 }
 0x314   : > { %v1211_v25 = vrot.slane %v1210_v49, 1 }
 0x316   : > { %v1212_v43 = vadd.f32 %v1211_v25, %v1210_v49 }
 0x318   : > { %v1218_v60 = vadd.f32 %v1217_v52, %v1212_v43 }
 0x31a   : > { %1220 = vst.msk [vmem:[#allocation2] sm:$0x1] %vm4605_vm9, %v1218_v60 }
 0x31b PF: > { %p2279_p11 = scmp.ne.s32.totalorder %s2708_s16, 1 }
 0x31d   : > { %1225 = sbr.rel (%p2279_p11) target bundleno = 1426 (0x592), region = 44 }
 0x322   : > { %v3501_v58 = vld [vmem:[#allocation5] ss:$0 sm:$0xff]  ;;  %vm1266_vm12 = vcmask 195584   ;;  %vm4606_vm7 = vnez %v4436_v10  ;;  %vm4607_vm2 = vnez %v4393_v6  ;;  %vm4608_vm6 = vnez %v4390_v5  ;;  %v3517_v51 = vld [vmem:[#allocation2] ss:$0 sm:$0xff]  ;;  %v4613_v57 = vld [vmem:[#allocation50_spill] sm:$0xff] }
 0x323   : > { %v1264_v38 = vsel %vm4606_vm7, %v3501_v58, 0.0  ;;  %v1248_v33 = vsel %vm4607_vm2, %v3501_v58, 0.0  ;;  %v1265_v45 = vsel %vm3089_vm15, %v3501_v58, 0.0  ;;  %v1249_v46 = vsel %vm4608_vm6, %v3501_v58, 0.0 }
 0x324   : > { %v1357_v63 = vsel %vm1266_vm12, %v1264_v38, 0.0  ;;  %v1309_v56 = vsel %vm1266_vm12, %v1248_v33, 0.0  ;;  %v1360_v53 = vsel %vm1266_vm12, %v1265_v45, 0.0  ;;  %v1312_v40 = vsel %vm1266_vm12, %v1249_v46, 0.0  ;;  %v4615_v46 = vld [vmem:[#allocation45_spill] sm:$0xff] }
 0x325   : > { %1358 = vadd.xlane.f32.xlu0 %v1357_v63  ;;  %1310 = vadd.xlane.f32.xlu1 %v1309_v56  ;;  %v1399_v48 = vsel %vm4606_vm7, %v3517_v51, 0.0  ;;  %v1400_v54 = vsel %vm3089_vm15, %v3517_v51, 0.0  ;;  %v1383_v41 = vsel %vm4607_vm2, %v3517_v51, 0.0  ;;  %v1384_v50 = vsel %vm4608_vm6, %v3517_v51, 0.0  ;;  %v4617_v56 = vld [vmem:[#allocation46_spill] sm:$0xff] }
 0x326   : > { %v1491_v55 = vsel %vm1266_vm12, %v1399_v48, 0.0  ;;  %v1494_v62 = vsel %vm1266_vm12, %v1400_v54, 0.0  ;;  %v1443_v1 = vsel %vm1266_vm12, %v1383_v41, 0.0  ;;  %v1446_v39 = vsel %vm1266_vm12, %v1384_v50, 0.0 }
 0x327   : > { %vm4609_vm5 = vnez %v4430_v26  ;;  %v1263_v44 = vsel %vm3079_vm13, %v3501_v58, 0.0  ;;  %vm4610_vm4 = vnez %v4384_v31  ;;  %vm4611_vm14 = vnez %v4387_v32 }
 0x328   : > { %v1262_v42 = vsel %vm4609_vm5, %v3501_v58, 0.0  ;;  %v1247_v9 = vsel %vm4610_vm4, %v3501_v58, 0.0  ;;  %v1246_v4 = vsel %vm4611_vm14, %v3501_v58, 0.0  ;;  %v1398_v59 = vsel %vm3079_vm13, %v3517_v51, 0.0 }
 0x329   : > { %1361 = vadd.xlane.f32.xlu0 %v1360_v53  ;;  %1313 = vadd.xlane.f32.xlu1 %v1312_v40  ;;  %v1397_v2 = vsel %vm4609_vm5, %v3517_v51, 0.0  ;;  %v1382_v37 = vsel %vm4610_vm4, %v3517_v51, 0.0  ;;  %v1381_v61 = vsel %vm4611_vm14, %v3517_v51, 0.0  ;;  %vm4612_vm8 = vnez %v4421_v34 }
 0x32a   : > { %v1261_v17 = vsel %vm4612_vm8, %v3501_v58, 0.0  ;;  %vm4614_vm10 = vnez %v4613_v57  ;;  %v1351_v49 = vsel %vm1266_vm12, %v1262_v42, 0.0  ;;  %v1354_v35 = vsel %vm1266_vm12, %v1263_v44, 0.0 }
 0x32b   : > { %v1260_v0 = vsel %vm4614_vm10, %v3501_v58, 0.0  ;;  %v1306_v47 = vsel %vm1266_vm12, %v1247_v9, 0.0  ;;  %v1303_v25 = vsel %vm1266_vm12, %v1246_v4, 0.0  ;;  %v1488_v52 = vsel %vm1266_vm12, %v1398_v59, 0.0 }
 0x32c   : > { %v1485_v43 = vsel %vm1266_vm12, %v1397_v2, 0.0  ;;  %v3574_v60 = vsel %vm1266_vm12, %v1382_v37, 0.0  ;;  %v3577_v38 = vsel %vm1266_vm12, %v1381_v61, 0.0  ;;  %v3580_v33 = vsel %vm1266_vm12, %v1261_v17, 0.0 }
 0x32d   : > { %1492 = vadd.xlane.f32.xlu0 %v1491_v55  ;;  %1495 = vadd.xlane.f32.xlu1 %v1494_v62  ;;  %v3583_v45 = vsel %vm1266_vm12, %v1260_v0, 0.0  ;;  %vm4616_vm3 = vnez %v4615_v46  ;;  %vm4618_vm0 = vnez %v4617_v56  ;;  %vm4619_vm1 = vnez %v4372_v19 }
 0x32e   : > { %v1257_v63 = vsel %vm4616_vm3, %v3501_v58, 0.0  ;;  %v1256_v53 = vsel %vm4618_vm0, %v3501_v58, 0.0  ;;  %v1241_v40 = vsel %vm4619_vm1, %v3501_v58, 0.0  ;;  %vm4620_vm11 = vnez %v4374_v20  ;;  %v1780_v20 = vld [vmem:[%s2805_s10 + $0xd8] sm:$0xff] }
 0x32f   : > { %v1240_v48 = vsel %vm4620_vm11, %v3501_v58, 0.0  ;;  %v3598_v54 = vsel %vm1266_vm12, %v1257_v63, 0.0  ;;  %v3601_v55 = vsel %vm1266_vm12, %v1256_v53, 0.0  ;;  %v3604_v62 = vsel %vm1266_vm12, %v1241_v40, 0.0 }
 0x330   : > { %v3607_v41 = vsel %vm1266_vm12, %v1240_v48, 0.0  ;;  %v1392_v50 = vsel %vm4616_vm3, %v3517_v51, 0.0  ;;  %v1375_v42 = vsel %vm4620_vm11, %v3517_v51, 0.0  ;;  %vm4621_vm9 = vnez %v4404_v29 }
 0x331   : > { %1444 = vadd.xlane.f32.xlu0 %v1443_v1  ;;  %1447 = vadd.xlane.f32.xlu1 %v1446_v39  ;;  %v1391_v1 = vsel %vm4618_vm0, %v3517_v51, 0.0  ;;  %v1376_v39 = vsel %vm4619_vm1, %v3517_v51, 0.0  ;;  %v3622_v44 = vsel %vm1266_vm12, %v1392_v50, 0.0  ;;  %v3631_v59 = vsel %vm1266_vm12, %v1375_v42, 0.0 }
 0x332   : > { %v3625_v9 = vsel %vm1266_vm12, %v1391_v1, 0.0  ;;  %v3628_v4 = vsel %vm1266_vm12, %v1376_v39, 0.0  ;;  %v1255_v2 = vsel %vm4621_vm9, %v3501_v58, 0.0  ;;  %vm4622_vm15 = vnez %v4407_v30 }
 0x333   : > { %v1254_v37 = vsel %vm4622_vm15, %v3501_v58, 0.0  ;;  %vm4623_vm7 = vnez %v4368_v15  ;;  %vm4624_vm13 = vnez %v4370_v16  ;;  %v3646_v0 = vsel %vm1266_vm12, %v1255_v2, 0.0  ;;  %v1765_v16 = vld [vmem:[%s2805_s10 + $0x60] sm:$0xff] }
 0x334   : > { %v1239_v61 = vsel %vm4623_vm7, %v3501_v58, 0.0  ;;  %v1238_v17 = vsel %vm4624_vm13, %v3501_v58, 0.0  ;;  %v1390_v53 = vsel %vm4621_vm9, %v3517_v51, 0.0  ;;  %v1389_v40 = vsel %vm4622_vm15, %v3517_v51, 0.0 }
 0x335   : > { %1352 = vadd.xlane.f32.xlu0 %v1351_v49  ;;  %1355 = vadd.xlane.f32.xlu1 %v1354_v35  ;;  %v3649_v49 = vsel %vm1266_vm12, %v1254_v37, 0.0  ;;  %v3652_v35 = vsel %vm1266_vm12, %v1239_v61, 0.0  ;;  %v3655_v63 = vsel %vm1266_vm12, %v1238_v17, 0.0  ;;  %v1374_v48 = vsel %vm4623_vm7, %v3517_v51, 0.0 }
 0x336   : > { %v1373_v50 = vsel %vm4624_vm13, %v3517_v51, 0.0  ;;  %v3670_v1 = vsel %vm1266_vm12, %v1390_v53, 0.0  ;;  %vm4625_vm5 = vnez %v4400_v21  ;;  %vm4626_vm6 = vnez %v4402_v22 }
 0x337   : > { %v3679_v39 = vsel %vm1266_vm12, %v1373_v50, 0.0  ;;  %v1253_v42 = vsel %vm4625_vm5, %v3501_v58, 0.0  ;;  %v1252_v2 = vsel %vm4626_vm6, %v3501_v58, 0.0  ;;  %vm4627_vm2 = vnez %v4364_v11 }
 0x338   : > { %v1237_v37 = vsel %vm4627_vm2, %v3501_v58, 0.0  ;;  %vm4628_vm4 = vnez %v4360_v7  ;;  %v3694_v17 = vsel %vm1266_vm12, %v1253_v42, 0.0  ;;  %v3697_v53 = vsel %vm1266_vm12, %v1252_v2, 0.0 }
 0x339   : > { %1307 = vadd.xlane.f32.xlu1 %v1306_v47  ;;  %1304 = vadd.xlane.f32.xlu0 %v1303_v25  ;;  %v3673_v47 = vsel %vm1266_vm12, %v1389_v40, 0.0  ;;  %v3676_v25 = vsel %vm1266_vm12, %v1374_v48, 0.0  ;;  %v1236_v61 = vsel %vm4628_vm4, %v3501_v58, 0.0  ;;  %v3700_v40 = vsel %vm1266_vm12, %v1237_v37, 0.0 }
 0x33a   : > { %v3703_v48 = vsel %vm1266_vm12, %v1236_v61, 0.0  ;;  %v1388_v50 = vsel %vm4625_vm5, %v3517_v51, 0.0  ;;  %v1387_v42 = vsel %vm4626_vm6, %v3517_v51, 0.0  ;;  %v1372_v2 = vsel %vm4627_vm2, %v3517_v51, 0.0 }
 0x33b   : > { %v1371_v37 = vsel %vm4628_vm4, %v3517_v51, 0.0  ;;  %v3718_v61 = vsel %vm1266_vm12, %v1388_v50, 0.0  ;;  %vm4629_vm14 = vnez %v4396_v13  ;;  %vm4630_vm3 = vnez %v4398_v14 }
 0x33c   : > { %v3727_v3 = vsel %vm1266_vm12, %v1371_v37, 0.0  ;;  %v1251_v10 = vsel %vm4629_vm14, %v3501_v58, 0.0  ;;  %v1250_v18 = vsel %vm4630_vm3, %v3501_v58, 0.0  ;;  %vm4631_vm0 = vnez %v4366_v12 }
 0x33d   : > { %1489 = vadd.xlane.f32.xlu1 %v1488_v52  ;;  %1486 = vadd.xlane.f32.xlu0 %v1485_v43  ;;  %v3721_v52 = vsel %vm1266_vm12, %v1387_v42, 0.0  ;;  %v3724_v43 = vsel %vm1266_vm12, %v1372_v2, 0.0  ;;  %v1235_v50 = vsel %vm4631_vm0, %v3501_v58, 0.0  ;;  %vm4632_vm9 = vnez %v4362_v8 }
 0x33e   : > { %v1234_v42 = vsel %vm4632_vm9, %v3501_v58, 0.0  ;;  %v3742_v2 = vsel %vm1266_vm12, %v1251_v10, 0.0  ;;  %v3745_v37 = vsel %vm1266_vm12, %v1250_v18, 0.0  ;;  %v3748_v26 = vsel %vm1266_vm12, %v1235_v50, 0.0 }
 0x33f   : > { %v3751_v5 = vsel %vm1266_vm12, %v1234_v42, 0.0  ;;  %v1386_v6 = vsel %vm4629_vm14, %v3517_v51, 0.0  ;;  %v1385_v10 = vsel %vm4630_vm3, %v3517_v51, 0.0  ;;  %v1370_v18 = vsel %vm4631_vm0, %v3517_v51, 0.0 }
 0x340   : > { %v1369_v50 = vsel %vm4632_vm9, %v3517_v51, 0.0  ;;  %v3774_v42 = vsel %vm1266_vm12, %v1370_v18, 0.0  ;;  %vm4633_vm15 = vnez %v4380_v27  ;;  %vm4634_vm1 = vnez %v4382_v28 }
 0x341   : > { %1441 = vadd.xlane.f32.xlu1 %v3574_v60  ;;  %1438 = vadd.xlane.f32.xlu0 %v3577_v38  ;;  %v3768_v60 = vsel %vm1266_vm12, %v1386_v6, 0.0  ;;  %v3771_v38 = vsel %vm1266_vm12, %v1385_v10, 0.0  ;;  %v3777_v31 = vsel %vm1266_vm12, %v1369_v50, 0.0  ;;  %v1245_v32 = vsel %vm4633_vm15, %v3501_v58, 0.0 }
 0x342   : > { %v1244_v46 = vsel %vm4634_vm1, %v3501_v58, 0.0  ;;  %v1300_v6 = vsel %vm1266_vm12, %v1245_v32, 0.0  ;;  %v1396_v18 = vsel %vm4612_vm8, %v3517_v51, 0.0  ;;  %v1395_v50 = vsel %vm4614_vm10, %v3517_v51, 0.0 }
 0x343   : > { %v1297_v10 = vsel %vm1266_vm12, %v1244_v46, 0.0  ;;  %v1482_v56 = vsel %vm1266_vm12, %v1396_v18, 0.0  ;;  %v2726_v29 = vmov 0   ;;  %v1380_v32 = vsel %vm4633_vm15, %v3517_v51, 0.0 }
 0x344   : > { %2497 = vset.pattern.permute.xlu1 %v2726_v29  ;;  %2496 = vset.pattern.permute.xlu0 %v2726_v29  ;;  %v1434_v46 = vsel %vm1266_vm12, %v1380_v32, 0.0  ;;  %v4637_v29 = vld [vmem:[#allocation48_spill] sm:$0xff]  ;;  %vm4639_vm15 = vnez %v4376_v23 }
 0x345   : > { %1349 = vadd.xlane.f32.xlu1 %v3580_v33  ;;  %1346 = vadd.xlane.f32.xlu0 %v3583_v45  ;;  %v1479_v33 = vsel %vm1266_vm12, %v1395_v50, 0.0  ;;  %v1379_v45 = vsel %vm4634_vm1, %v3517_v51, 0.0  ;;  %vm4638_vm10 = vnez %v4637_v29  ;;  %vm4640_vm1 = vnez %v4378_v24 }
 0x346   : > { %v1258_v50 = vsel %vm4638_vm10, %v3501_v58, 0.0 }
 0x347   : > { %v1339_v57 = vsel %vm1266_vm12, %v1258_v50, 0.0 }
 0x349   : > { %1301 = vadd.xlane.f32.xlu1 %v1300_v6  ;;  %1298 = vadd.xlane.f32.xlu0 %v1297_v10  ;;  %v1431_v6 = vsel %vm1266_vm12, %v1379_v45, 0.0  ;;  %v4635_v10 = vld [vmem:[#allocation47_spill] sm:$0xff] }
 0x34a   : > { %vm4636_vm8 = vnez %v4635_v10 }
 0x34b   : > { %v1259_v18 = vsel %vm4636_vm8, %v3501_v58, 0.0 }
 0x34c   : > { %v1342_v34 = vsel %vm1266_vm12, %v1259_v18, 0.0 }
 0x34d   : > { %1483 = vadd.xlane.f32.xlu1 %v1482_v56  ;;  %1480 = vadd.xlane.f32.xlu0 %v1479_v33  ;;  %v1243_v56 = vsel %vm4639_vm15, %v3501_v58, 0.0  ;;  %v1242_v33 = vsel %vm4640_vm1, %v3501_v58, 0.0 }
 0x34e   : > { %v1294_v32 = vsel %vm1266_vm12, %v1243_v56, 0.0  ;;  %v1291_v45 = vsel %vm1266_vm12, %v1242_v33, 0.0 }
 0x351   : > { %1435 = vadd.xlane.f32.xlu1 %v1434_v46  ;;  %1432 = vadd.xlane.f32.xlu0 %v1431_v6  ;;  %v1394_v46 = vsel %vm4636_vm8, %v3517_v51, 0.0  ;;  %v1393_v6 = vsel %vm4638_vm10, %v3517_v51, 0.0 }
 0x352   : > { %v1476_v18 = vsel %vm1266_vm12, %v1394_v46, 0.0  ;;  %v1473_v58 = vsel %vm1266_vm12, %v1393_v6, 0.0 }
 0x355   : > { %1343 = vadd.xlane.f32.xlu1 %v1342_v34  ;;  %1340 = vadd.xlane.f32.xlu0 %v1339_v57  ;;  %v1378_v34 = vsel %vm4639_vm15, %v3517_v51, 0.0  ;;  %v1377_v57 = vsel %vm4640_vm1, %v3517_v51, 0.0 }
 0x356   : > { %v1428_v50 = vsel %vm1266_vm12, %v1378_v34, 0.0  ;;  %v1425_v56 = vsel %vm1266_vm12, %v1377_v57, 0.0 }
 0x359   : > { %1295 = vadd.xlane.f32.xlu1 %v1294_v32  ;;  %1292 = vadd.xlane.f32.xlu0 %v1291_v45 }
 0x35d   : > { %1477 = vadd.xlane.f32.xlu1 %v1476_v18  ;;  %1474 = vadd.xlane.f32.xlu0 %v1473_v58 }
 0x361   : > { %1429 = vadd.xlane.f32.xlu1 %v1428_v50  ;;  %1426 = vadd.xlane.f32.xlu0 %v1425_v56  ;;  %v4647_v50 = vld [vmem:[#allocation20_spill] sm:$0xff] }
 0x365   : > { %1337 = vadd.xlane.f32.xlu1 %v3598_v54  ;;  %1334 = vadd.xlane.f32.xlu0 %v3601_v55  ;;  %v4641_v55 = vld [vmem:[#allocation38_spill] sm:$0xff] }
 0x369   : > { %1289 = vadd.xlane.f32.xlu1 %v3604_v62  ;;  %1286 = vadd.xlane.f32.xlu0 %v3607_v41 }
 0x36d   : > { %1471 = vadd.xlane.f32.xlu1 %v3622_v44  ;;  %1468 = vadd.xlane.f32.xlu0 %v3625_v9  ;;  %v4642_v9 = vld [vmem:[#allocation39_spill] sm:$0xff] }
 0x371   : > { %1423 = vadd.xlane.f32.xlu1 %v3628_v4  ;;  %1420 = vadd.xlane.f32.xlu0 %v3631_v59 }
 0x375   : > { %1331 = vadd.xlane.f32.xlu1 %v3646_v0  ;;  %1328 = vadd.xlane.f32.xlu0 %v3649_v49 }
 0x379   : > { %1283 = vadd.xlane.f32.xlu1 %v3652_v35  ;;  %1280 = vadd.xlane.f32.xlu0 %v3655_v63 }
 0x37d   : > { %1465 = vadd.xlane.f32.xlu1 %v3670_v1  ;;  %1462 = vadd.xlane.f32.xlu0 %v3673_v47 }
 0x381   : > { %1417 = vadd.xlane.f32.xlu1 %v3676_v25  ;;  %1414 = vadd.xlane.f32.xlu0 %v3679_v39 }
 0x385   : > { %1325 = vadd.xlane.f32.xlu1 %v3694_v17  ;;  %1322 = vadd.xlane.f32.xlu0 %v3697_v53 }
 0x389   : > { %1277 = vadd.xlane.f32.xlu1 %v3700_v40  ;;  %1274 = vadd.xlane.f32.xlu0 %v3703_v48 }
 0x38d   : > { %1459 = vadd.xlane.f32.xlu1 %v3718_v61  ;;  %1456 = vadd.xlane.f32.xlu0 %v3721_v52  ;;  %v4645_v52 = vld [vmem:[#allocation36_spill] sm:$0xff] }
 0x391   : > { %1411 = vadd.xlane.f32.xlu1 %v3724_v43  ;;  %1408 = vadd.xlane.f32.xlu0 %v3727_v3 }
 0x395   : > { %1319 = vadd.xlane.f32.xlu1 %v3742_v2  ;;  %1316 = vadd.xlane.f32.xlu0 %v3745_v37 }
 0x399   : > { %1271 = vadd.xlane.f32.xlu1 %v3748_v26  ;;  %1268 = vadd.xlane.f32.xlu0 %v3751_v5  ;;  %v4643_v26 = vld [vmem:[#allocation22_spill] sm:$0xff] }
 0x39d   : > { %1453 = vadd.xlane.f32.xlu1 %v3768_v60  ;;  %1450 = vadd.xlane.f32.xlu0 %v3771_v38  ;;  %v4646_v60 = vld [vmem:[#allocation37_spill] sm:$0xff] }
 0x3a1   : > { %1405 = vadd.xlane.f32.xlu1 %v3774_v42  ;;  %1402 = vadd.xlane.f32.xlu0 %v3777_v31  ;;  %v4644_v31 = vld [vmem:[#allocation23_spill] sm:$0xff] }
 0x3ae   : > { %v1359_v51 = vpop.xlane.xlu0 %1358  ;;  %v1311_v54 = vpop.xlane.xlu1 %1310 }
 0x3af   : > { %v1527_v3 = vsub.f32 %v4641_v55, %v1359_v51  ;;  %v1511_v59 = vsub.f32 %v4643_v26, %v1311_v54 }
 0x3b1   : > { %v1589_v44 = vmul.f32 1.442695, %v1527_v3  ;;  %v1557_v1 = vmul.f32 1.442695, %v1511_v59  ;;  %v4648_v59 = vld [vmem:[#allocation21_spill] sm:$0xff] }
 0x3b2   : > { %v1362_v62 = vpop.xlane.xlu0 %1361  ;;  %v1314_v41 = vpop.xlane.xlu1 %1313 }
 0x3b3   : > { %v1528_v4 = vsub.f32 %v4642_v9, %v1362_v62  ;;  %2498 = vpow2.f32 %v1589_v44  ;;  %v1512_v47 = vsub.f32 %v4644_v31, %v1314_v41 }
 0x3b5   : > { %v1591_v5 = vmul.f32 1.442695, %v1528_v4  ;;  %v1559_v40 = vmul.f32 1.442695, %v1512_v47 }
 0x3b6   : > { %v1493_v0 = vpop.xlane.xlu0 %1492  ;;  %v1496_v49 = vpop.xlane.xlu1 %1495 }
 0x3b7   : > { %v1623_v35 = vmax.f32 %v1493_v0, 1e-30  ;;  %v1624_v63 = vmax.f32 %v1496_v49, 1e-30  ;;  %2500 = vpow2.f32 %v1591_v5  ;;  %vm1687_vm12 = vcmp.gt.f32.partialorder %v1493_v0, 0.0 }
 0x3b8   : > { %vm1688_vm8 = vcmp.gt.f32.partialorder %v1496_v49, 0.0 }
 0x3b9   : > { %2502 = vrcp.f32 %v1623_v35 }
 0x3ba   : > { %2504 = vrcp.f32 %v1624_v63  ;;  %v1445_v25 = vpop.xlane.xlu0 %1444  ;;  %v3873_v39 = vpop.xlane.xlu1 %1447 }
 0x3bb   : > { %v1607_v17 = vmax.f32 %v1445_v25, 1e-30  ;;  %v1608_v53 = vmax.f32 %v3873_v39, 1e-30  ;;  %2506 = vpow2.f32 %v1557_v1  ;;  %vm1671_vm10 = vcmp.gt.f32.partialorder %v1445_v25, 0.0 }
 0x3bd   : > { %2508 = vrcp.f32 %v1607_v17 }
 0x3be   : > { %2510 = vrcp.f32 %v1608_v53  ;;  %v1353_v48 = vpop.xlane.xlu0 %1352  ;;  %v1356_v61 = vpop.xlane.xlu1 %1355  ;;  %v4649_v53 = vld [vmem:[#allocation35_spill] sm:$0xff] }
 0x3bf   : > { %2512 = vpow2.f32 %v1559_v40  ;;  %v1525_v43 = vsub.f32 %v4645_v52, %v1353_v48  ;;  %v1526_v38 = vsub.f32 %v4646_v60, %v1356_v61  ;;  %v4650_v61 = vld [vmem:[#allocation34_spill] sm:$0xff]  ;;  %v4651_v60 = vld [vmem:[#allocation19_spill] sm:$0xff] }
 0x3c0   : > { %v2499_v42 = vpop.eup %2498 }
 0x3c1   : > { %v1585_v33 = vmul.f32 1.442695, %v1525_v43  ;;  %v1587_v58 = vmul.f32 1.442695, %v1526_v38 }
 0x3c2   : > { %v1308_v2 = vpop.xlane.xlu1 %1307  ;;  %v1305_v37 = vpop.xlane.xlu0 %1304 }
 0x3c3   : > { %2514 = vpow2.f32 %v1585_v33  ;;  %v1509_v56 = vsub.f32 %v4647_v50, %v1305_v37  ;;  %v1510_v5 = vsub.f32 %v4648_v59, %v1308_v2  ;;  %v4652_v33 = vld [vmem:[#allocation18_spill] sm:$0xff] }
 0x3c4   : > { %v2501_v32 = vpop.eup %2500 }
 0x3c5   : > { %v1553_v35 = vmul.f32 1.442695, %v1509_v56  ;;  %v1555_v48 = vmul.f32 1.442695, %v1510_v5 }
 0x3c6   : > { %v2503_v45 = vpop.eup %2502  ;;  %v3878_v46 = vpop.xlane.xlu1 %1489 }
 0x3c7   : > { %v3880_v6 = vpop.xlane.xlu0 %1486  ;;  %v2505_v18 = vpop.eup %2504  ;;  %v1622_v34 = vmax.f32 %v3878_v46, 1e-30  ;;  %v1719_v54 = vmul.f32 %v2503_v45, %v2499_v42 }
 0x3c8   : > { %v1621_v57 = vmax.f32 %v3880_v6, 1e-30  ;;  %v1720_v51 = vmul.f32 %v2505_v18, %v2501_v32  ;;  %v2507_v55 = vpop.eup %2506 }
 0x3c9   : > { %2516 = vrcp.f32 %v1622_v34  ;;  %v1751_v9 = vsel %vm1687_vm12, %v1719_v54, 0.0  ;;  %vm1686_vm12 = vcmp.gt.f32.partialorder %v3878_v46, 0.0 }
 0x3ca   : > { %v2509_v3 = vpop.eup %2508  ;;  %2518 = vrcp.f32 %v1621_v57  ;;  %v3885_v62 = vpop.xlane.xlu1 %1441  ;;  %v1752_v44 = vsel %vm1688_vm8, %v1720_v51, 0.0  ;;  %1937 = vperm.xlu0 %2496, %v1751_v9   ;;  %vm1672_vm8 = vcmp.gt.f32.partialorder %v3873_v39, 0.0 }
 0x3cb   : > { %v3887_v41 = vpop.xlane.xlu0 %1438  ;;  %v2511_v4 = vpop.eup %2510  ;;  %1942 = vperm.xlu1 %2497, %v1752_v44   ;;  %2520 = vpow2.f32 %v1587_v58  ;;  %v1703_v0 = vmul.f32 %v2509_v3, %v2507_v55  ;;  %v1606_v63 = vmax.f32 %v3885_v62, 1e-30 }
 0x3cc   : > { %v1605_v26 = vmax.f32 %v3887_v41, 1e-30  ;;  %v2513_v49 = vpop.eup %2512 }
 0x3cd   : > { %v1735_v47 = vsel %vm1671_vm10, %v1703_v0, 0.0  ;;  %v1704_v17 = vmul.f32 %v2513_v49, %v2511_v4  ;;  %vm1685_vm10 = vcmp.gt.f32.partialorder %v3880_v6, 0.0 }
 0x3ce   : > { %2522 = vrcp.f32 %v1605_v26  ;;  %v1350_v1 = vpop.xlane.xlu1 %1349 }
 0x3cf   : > { %v1347_v31 = vpop.xlane.xlu0 %1346  ;;  %v1524_v40 = vsub.f32 %v4649_v53, %v1350_v1  ;;  %1857 = vperm.xlu1 %2497, %v1735_v47   ;;  %2524 = vpow2.f32 %v1553_v35  ;;  %v1736_v25 = vsel %vm1672_vm8, %v1704_v17, 0.0  ;;  %v4654_v17 = vld [vmem:[#allocation32_spill] sm:$0xff]  ;;  %vm1669_vm8 = vcmp.gt.f32.partialorder %v3887_v41, 0.0 }
 0x3d0   : > { %v1523_v52 = vsub.f32 %v4650_v61, %v1347_v31  ;;  %2526 = vrcp.f32 %v1606_v63  ;;  %v2515_v45 = vpop.eup %2514  ;;  %v4653_v31 = vld [vmem:[#allocation33_spill] sm:$0xff] }
 0x3d1   : > { %v1583_v37 = vmul.f32 1.442695, %v1524_v40  ;;  %2528 = vpow2.f32 %v1555_v48 }
 0x3d2   : > { %v1302_v43 = vpop.xlane.xlu1 %1301  ;;  %v1581_v42 = vmul.f32 1.442695, %v1523_v52 }
 0x3d3   : > { %v1299_v2 = vpop.xlane.xlu0 %1298  ;;  %v1508_v38 = vsub.f32 %v4651_v60, %v1302_v43  ;;  %1862 = vperm.xlu1 %2497, %v1736_v25   ;;  %2530 = vpow2.f32 %v1583_v37 }
 0x3d4   : > { %v1507_v32 = vsub.f32 %v4652_v33, %v1299_v2  ;;  %2532 = vpow2.f32 %v1581_v42  ;;  %v4655_v2 = vld [vmem:[#allocation17_spill] sm:$0xff] }
 0x3d5   : > { %v1551_v39 = vmul.f32 1.442695, %v1508_v38  ;;  %v4656_v38 = vld [vmem:[#allocation16_spill] sm:$0xff] }
 0x3d6   : > { %v2517_v18 = vpop.eup %2516  ;;  %v3897_v58 = vpop.xlane.xlu1 %1483  ;;  %v1549_v51 = vmul.f32 1.442695, %v1507_v32 }
 0x3d7   : > { %v3899_v34 = vpop.xlane.xlu0 %1480  ;;  %v2519_v57 = vpop.eup %2518  ;;  %v1620_v50 = vmax.f32 %v3897_v58, 1e-30 }
 0x3d8   : > { %v1619_v56 = vmax.f32 %v3899_v34, 1e-30  ;;  %v1717_v54 = vmul.f32 %v2519_v57, %v2515_v45  ;;  %v2521_v55 = vpop.eup %2520 }
 0x3d9   : > { %2534 = vrcp.f32 %v1620_v50  ;;  %v1718_v4 = vmul.f32 %v2521_v55, %v2517_v18 }
 0x3da   : > { %2536 = vrcp.f32 %v1619_v56  ;;  %v3904_v3 = vpop.xlane.xlu1 %1435  ;;  %v1749_v9 = vsel %vm1685_vm10, %v1717_v54, 0.0  ;;  %vm1670_vm10 = vcmp.gt.f32.partialorder %v3885_v62, 0.0 }
 0x3db   : > { %v3906_v44 = vpop.xlane.xlu0 %1432  ;;  %v2523_v26 = vpop.eup %2522  ;;  %2538 = vpow2.f32 %v1551_v39  ;;  %v1604_v59 = vmax.f32 %v3904_v3, 1e-30  ;;  %1927 = vperm.xlu1 %2497, %v1749_v9   ;;  %v1750_v49 = vsel %vm1686_vm12, %v1718_v4, 0.0  ;;  %vm1684_vm12 = vcmp.gt.f32.partialorder %v3897_v58, 0.0 }
 0x3dc   : > { %v1603_v5 = vmax.f32 %v3906_v44, 1e-30  ;;  %2540 = vpow2.f32 %v1549_v51  ;;  %v2525_v35 = vpop.eup %2524  ;;  %vm1667_vm15 = vcmp.gt.f32.partialorder %v3906_v44, 0.0  ;;  %v4660_v44 = vld [vmem:[#allocation14_spill] sm:$0xff] }
 0x3dd   : > { %2542 = vrcp.f32 %v1604_v59  ;;  %v1701_v63 = vmul.f32 %v2525_v35, %v2523_v26  ;;  %v2527_v1 = vpop.eup %2526 }
 0x3de   : > { %2544 = vrcp.f32 %v1603_v5  ;;  %v1344_v6 = vpop.xlane.xlu1 %1343  ;;  %v2529_v40 = vpop.eup %2528 }
 0x3df   : > { %v1341_v0 = vpop.xlane.xlu0 %1340  ;;  %v1522_v47 = vsub.f32 %v4653_v31, %v1344_v6  ;;  %1932 = vperm.xlu1 %2497, %v1750_v49   ;;  %v1733_v52 = vsel %vm1669_vm8, %v1701_v63, 0.0  ;;  %v1702_v43 = vmul.f32 %v2529_v40, %v2527_v1  ;;  %vm1683_vm8 = vcmp.gt.f32.partialorder %v3899_v34, 0.0  ;;  %v4658_v40 = vld [vmem:[#allocation30_spill] sm:$0xff] }
 0x3e0   : > { %v1521_v53 = vsub.f32 %v4654_v17, %v1341_v0  ;;  %v2531_v37 = vpop.eup %2530  ;;  %v4657_v17 = vld [vmem:[#allocation31_spill] sm:$0xff] }
 0x3e1   : > { %v1579_v46 = vmul.f32 1.442695, %v1522_v47  ;;  %v2533_v33 = vpop.eup %2532  ;;  %v1734_v41 = vsel %vm1670_vm10, %v1702_v43, 0.0  ;;  %vm1668_vm10 = vcmp.gt.f32.partialorder %v3904_v3, 0.0 }
 0x3e2   : > { %v1296_v48 = vpop.xlane.xlu1 %1295  ;;  %v1577_v60 = vmul.f32 1.442695, %v1521_v53 }
 0x3e3   : > { %v1293_v61 = vpop.xlane.xlu0 %1292  ;;  %v1506_v25 = vsub.f32 %v4655_v2, %v1296_v48  ;;  %1847 = vperm.xlu1 %2497, %v1733_v52   ;;  %2546 = vpow2.f32 %v1579_v46  ;;  %v4659_v46 = vld [vmem:[#allocation15_spill] sm:$0xff] }
 0x3e4   : > { %v1505_v42 = vsub.f32 %v4656_v38, %v1293_v61  ;;  %2548 = vpow2.f32 %v1577_v60 }
 0x3e5   : > { %v1547_v39 = vmul.f32 1.442695, %v1506_v25 }
 0x3e6   : > { %v2535_v32 = vpop.eup %2534  ;;  %v3917_v45 = vpop.xlane.xlu1 %1477  ;;  %v1545_v54 = vmul.f32 1.442695, %v1505_v42 }
 0x3e7   : > { %v3919_v18 = vpop.xlane.xlu0 %1474  ;;  %v2537_v57 = vpop.eup %2536  ;;  %v1618_v50 = vmax.f32 %v3917_v45, 1e-30  ;;  %1852 = vperm.xlu1 %2497, %v1734_v41   ;;  %v1716_v9 = vmul.f32 %v2535_v32, %v2531_v37 }
 0x3e8   : > { %v1617_v56 = vmax.f32 %v3919_v18, 1e-30  ;;  %v2539_v51 = vpop.eup %2538  ;;  %v1715_v55 = vmul.f32 %v2537_v57, %v2533_v33 }
 0x3e9   : > { %v2541_v62 = vpop.eup %2540  ;;  %2550 = vrcp.f32 %v1618_v50  ;;  %v1748_v35 = vsel %vm1684_vm12, %v1716_v9, 0.0  ;;  %vm1681_vm12 = vcmp.gt.f32.partialorder %v3919_v18, 0.0 }
 0x3ea   : > { %v2543_v4 = vpop.eup %2542  ;;  %2552 = vrcp.f32 %v1617_v56  ;;  %v3925_v26 = vpop.xlane.xlu1 %1429  ;;  %v1747_v5 = vsel %vm1683_vm8, %v1715_v55, 0.0  ;;  %1922 = vperm.xlu0 %2496, %v1748_v35  }
 0x3eb   : > { %v3927_v59 = vpop.xlane.xlu0 %1426  ;;  %v2545_v6 = vpop.eup %2544  ;;  %2554 = vpow2.f32 %v1547_v39  ;;  %v1602_v0 = vmax.f32 %v3925_v26, 1e-30  ;;  %1917 = vperm.xlu1 %2497, %v1747_v5   ;;  %v1700_v34 = vmul.f32 %v2543_v4, %v2539_v51  ;;  %vm1666_vm8 = vcmp.gt.f32.partialorder %v3925_v26, 0.0 }
 0x3ec   : > { %v1601_v49 = vmax.f32 %v3927_v59, 1e-30  ;;  %2556 = vpow2.f32 %v1545_v54  ;;  %v1699_v58 = vmul.f32 %v2545_v6, %v2541_v62 }
 0x3ed   : > { %2558 = vrcp.f32 %v1602_v0  ;;  %v1732_v47 = vsel %vm1668_vm10, %v1700_v34, 0.0  ;;  %vm1665_vm10 = vcmp.gt.f32.partialorder %v3927_v59, 0.0  ;;  %v4664_v59 = vld [vmem:[#allocation12_spill] sm:$0xff] }
 0x3ee   : > { %2560 = vrcp.f32 %v1601_v49  ;;  %v1338_v63 = vpop.xlane.xlu1 %1337  ;;  %v1731_v31 = vsel %vm1667_vm15, %v1699_v58, 0.0  ;;  %1842 = vperm.xlu0 %2496, %v1732_v47   ;;  %vm1682_vm15 = vcmp.gt.f32.partialorder %v3917_v45, 0.0 }
 0x3ef   : > { %v1335_v1 = vpop.xlane.xlu0 %1334  ;;  %v1520_v53 = vsub.f32 %v4657_v17, %v1338_v63  ;;  %1837 = vperm.xlu1 %2497, %v1731_v31   ;;  %v4661_v31 = vld [vmem:[#allocation29_spill] sm:$0xff]  ;;  %v4662_v17 = vld [vmem:[#allocation28_spill] sm:$0xff] }
 0x3f0   : > { %v1519_v48 = vsub.f32 %v4658_v40, %v1335_v1  ;;  %v2547_v3 = vpop.eup %2546 }
 0x3f1   : > { %v1575_v43 = vmul.f32 1.442695, %v1520_v53  ;;  %v2549_v60 = vpop.eup %2548 }
 0x3f2   : > { %v1290_v61 = vpop.xlane.xlu1 %1289  ;;  %v1573_v25 = vmul.f32 1.442695, %v1519_v48 }
 0x3f3   : > { %v1287_v52 = vpop.xlane.xlu0 %1286  ;;  %v1504_v2 = vsub.f32 %v4659_v46, %v1290_v61  ;;  %2562 = vpow2.f32 %v1575_v43 }
 0x3f4   : > { %v1503_v37 = vsub.f32 %v4660_v44, %v1287_v52  ;;  %2564 = vpow2.f32 %v1573_v25  ;;  %v4663_v52 = vld [vmem:[#allocation13_spill] sm:$0xff] }
 0x3f5   : > { %v1543_v41 = vmul.f32 1.442695, %v1504_v2 }
 0x3f6   : > { %v2551_v38 = vpop.eup %2550  ;;  %v3937_v42 = vpop.xlane.xlu1 %1471  ;;  %v1541_v56 = vmul.f32 1.442695, %v1503_v37 }
 0x3f7   : > { %v3939_v33 = vpop.xlane.xlu0 %1468  ;;  %v2553_v32 = vpop.eup %2552  ;;  %v1616_v57 = vmax.f32 %v3937_v42, 1e-30  ;;  %v1714_v54 = vmul.f32 %v2551_v38, %v2547_v3 }
 0x3f8   : > { %v1615_v39 = vmax.f32 %v3939_v33, 1e-30  ;;  %v2555_v50 = vpop.eup %2554  ;;  %v1713_v51 = vmul.f32 %v2553_v32, %v2549_v60 }
 0x3f9   : > { %v2557_v55 = vpop.eup %2556  ;;  %2566 = vrcp.f32 %v1616_v57  ;;  %v1746_v35 = vsel %vm1682_vm15, %v1714_v54, 0.0  ;;  %vm1680_vm15 = vcmp.gt.f32.partialorder %v3937_v42, 0.0 }
 0x3fa   : > { %v2559_v9 = vpop.eup %2558  ;;  %2568 = vrcp.f32 %v1615_v39  ;;  %v3945_v62 = vpop.xlane.xlu1 %1423  ;;  %v1745_v5 = vsel %vm1681_vm12, %v1713_v51, 0.0  ;;  %1912 = vperm.xlu0 %2496, %v1746_v35   ;;  %vm1679_vm12 = vcmp.gt.f32.partialorder %v3939_v33, 0.0 }
 0x3fb   : > { %v3947_v4 = vpop.xlane.xlu0 %1420  ;;  %v2561_v6 = vpop.eup %2560  ;;  %2570 = vpow2.f32 %v1543_v41  ;;  %v1600_v0 = vmax.f32 %v3945_v62, 1e-30  ;;  %1907 = vperm.xlu1 %2497, %v1745_v5   ;;  %v1698_v18 = vmul.f32 %v2559_v9, %v2555_v50 }
 0x3fc   : > { %v1599_v49 = vmax.f32 %v3947_v4, 1e-30  ;;  %2572 = vpow2.f32 %v1541_v56  ;;  %v1697_v45 = vmul.f32 %v2561_v6, %v2557_v55 }
 0x3fd   : > { %2574 = vrcp.f32 %v1600_v0  ;;  %v1730_v1 = vsel %vm1666_vm8, %v1698_v18, 0.0  ;;  %vm1664_vm8 = vcmp.gt.f32.partialorder %v3945_v62, 0.0 }
 0x3fe   : > { %2576 = vrcp.f32 %v1599_v49  ;;  %v1332_v58 = vpop.xlane.xlu1 %1331  ;;  %v1729_v63 = vsel %vm1665_vm10, %v1697_v45, 0.0  ;;  %1832 = vperm.xlu0 %2496, %v1730_v1   ;;  %vm1663_vm10 = vcmp.gt.f32.partialorder %v3947_v4, 0.0  ;;  %v4668_v4 = vld [vmem:[#allocation10_spill] sm:$0xff] }
 0x3ff   : > { %v1329_v34 = vpop.xlane.xlu0 %1328  ;;  %v1518_v47 = vsub.f32 %v4661_v31, %v1332_v58  ;;  %1827 = vperm.xlu1 %2497, %v1729_v63   ;;  %v4665_v63 = vld [vmem:[#allocation27_spill] sm:$0xff]  ;;  %v4666_v31 = vld [vmem:[#allocation26_spill] sm:$0xff] }
 0x400   : > { %v1517_v53 = vsub.f32 %v4662_v17, %v1329_v34  ;;  %v2563_v26 = vpop.eup %2562 }
 0x401   : > { %v1571_v61 = vmul.f32 1.442695, %v1518_v47  ;;  %v2565_v3 = vpop.eup %2564 }
 0x402   : > { %v1284_v40 = vpop.xlane.xlu1 %1283  ;;  %v1569_v46 = vmul.f32 1.442695, %v1517_v53 }
 0x403   : > { %v1281_v48 = vpop.xlane.xlu0 %1280  ;;  %v1502_v43 = vsub.f32 %v4663_v52, %v1284_v40  ;;  %2578 = vpow2.f32 %v1571_v61 }
 0x404   : > { %v1501_v2 = vsub.f32 %v4664_v59, %v1281_v48  ;;  %2580 = vpow2.f32 %v1569_v46  ;;  %v4667_v48 = vld [vmem:[#allocation11_spill] sm:$0xff] }
 0x405   : > { %v1539_v38 = vmul.f32 1.442695, %v1502_v43 }
 0x406   : > { %v2567_v25 = vpop.eup %2566  ;;  %v3957_v44 = vpop.xlane.xlu1 %1465  ;;  %v1537_v39 = vmul.f32 1.442695, %v1501_v2 }
 0x407   : > { %v3959_v37 = vpop.xlane.xlu0 %1462  ;;  %v2569_v60 = vpop.eup %2568  ;;  %v1614_v32 = vmax.f32 %v3957_v44, 1e-30  ;;  %v1712_v56 = vmul.f32 %v2567_v25, %v2563_v26 }
 0x408   : > { %v1613_v41 = vmax.f32 %v3959_v37, 1e-30  ;;  %v2571_v57 = vpop.eup %2570  ;;  %v1711_v50 = vmul.f32 %v2569_v60, %v2565_v3 }
 0x409   : > { %v2573_v51 = vpop.eup %2572  ;;  %2582 = vrcp.f32 %v1614_v32  ;;  %v1744_v35 = vsel %vm1680_vm15, %v1712_v56, 0.0  ;;  %vm1678_vm15 = vcmp.gt.f32.partialorder %v3957_v44, 0.0 }
 0x40a   : > { %v2575_v54 = vpop.eup %2574  ;;  %2584 = vrcp.f32 %v1613_v41  ;;  %v3965_v55 = vpop.xlane.xlu1 %1417  ;;  %v1743_v5 = vsel %vm1679_vm12, %v1711_v50, 0.0  ;;  %1902 = vperm.xlu0 %2496, %v1744_v35   ;;  %vm1677_vm12 = vcmp.gt.f32.partialorder %v3959_v37, 0.0 }
 0x40b   : > { %v3967_v9 = vpop.xlane.xlu0 %1414  ;;  %v2577_v6 = vpop.eup %2576  ;;  %2586 = vpow2.f32 %v1539_v38  ;;  %v1598_v0 = vmax.f32 %v3965_v55, 1e-30  ;;  %1897 = vperm.xlu1 %2497, %v1743_v5   ;;  %v1696_v33 = vmul.f32 %v2575_v54, %v2571_v57 }
 0x40c   : > { %v1597_v49 = vmax.f32 %v3967_v9, 1e-30  ;;  %2588 = vpow2.f32 %v1537_v39  ;;  %v1695_v42 = vmul.f32 %v2577_v6, %v2573_v51 }
 0x40d   : > { %2590 = vrcp.f32 %v1598_v0  ;;  %v1728_v34 = vsel %vm1664_vm8, %v1696_v33, 0.0  ;;  %vm1662_vm8 = vcmp.gt.f32.partialorder %v3965_v55, 0.0 }
 0x40e   : > { %2592 = vrcp.f32 %v1597_v49  ;;  %v1326_v45 = vpop.xlane.xlu1 %1325  ;;  %v1727_v58 = vsel %vm1663_vm10, %v1695_v42, 0.0  ;;  %1822 = vperm.xlu0 %2496, %v1728_v34   ;;  %vm1661_vm10 = vcmp.gt.f32.partialorder %v3967_v9, 0.0  ;;  %v4671_v9 = vld [vmem:[#allocation9_spill] sm:$0xff] }
 0x40f   : > { %v1323_v18 = vpop.xlane.xlu0 %1322  ;;  %v1516_v1 = vsub.f32 %v4665_v63, %v1326_v45  ;;  %1817 = vperm.xlu1 %2497, %v1727_v58   ;;  %v4669_v58 = vld [vmem:[#allocation25_spill] sm:$0xff]  ;;  %v4670_v63 = vld [vmem:[#allocation24_spill] sm:$0xff] }
 0x410   : > { %v1515_v47 = vsub.f32 %v4666_v31, %v1323_v18  ;;  %v2579_v62 = vpop.eup %2578 }
 0x411   : > { %v1567_v40 = vmul.f32 1.442695, %v1516_v1  ;;  %v2581_v26 = vpop.eup %2580 }
 0x412   : > { %v1278_v17 = vpop.xlane.xlu1 %1277  ;;  %v1565_v52 = vmul.f32 1.442695, %v1515_v47 }
 0x413   : > { %v1275_v53 = vpop.xlane.xlu0 %1274  ;;  %v1500_v61 = vsub.f32 %v4667_v48, %v1278_v17  ;;  %2594 = vpow2.f32 %v1567_v40 }
 0x414   : > { %v1499_v43 = vsub.f32 %v4668_v4, %v1275_v53  ;;  %2596 = vpow2.f32 %v1565_v52 }
 0x415   : > { %v1535_v25 = vmul.f32 1.442695, %v1500_v61 }
 0x416   : > { %v2583_v46 = vpop.eup %2582  ;;  %v3977_v59 = vpop.xlane.xlu1 %1459  ;;  %v1533_v41 = vmul.f32 1.442695, %v1499_v43 }
 0x417   : > { %v3979_v2 = vpop.xlane.xlu0 %1456  ;;  %v2585_v3 = vpop.eup %2584  ;;  %v1612_v60 = vmax.f32 %v3977_v59, 1e-30  ;;  %v1710_v39 = vmul.f32 %v2583_v46, %v2579_v62 }
 0x418   : > { %v1611_v38 = vmax.f32 %v3979_v2, 1e-30  ;;  %v2587_v32 = vpop.eup %2586  ;;  %v1709_v57 = vmul.f32 %v2585_v3, %v2581_v26 }
 0x419   : > { %v2589_v50 = vpop.eup %2588  ;;  %2598 = vrcp.f32 %v1612_v60  ;;  %v1742_v35 = vsel %vm1678_vm15, %v1710_v39, 0.0  ;;  %vm1676_vm15 = vcmp.gt.f32.partialorder %v3977_v59, 0.0 }
 0x41a   : > { %v2591_v56 = vpop.eup %2590  ;;  %2600 = vrcp.f32 %v1611_v38  ;;  %v3985_v51 = vpop.xlane.xlu1 %1411  ;;  %v1741_v5 = vsel %vm1677_vm12, %v1709_v57, 0.0  ;;  %1892 = vperm.xlu0 %2496, %v1742_v35   ;;  %vm1675_vm12 = vcmp.gt.f32.partialorder %v3979_v2, 0.0 }
 0x41b   : > { %v3987_v54 = vpop.xlane.xlu0 %1408  ;;  %v2593_v6 = vpop.eup %2592  ;;  %2602 = vpow2.f32 %v1535_v25  ;;  %v1596_v0 = vmax.f32 %v3985_v51, 1e-30  ;;  %1887 = vperm.xlu1 %2497, %v1741_v5   ;;  %v1694_v37 = vmul.f32 %v2591_v56, %v2587_v32 }
 0x41c   : > { %v1595_v49 = vmax.f32 %v3987_v54, 1e-30  ;;  %2604 = vpow2.f32 %v1533_v41  ;;  %v1693_v44 = vmul.f32 %v2593_v6, %v2589_v50 }
 0x41d   : > { %2606 = vrcp.f32 %v1596_v0  ;;  %v1726_v18 = vsel %vm1662_vm8, %v1694_v37, 0.0  ;;  %vm1660_vm8 = vcmp.gt.f32.partialorder %v3985_v51, 0.0 }
 0x41e   : > { %2608 = vrcp.f32 %v1595_v49  ;;  %v1320_v42 = vpop.xlane.xlu1 %1319  ;;  %v1725_v45 = vsel %vm1661_vm10, %v1693_v44, 0.0  ;;  %1812 = vperm.xlu0 %2496, %v1726_v18   ;;  %vm1659_vm10 = vcmp.gt.f32.partialorder %v3987_v54, 0.0 }
 0x41f   : > { %v1317_v33 = vpop.xlane.xlu0 %1316  ;;  %v1514_v34 = vsub.f32 %v4669_v58, %v1320_v42  ;;  %1807 = vperm.xlu1 %2497, %v1725_v45  }
 0x420   : > { %v1513_v1 = vsub.f32 %v4670_v63, %v1317_v33  ;;  %v2595_v55 = vpop.eup %2594 }
 0x421   : > { %v1563_v17 = vmul.f32 1.442695, %v1514_v34  ;;  %v2597_v61 = vpop.eup %2596 }
 0x422   : > { %v1272_v31 = vpop.xlane.xlu1 %1271  ;;  %v1561_v40 = vmul.f32 1.442695, %v1513_v1 }
 0x423   : > { %v1269_v47 = vpop.xlane.xlu0 %1268  ;;  %v1498_v53 = vsub.f32 %v2843_v36, %v1272_v31  ;;  %2610 = vpow2.f32 %v1563_v17 }
 0x424   : > { %v1497_v48 = vsub.f32 %v4671_v9, %v1269_v47  ;;  %2612 = vpow2.f32 %v1561_v40  ;;  %v1783_v40 = vld [vmem:[%s2805_s10 + $0xf0] sm:$0xff] }
 0x425   : > { %v1531_v26 = vmul.f32 1.442695, %v1498_v53 }
 0x426   : > { %v2599_v62 = vpop.eup %2598  ;;  %v1454_v52 = vpop.xlane.xlu1 %1453  ;;  %v1529_v60 = vmul.f32 1.442695, %v1497_v48 }
 0x427   : > { %v1451_v4 = vpop.xlane.xlu0 %1450  ;;  %v2601_v43 = vpop.eup %2600  ;;  %v1610_v46 = vmax.f32 %v1454_v52, 1e-30  ;;  %v1708_v32 = vmul.f32 %v2599_v62, %v2595_v55  ;;  %v1784_v55 = vld [vmem:[%s2805_s10 + $0xf8] sm:$0xff] }
 0x428   : > { %v1609_v3 = vmax.f32 %v1451_v4, 1e-30  ;;  %v2603_v25 = vpop.eup %2602  ;;  %v1707_v38 = vmul.f32 %v2601_v43, %v2597_v61  ;;  %v1767_v43 = vld [vmem:[%s2805_s10 + $0x70] sm:$0xff] }
 0x429   : > { %v2605_v41 = vpop.eup %2604  ;;  %2614 = vrcp.f32 %v1610_v46  ;;  %v1740_v50 = vsel %vm1676_vm15, %v1708_v32, 0.0  ;;  %vm1674_vm15 = vcmp.gt.f32.partialorder %v1454_v52, 0.0 }
 0x42a   : > { %v2607_v36 = vpop.eup %2606  ;;  %2616 = vrcp.f32 %v1609_v3  ;;  %v1739_v57 = vsel %vm1675_vm12, %v1707_v38, 0.0  ;;  %v1406_v39 = vpop.xlane.xlu1 %1405  ;;  %1882 = vperm.xlu0 %2496, %v1740_v50   ;;  %vm1673_vm12 = vcmp.gt.f32.partialorder %v1451_v4, 0.0  ;;  %v2727_v38 = vmov 0.0  }
 0x42b   : > { %v1403_v56 = vpop.xlane.xlu0 %1402  ;;  %v2609_v5 = vpop.eup %2608  ;;  %2618 = vpow2.f32 %v1531_v26  ;;  %1877 = vperm.xlu1 %2497, %v1739_v57   ;;  %v1594_v35 = vmax.f32 %v1406_v39, 1e-30  ;;  %v1692_v49 = vmul.f32 %v2607_v36, %v2603_v25  ;;  %v1768_v26 = vld [vmem:[%s2805_s10 + $0x78] sm:$0xff]  ;;  %v2282_v32 = vsel %vm4632_vm9, 1.0, %v2727_v38  ;;  %v1781_v57 = vld [vmem:[%s2805_s10 + $0xe0] sm:$0xff] }
 0x42c   : > { %v1593_v6 = vmax.f32 %v1403_v56, 1e-30  ;;  %2620 = vpow2.f32 %v1529_v60  ;;  %v1691_v0 = vmul.f32 %v2609_v5, %v2605_v41  ;;  %v2283_v41 = vsel %vm4631_vm0, 1.0, %v2727_v38 }
 0x42d   : > { %2622 = vrcp.f32 %v1594_v35  ;;  %v1724_v2 = vsel %vm1660_vm8, %v1692_v49, 0.0  ;;  %vm1658_vm8 = vcmp.gt.f32.partialorder %v1406_v39, 0.0  ;;  %v1782_v39 = vld [vmem:[%s2805_s10 + $0xe8] sm:$0xff]  ;;  %v2060_v50 = vpack.c.bf16 %v2283_v41, %v2282_v32 }
 0x42e   : > { %2624 = vrcp.f32 %v1593_v6  ;;  %v1723_v59 = vsel %vm1659_vm10, %v1691_v0, 0.0  ;;  %1802 = vperm.xlu0 %2496, %v1724_v2   ;;  %vm1657_vm10 = vcmp.gt.f32.partialorder %v1403_v56, 0.0  ;;  %v2284_v56 = vsel %vm4628_vm4, 1.0, %v2727_v38 }
 0x42f   : > { %1797 = vperm.xlu1 %2497, %v1723_v59   ;;  %v2285_v5 = vsel %vm4627_vm2, 1.0, %v2727_v38  ;;  %v2298_v12 = vsel %vm4630_vm3, 1.0, %v2727_v38  ;;  %v2299_v0 = vsel %vm4629_vm14, 1.0, %v2727_v38  ;;  %v2286_v11 = vsel %vm4624_vm13, 1.0, %v2727_v38 }
 0x430   : > { %v2611_v44 = vpop.eup %2610  ;;  %v2061_v7 = vpack.c.bf16 %v2285_v5, %v2284_v56  ;;  %v2287_v59 = vsel %vm4623_vm7, 1.0, %v2727_v38  ;;  %v2300_v13 = vsel %vm4626_vm6, 1.0, %v2727_v38  ;;  %v2301_v14 = vsel %vm4625_vm5, 1.0, %v2727_v38  ;;  %v4691_v5 = vld [vmem:[#allocation49_spill] sm:$0xff] }
 0x431   : > { %v2613_v37 = vpop.eup %2612  ;;  %v2288_v15 = vsel %vm4620_vm11, 1.0, %v2727_v38  ;;  %vm4672_vm13 = vnez %v4372_v19  ;;  %vm4673_vm7 = vnez %v4407_v30  ;;  %vm4676_vm6 = vnez %v4376_v23 }
 0x432   : > { %v2302_v21 = vsel %vm4673_vm7, 1.0, %v2727_v38  ;;  %v2291_v30 = vsel %vm4676_vm6, 1.0, %v2727_v38  ;;  %vm4681_vm14 = vnez %v4382_v28  ;;  %vm4682_vm3 = vnez %v4380_v27 }
 0x433   : > { %vm4683_vm0 = vnez %v4637_v29 }
 0x434   : > { %v2306_v32 = vsel %vm4683_vm0, 1.0, %v2727_v38 }
 0x436   : > { %v2615_v42 = vpop.eup %2614 }
 0x437   : > { %v2617_v33 = vpop.eup %2616  ;;  %v1706_v45 = vmul.f32 %v2615_v42, %v2611_v44  ;;  %v2068_v44 = vpack.c.bf16 %v2299_v0, %v2298_v12  ;;  %v2062_v42 = vpack.c.bf16 %v2287_v59, %v2286_v11  ;;  %v4695_v0 = vld [vmem:[#allocation42_spill] sm:$0xff]  ;;  %v4697_v11 = vld [vmem:[#allocation52_spill] sm:$0xff] }
 0x438   : > { %v2619_v18 = vpop.eup %2618  ;;  %v1705_v58 = vmul.f32 %v2617_v33, %v2613_v37  ;;  %v1766_v37 = vld [vmem:[%s2805_s10 + $0x68] sm:$0xff]  ;;  %v2289_v33 = vsel %vm4672_vm13, 1.0, %v2727_v38  ;;  %vm4698_vm13 = vnez %v4697_v11 }
 0x439   : > { %v2621_v34 = vpop.eup %2620  ;;  %v1738_v51 = vsel %vm1674_vm15, %v1706_v45, 0.0  ;;  %v2069_v45 = vpack.c.bf16 %v2301_v14, %v2300_v13  ;;  %v2063_v19 = vpack.c.bf16 %v2289_v33, %v2288_v15  ;;  %v2310_v59 = vsel %vm4698_vm13, 1.0, %v2727_v38  ;;  %v1777_v13 = vld [vmem:[%s2805_s10 + $0xc0] sm:$0xff]  ;;  %v1778_v14 = vld [vmem:[%s2805_s10 + $0xc8] sm:$0xff] }
 0x43a   : > { %v2623_v54 = vpop.eup %2622  ;;  %v1737_v63 = vsel %vm1673_vm12, %v1705_v58, 0.0  ;;  %1872 = vperm.xlu0 %2496, %v1738_v51   ;;  %vm4692_vm12 = vnez %v4691_v5 }
 0x43b   : > { %v2625_v1 = vpop.eup %2624  ;;  %1867 = vperm.xlu1 %2497, %v1737_v63   ;;  %v1690_v31 = vmul.f32 %v2623_v54, %v2619_v18  ;;  %v1779_v54 = vld [vmem:[%s2805_s10 + $0xd0] sm:$0xff] }
 0x43c   : > { %v1689_v47 = vmul.f32 %v2625_v1, %v2621_v34  ;;  %v4674_v34 = vld [vmem:[#allocation44_spill] sm:$0xff]  ;;  %v2290_v1 = vsel %vm4640_vm1, 1.0, %v2727_v38  ;;  %vm4684_vm1 = vnez %v4635_v10  ;;  %v4689_v10 = vld [vmem:[#allocation50_spill] sm:$0xff] }
 0x43d   : > { %v1722_v17 = vsel %vm1658_vm8, %v1690_v31, 0.0  ;;  %vm4675_vm2 = vnez %v4674_v34  ;;  %v2064_v23 = vpack.c.bf16 %v2291_v30, %v2290_v1  ;;  %v2307_v28 = vsel %vm4684_vm1, 1.0, %v2727_v38  ;;  %v1761_v34 = vld [vmem:[%s2805_s10 + $0x40] sm:$0xff] }
 0x43e   : > { %v1721_v53 = vsel %vm1657_vm10, %v1689_v47, 0.0  ;;  %1792 = vperm.xlu0 %2496, %v1722_v17   ;;  %v2303_v51 = vsel %vm4675_vm2, 1.0, %v2727_v38  ;;  %v2072_v29 = vpack.c.bf16 %v2307_v28, %v2306_v32  ;;  %vm4690_vm15 = vnez %v4689_v10  ;;  %v1757_v32 = vld [vmem:[%s2805_s10 + $0x20] sm:$0xff]  ;;  %v1758_v28 = vld [vmem:[%s2805_s10 + $0x28] sm:$0xff]  ;;  %v1772_v10 = vld [vmem:[%s2805_s10 + $0x98] sm:$0xff] }
 0x43f   : > { %1787 = vperm.xlu1 %2497, %v1721_v53   ;;  %v2070_v17 = vpack.c.bf16 %v2303_v51, %v2302_v21  ;;  %v2308_v56 = vsel %vm4690_vm15, 1.0, %v2727_v38  ;;  %vm4696_vm10 = vnez %v4695_v0  ;;  %v1762_v51 = vld [vmem:[%s2805_s10 + $0x48] sm:$0xff] }
 0x445   : > { %v1938_v48 = vpop.permute.xlu0 %1937 }
 0x446   : > { %v1943_v9 = vpop.permute.xlu1 %1942  ;;  %v1975_v62 = vmul.f32 %v1938_v48, %v1783_v40  ;;  %v4677_v40 = vld [vmem:[#allocation46_spill] sm:$0xff]  ;;  %v4679_v48 = vld [vmem:[#allocation45_spill] sm:$0xff] }
 0x447   : > { %v1976_v61 = vmul.f32 %v1943_v9, %v1784_v55  ;;  %vm4678_vm5 = vnez %v4677_v40  ;;  %vm4680_vm4 = vnez %v4679_v48  ;;  %v1760_v48 = vld [vmem:[%s2805_s10 + $0x38] sm:$0xff] }
 0x448   : > { %v2304_v9 = vsel %vm4678_vm5, 1.0, %v2727_v38  ;;  %v2305_v24 = vsel %vm4680_vm4, 1.0, %v2727_v38 }
 0x449   : > { %v1992_v52 = vpack.c.bf16 %v1976_v61, %v1975_v62  ;;  %v1763_v61 = vld [vmem:[%s2805_s10 + $0x50] sm:$0xff]  ;;  %v1764_v62 = vld [vmem:[%s2805_s10 + $0x58] sm:$0xff] }
 0x44a   : > { %v1858_v4 = vpop.permute.xlu1 %1857 }
 0x44b   : > { %2320 = vmatprep.subr.bf16.mxu0 %v1992_v52  ;;  %2348 = vmatprep.subr.bf16.mxu1 %v1992_v52  ;;  %v1959_v3 = vmul.f32 %v1858_v4, %v1767_v43  ;;  %v2292_v4 = vsel %vm4681_vm14, 1.0, %v2727_v38  ;;  %v2293_v43 = vsel %vm4682_vm3, 1.0, %v2727_v38 }
 0x44c   : > { %v2065_v41 = vpack.c.bf16 %v2293_v43, %v2292_v4  ;;  %v1773_v43 = vld [vmem:[%s2805_s10 + $0xa0] sm:$0xff] }
 0x44e   : > { %v1863_v46 = vpop.permute.xlu1 %1862 }
 0x44f   : > { %v1960_v25 = vmul.f32 %v1863_v46, %v1768_v26 }
 0x451   : > { %v1984_v60 = vpack.c.bf16 %v1960_v25, %v1959_v3  ;;  %v2071_v3 = vpack.c.bf16 %v2305_v24, %v2304_v9  ;;  %v1759_v9 = vld [vmem:[%s2805_s10 + $0x30] sm:$0xff] }
 0x453   : > { %2321 = vmatpush3.bf16.msra.mxu0 %v1984_v60  ;;  %2356 = vmatpush3.bf16.msra.mxu1 %v1984_v60 }
 0x456   : > { %v1928_v36 = vpop.permute.xlu1 %1927 }
 0x457   : > { %v1973_v8 = vmul.f32 %v1928_v36, %v1781_v57  ;;  %v4685_v36 = vld [vmem:[#allocation41_spill] sm:$0xff] }
 0x458   : > { %vm4686_vm11 = vnez %v4685_v36 }
 0x459   : > { %v2294_v57 = vsel %vm4686_vm11, 1.0, %v2727_v38 }
 0x45a   : > { %v1933_v35 = vpop.permute.xlu1 %1932 }
 0x45b   : > { %v1974_v6 = vmul.f32 %v1933_v35, %v1782_v39  ;;  %v4687_v39 = vld [vmem:[#allocation40_spill] sm:$0xff]  ;;  %v2309_v35 = vsel %vm4692_vm12, 1.0, %v2727_v38 }
 0x45c   : > { %2076 = vxpose.xlu0.c.b16.start [1/8] (narrow) %v2060_v50, 32  ;;  %vm4688_vm9 = vnez %v4687_v39 }
 0x45d   : > { %v1991_v49 = vpack.c.bf16 %v1974_v6, %v1973_v8  ;;  %v2295_v50 = vsel %vm4688_vm9, 1.0, %v2727_v38  ;;  %v4693_v6 = vld [vmem:[#allocation43_spill] sm:$0xff] }
 0x45e   : > { %v1848_v2 = vpop.permute.xlu1 %1847  ;;  %v2066_v8 = vpack.c.bf16 %v2295_v50, %v2294_v57  ;;  %vm4694_vm8 = vnez %v4693_v6  ;;  %v1755_v6 = vld [vmem:[%s2805_s10 + $0x10] sm:$0xff] }
 0x45f   : > { %2322 = vmatprep.subr.bf16.mxu0 %v1991_v49  ;;  %2349 = vmatprep.subr.bf16.mxu1 %v1991_v49  ;;  %v1957_v18 = vmul.f32 %v1848_v2, %v1765_v16  ;;  %v2296_v12 = vsel %vm4694_vm8, 1.0, %v2727_v38  ;;  %v2073_v49 = vpack.c.bf16 %v2309_v35, %v2308_v56  ;;  %v4699_v2 = vld [vmem:[#allocation51_spill] sm:$0xff] }
 0x460   : > { %2077 = vxpose.xlu0.c.b16.cont [2/8] (narrow) %v2061_v7, 32  ;;  %v2297_v7 = vsel %vm4696_vm10, 1.0, %v2727_v38  ;;  %vm4700_vm7 = vnez %v4699_v2 }
 0x461   : > { %v2067_v16 = vpack.c.bf16 %v2297_v7, %v2296_v12  ;;  %v1756_v12 = vld [vmem:[%s2805_s10 + $0x18] sm:$0xff] }
 0x462   : > { %v1853_v22 = vpop.permute.xlu1 %1852  ;;  %2092 = vxpose.xlu1.c.b16.start [1/8] (narrow) %v2068_v44, 32  ;;  %v2311_v44 = vsel %vm4700_vm7, 1.0, %v2727_v38 }
 0x463   : > { %v1958_v58 = vmul.f32 %v1853_v22, %v1766_v37  ;;  %v2074_v15 = vpack.c.bf16 %v2311_v44, %v2310_v59  ;;  %v1770_v44 = vld [vmem:[%s2805_s10 + $0x88] sm:$0xff] }
 0x464   : > { %2078 = vxpose.xlu0.c.b16.cont [3/8] (narrow) %v2062_v42, 32 }
 0x465   : > { %v1983_v63 = vpack.c.bf16 %v1958_v58, %v1957_v18  ;;  %v1923_v47 = vpop.permute.xlu0 %1922  ;;  %v4703_v58 = vld [vmem:[#allocation53_spill] sm:$0xff] }
 0x466   : > { %v1918_v31 = vpop.permute.xlu1 %1917  ;;  %2093 = vxpose.xlu1.c.b16.cont [2/8] (narrow) %v2069_v45, 32  ;;  %v1972_v55 = vmul.f32 %v1923_v47, %v1780_v20  ;;  %v4701_v45 = vld [vmem:[#allocation54_spill] sm:$0xff]  ;;  %vm4704_vm6 = vnez %v4703_v58  ;;  %v1776_v47 = vld [vmem:[%s2805_s10 + $0xb8] sm:$0xff] }
 0x467   : > { %v1971_v53 = vmul.f32 %v1918_v31, %v1779_v54  ;;  %2323 = vmatpush3.bf16.msra.mxu0 %v1983_v63  ;;  %2357 = vmatpush3.bf16.msra.mxu1 %v1983_v63  ;;  %vm4702_vm2 = vnez %v4701_v45  ;;  %v2313_v21 = vsel %vm4704_vm6, 1.0, %v2727_v38 }
 0x468   : > { %2079 = vxpose.xlu0.c.b16.cont [4/8] (narrow) %v2063_v19, 32  ;;  %v2312_v18 = vsel %vm4702_vm2, 1.0, %v2727_v38  ;;  %v1775_v38 = vld [vmem:[%s2805_s10 + $0xb0] sm:$0xff] }
 0x469   : > { %v1990_v52 = vpack.c.bf16 %v1972_v55, %v1971_v53  ;;  %v1843_v46 = vpop.permute.xlu0 %1842  ;;  %v2075_v63 = vpack.c.bf16 %v2313_v21, %v2312_v18 }
 0x46a   : > { %v1838_v26 = vpop.permute.xlu1 %1837  ;;  %2094 = vxpose.xlu1.c.b16.cont [3/8] (narrow) %v2070_v17, 32  ;;  %v1956_v60 = vmul.f32 %v1843_v46, %v1764_v62 }
 0x46b   : > { %v1955_v25 = vmul.f32 %v1838_v26, %v1763_v61  ;;  %2324 = vmatprep.subr.bf16.mxu0 %v1990_v52  ;;  %2350 = vmatprep.subr.bf16.mxu1 %v1990_v52  ;;  %v1774_v26 = vld [vmem:[%s2805_s10 + $0xa8] sm:$0xff] }
 0x46c   : > { %2080 = vxpose.xlu0.c.b16.cont [5/8] (narrow) %v2064_v23, 32 }
 0x46d   : > { %v1982_v27 = vpack.c.bf16 %v1956_v60, %v1955_v25 }
 0x46e   : > { %2095 = vxpose.xlu1.c.b16.cont [4/8] (narrow) %v2071_v3, 32 }
 0x46f   : > { %2325 = vmatpush3.bf16.msra.mxu0 %v1982_v27  ;;  %2358 = vmatpush3.bf16.msra.mxu1 %v1982_v27 }
 0x470   : > { %2081 = vxpose.xlu0.c.b16.cont [6/8] (narrow) %v2065_v41, 32 }
 0x472   : > { %2096 = vxpose.xlu1.c.b16.cont [5/8] (narrow) %v2072_v29, 32  ;;  %v1771_v29 = vld [vmem:[%s2805_s10 + $0x90] sm:$0xff] }
 0x474   : > { %2082 = vxpose.xlu0.c.b16.cont [7/8] (narrow) %v2066_v8, 32 }
 0x475   : > { %v1913_v42 = vpop.permute.xlu0 %1912 }
 0x476   : > { %v1908_v37 = vpop.permute.xlu1 %1907  ;;  %2097 = vxpose.xlu1.c.b16.cont [6/8] (narrow) %v2073_v49, 32  ;;  %v1970_v22 = vmul.f32 %v1913_v42, %v1778_v14 }
 0x477   : > { %v1969_v33 = vmul.f32 %v1908_v37, %v1777_v13  ;;  %v1769_v13 = vld [vmem:[%s2805_s10 + $0x80] sm:$0xff] }
 0x478   : > { %2083 = vxpose.xlu0.c.b16.end [8/8] (narrow) %v2067_v16, 32 }
 0x479   : > { %v1989_v54 = vpack.c.bf16 %v1970_v22, %v1969_v33  ;;  %v1833_v19 = vpop.permute.xlu0 %1832  ;;  %v1753_v33 = vld [vmem:[%s2805_s10] sm:$0xff] }
 0x47a   : > { %v1828_v20 = vpop.permute.xlu1 %1827  ;;  %2098 = vxpose.xlu1.c.b16.cont [7/8] (narrow) %v2074_v15, 32  ;;  %v1954_v30 = vmul.f32 %v1833_v19, %v1762_v51  ;;  %v1754_v15 = vld [vmem:[%s2805_s10 + $0x8] sm:$0xff] }
 0x47b   : > { %v1953_v1 = vmul.f32 %v1828_v20, %v1761_v34  ;;  %2326 = vmatprep.subr.bf16.mxu0 %v1989_v54  ;;  %2351 = vmatprep.subr.bf16.mxu1 %v1989_v54 }
 0x47d   : > { %v1981_v31 = vpack.c.bf16 %v1954_v30, %v1953_v1  ;;  %v1993_v1 = vld [vmem:[#allocation3] sm:$0xff] }
 0x47e   : > { %2099 = vxpose.xlu1.c.b16.end [8/8] (narrow) %v2075_v63, 32 }
 0x47f   : > { %2327 = vmatpush3.bf16.msra.mxu0 %v1981_v31  ;;  %2359 = vmatpush3.bf16.msra.mxu1 %v1981_v31 }
 0x485   : > { %v1903_v53 = vpop.permute.xlu0 %1902 }
 0x486   : > { %v1898_v17 = vpop.permute.xlu1 %1897  ;;  %v1968_v40 = vmul.f32 %v1903_v53, %v1776_v47  ;;  %v1994_v53 = vld [vmem:[#allocation3 + $0x8] sm:$0xff] }
 0x487   : > { %v1967_v55 = vmul.f32 %v1898_v17, %v1775_v38 }
 0x489   : > { %v1988_v24 = vpack.c.bf16 %v1968_v40, %v1967_v55  ;;  %v1823_v62 = vpop.permute.xlu0 %1822  ;;  %v1995_v40 = vld [vmem:[#allocation3 + $0x10] sm:$0xff] }
 0x48a   : > { %v1818_v61 = vpop.permute.xlu1 %1817  ;;  %v1952_v52 = vmul.f32 %v1823_v62, %v1760_v48 }
 0x48b   : > { %v1951_v23 = vmul.f32 %v1818_v61, %v1759_v9  ;;  %2328 = vmatprep.subr.bf16.mxu0 %v1988_v24  ;;  %2352 = vmatprep.subr.bf16.mxu1 %v1988_v24 }
 0x48d   : > { %v1980_v4 = vpack.c.bf16 %v1952_v52, %v1951_v23 }
 0x48f   : > { %2329 = vmatpush3.bf16.msra.mxu0 %v1980_v4  ;;  %2360 = vmatpush3.bf16.msra.mxu1 %v1980_v4 }
 0x495   : > { %v1893_v3 = vpop.permute.xlu0 %1892 }
 0x496   : > { %v1888_v46 = vpop.permute.xlu1 %1887  ;;  %v1966_v60 = vmul.f32 %v1893_v3, %v1774_v26 }
 0x497   : > { %v1965_v25 = vmul.f32 %v1888_v46, %v1773_v43 }
 0x499   : > { %v1987_v41 = vpack.c.bf16 %v1966_v60, %v1965_v25  ;;  %v1813_v36 = vpop.permute.xlu0 %1812 }
 0x49a   : > { %v1808_v27 = vpop.permute.xlu1 %1807  ;;  %v1950_v39 = vmul.f32 %v1813_v36, %v1758_v28 }
 0x49b   : > { %v1949_v57 = vmul.f32 %v1808_v27, %v1757_v32  ;;  %2330 = vmatprep.subr.bf16.mxu0 %v1987_v41  ;;  %2353 = vmatprep.subr.bf16.mxu1 %v1987_v41 }
 0x49d   : > { %v1979_v50 = vpack.c.bf16 %v1950_v39, %v1949_v57 }
 0x49f   : > { %2331 = vmatpush3.bf16.msra.mxu0 %v1979_v50  ;;  %2361 = vmatpush3.bf16.msra.mxu1 %v1979_v50 }
 0x4a5   : > { %v1883_v5 = vpop.permute.xlu0 %1882 }
 0x4a6   : > { %v1878_v56 = vpop.permute.xlu1 %1877  ;;  %v1964_v8 = vmul.f32 %v1883_v5, %v1772_v10 }
 0x4a7   : > { %v1963_v35 = vmul.f32 %v1878_v56, %v1771_v29 }
 0x4a9   : > { %v1986_v0 = vpack.c.bf16 %v1964_v8, %v1963_v35  ;;  %v1803_v49 = vpop.permute.xlu0 %1802 }
 0x4aa   : > { %v1798_v7 = vpop.permute.xlu1 %1797  ;;  %v1948_v59 = vmul.f32 %v1803_v49, %v1756_v12 }
 0x4ab   : > { %v1947_v11 = vmul.f32 %v1798_v7, %v1755_v6  ;;  %2332 = vmatprep.subr.bf16.mxu0 %v1986_v0  ;;  %2354 = vmatprep.subr.bf16.mxu1 %v1986_v0 }
 0x4ad   : > { %v1978_v2 = vpack.c.bf16 %v1948_v59, %v1947_v11 }
 0x4af   : > { %2333 = vmatpush3.bf16.msra.mxu0 %v1978_v2  ;;  %2362 = vmatpush3.bf16.msra.mxu1 %v1978_v2 }
 0x4b5   : > { %v1873_v14 = vpop.permute.xlu0 %1872 }
 0x4b6   : > { %v1868_v16 = vpop.permute.xlu1 %1867  ;;  %v1962_v37 = vmul.f32 %v1873_v14, %v1770_v44 }
 0x4b7   : > { %v1961_v42 = vmul.f32 %v1868_v16, %v1769_v13 }
 0x4b9   : > { %v1985_v22 = vpack.c.bf16 %v1962_v37, %v1961_v42  ;;  %v1793_v45 = vpop.permute.xlu0 %1792 }
 0x4ba   : > { %v1788_v18 = vpop.permute.xlu1 %1787  ;;  %v1946_v58 = vmul.f32 %v1793_v45, %v1754_v15 }
 0x4bb   : > { %v1945_v21 = vmul.f32 %v1788_v18, %v1753_v33  ;;  %2334 = vmatprep.subr.bf16.mxu0 %v1985_v22  ;;  %2355 = vmatprep.subr.bf16.mxu1 %v1985_v22 }
 0x4bd   : > { %v1977_v34 = vpack.c.bf16 %v1946_v58, %v1945_v21 }
 0x4be   : > { %v2084_v51 = vpop.trf.xlu0 }
 0x4bf   : > { %2335 = vmatpush3.bf16.msra.mxu0 %v1977_v34  ;;  %2363 = vmatpush3.bf16.msra.mxu1 %v1977_v34 }
 0x4c2   : > { %v2085_v20 = vpop.trf.xlu0 }
 0x4c4   : > { %v2100_v54 = vpop.trf.xlu1 }
 0x4c5   : > { %2140 = vmatprep.mubr.bf16.mxu0 %v2100_v54 }
 0x4c6   : > { %2141 = vmatmul.mubr.bf16.vlgmr.msra.gmra.mxu0 %v2084_v51 }
 0x4c8   : > { %v2101_v19 = vpop.trf.xlu1 }
 0x4c9   : > { %2148 = vmatprep.mubr.bf16.mxu1 %v2101_v19 }
 0x4ca   : > { %2149 = vmatmul.mubr.bf16.vlgmr.msra.gmra.mxu1 %v2085_v20 }
 0x586   : > { %v2336_v63 = vpop.f32.mrf.mxu0 }
 0x588   : > { %v2337_v30 = vpop.f32.mrf.mxu0 }
 0x589   : > { %v2338_v31 = vadd.f32 %v2337_v30, %v2336_v63 }
 0x58a   : > { %v2339_v38 = vpop.f32.mrf.mxu0  ;;  %v2342_v47 = vpop.f32.mrf.mxu1 }
 0x58b   : > { %v2156_v17 = vadd.f32 %v2338_v31, %v1993_v1 }
 0x58c   : > { %v2340_v55 = vpop.f32.mrf.mxu0  ;;  %v2343_v9 = vpop.f32.mrf.mxu1 }
 0x58d   : > { %2159 = vst [vmem:[#allocation3] sm:$0xff] %v2156_v17  ;;  %v2341_v48 = vadd.f32 %v2340_v55, %v2339_v38  ;;  %v2344_v24 = vadd.f32 %v2343_v9, %v2342_v47 }
 0x58e   : > { %v2345_v61 = vpop.f32.mrf.mxu1 }
 0x58f   : > { %v2157_v62 = vadd.f32 %v2341_v48, %v1994_v53  ;;  %v2158_v23 = vadd.f32 %v2344_v24, %v1995_v40 }
 0x590   : > { %v2346_v52 = vpop.f32.mrf.mxu1 }
 0x591   : > { %2160 = vst [vmem:[#allocation3 + $0x8] sm:$0xff] %v2157_v62  ;;  %2161 = vst [vmem:[#allocation3 + $0x10] sm:$0xff] %v2158_v23 }
 0x592 PF: > { %p4131_p12 = scmp.eq.s32.totalorder %s2268_s20, 5  ;;  %s2728_s12 = smov [#allocation3]  }
 0x593   : > { %s2168_s13 = sshll.u32 %s2728_s12, 4  ;;  %s2169_s13 = int_to_ptr.vmem [resolvable:$true] %s2168_s13 }
 0x594   : > { %s2626_s14 = scalar_lea.vmem %s2169_s13, 384  ;;  %p2633_p2 = scmp.lt.s32.totalorder %s2169_s13, %s2169_s13 }
 0x595   : > { %p2627_p13 = scmp.ne.s32.totalorder %s2169_s13, %s2626_s14  ;;  %p2634_p3 = scmp.lt.s32.totalorder %s2626_s14, %s2626_s14 }
 0x597   : > { %p2628_p0 = pnand %p2627_p13, %p4131_p12  ;;  %p2635_p4 = por %p2634_p3, %p2633_p2 }
 0x599   : > { %p2629_p1 = pneg %p2628_p0 }
 0x59b   : > { %p2636_p5 = pnand %p2635_p4, %p2629_p1 }
 0x59d   : > { %2639 = shalt.err (!%p2636_p5)
}
 0x59e   : > { %s2729_s15 = smov 128   ;;  %s2730_s16 = smov 8  }
 0x59f   : > { %2365 = dma.vmem_to_hbm [thread:$0]  (%p4131_p12), %s2169_s13, 384, %s4175_s3, [#allocation4], %s2729_s15, %s2729_s15, %s2730_s16  }
 0x5a0   : > { %s2731_s24 = smov [#allocation5]  }
 0x5a1   : > { %s2182_s25 = sshll.u32 %s2731_s24, 4  ;;  %s2183_s25 = int_to_ptr.vmem [resolvable:$true] %s2182_s25 }
 0x5a2   : > { %s2650_s26 = scalar_lea.vmem %s2183_s25, 16  ;;  %s2656_s27 = scalar_lea.vmem %s2183_s25, 32 }
 0x5a3   : > { %p2651_p6 = scmp.ne.s32.totalorder %s2183_s25, %s2650_s26  ;;  %p2657_p9 = scmp.lt.s32.totalorder %s2183_s25, %s2183_s25 }
 0x5a4   : > { %p2658_p10 = scmp.lt.s32.totalorder %s2656_s27, %s2650_s26 }
 0x5a5   : > { %p2652_p7 = pnand %p2651_p6, %p4131_p12 }
 0x5a6   : > { %p2659_p11 = por %p2658_p10, %p2657_p9 }
 0x5a7   : > { %p2653_p8 = pneg %p2652_p7 }
 0x5a9   : > { %p2660_p13 = pnand %p2659_p11, %p2653_p8 }
 0x5ab   : > { %2663 = shalt.err (!%p2660_p13)
}
 0x5ac   : > { %2367 = dma.vmem_to_hbm [thread:$0]  (%p4131_p12), %s2183_s25, 16, %s4176_s4, [#allocation6]  }
 0x5ad   : > { %2695 = dma.done.wait (%p4131_p12), [#allocation4], 384  }
 0x5ae   : > { %2697 = vsyncadd (%p4131_p12), [#allocation4], 4294966912 }
 0x5af   : > { %2699 = dma.done.wait (%p4131_p12), [#allocation6], 16  }
 0x5b0   : > { %2701 = vsyncadd (%p4131_p12), [#allocation6], 4294967280 }
 0x5b1 PF: > { %s17_s19 = sadd.s32 1, %s2720_s19   ;;  %s4706_s15 = smov %s2712_s17 }
 0x5b2   : > { %p14_p0 = scmp.ge.s32.totalorder %s17_s19, 8   ;;  %s4707_s16 = smov %s2716_s18 }
 0x5b3   : > { %s4708_s17 = smov %s4711_s21  ;;  %s4709_s18 = smov %s4715_s22 }
 0x5b4   :  { %16 = sbr.rel (!%p14_p0) target bundleno = 4 (0x4), region = 85 }
 0x5b9   :  { %2199 = vsyncpa [#allocation4], 1 }
 0x5ba   :  { %2201 = vsyncpa [#allocation4 + $0x1], 1 }
 0x5bb   :  { %2202 = vsyncpa [#allocation6], 1 }

</bundles_post_ra>
